<compile_context>
chip_gen: v7x
topology: tpu7x:2x2x1
jax: 0.10.0
libtpu: 0.0.40
codegen_flags: <defaults>
</compile_context>

<pallas_src>
import functools

import jax
import jax.numpy as jnp
from jax.experimental import pallas as pl
from jax.experimental.pallas import tpu as pltpu


# -----------------------------------------------------------------------------
# Fully fused, interleaved forward kernel (single invocation, VMEM-resident).
#
# refs layout (positional):
#   inputs : a (T,N,N), x_flat (TN,F0), w0 (F0,F1), w1 (H1,F2),
#            then [wih_t, whh_t, bias] * n_l1   (LSTM stack 1),
#            then [wih_t, whh_t, bias] * n_l2   (LSTM stack 2)
#   outputs: out (TN, H2)
#   scratch: xw1   (TN, 4*H1)  -- hoisted LSTM1-layer0 input projection (+bias)
#            whhb  (HT, 4*HT)  -- blockdiag of all recurrent weights, HT = sum H
# -----------------------------------------------------------------------------
def _fused_kernel(*refs, T, N, H1, H2, n_l1, n_l2):
    f32 = jnp.float32
    n_in = 4 + 3 * (n_l1 + n_l2)
    a_ref, x_ref, w0_ref, w1_ref = refs[:4]
    lstm1 = [refs[4 + 3 * l: 4 + 3 * (l + 1)] for l in range(n_l1)]
    base2 = 4 + 3 * n_l1
    lstm2 = [refs[base2 + 3 * l: base2 + 3 * (l + 1)] for l in range(n_l2)]
    out_ref = refs[n_in]
    xw1_ref = refs[n_in + 1]
    whhb_ref = refs[n_in + 2]

    # ------------------------- prologue (runs once) --------------------------
    # (1) Block-diagonal recurrent weight matrix covering every LSTM layer of
    #     both stacks -> each interleaved step needs a single h@Whh MXU push.
    whhb_ref[...] = jnp.zeros_like(whhb_ref)
    row = col = 0
    for (_, whh_ref, _) in lstm1:
        whhb_ref[row:row + H1, col:col + 4 * H1] = whh_ref[...]
        row += H1
        col += 4 * H1
    for (_, whh_ref, _) in lstm2:
        whhb_ref[row:row + H2, col:col + 4 * H2] = whh_ref[...]
        row += H2
        col += 4 * H2

    # (2) GCN layer 1 per step + hoisted LSTM1-layer0 input projection
    #     (bias folded).  Stored in VMEM scratch so it is NOT pinned in vregs
    #     across the unrolled recurrence (re-read per step through the ref).
    xw0 = jnp.dot(x_ref[...], w0_ref[...], preferred_element_type=f32)  # (TN,F1)
    wih1_0 = lstm1[0][0][...]                                            # (F1,4H1)
    b1_0 = lstm1[0][2][...]                                              # (1, 4H1)
    for t in range(T):
        # TODO(synk): ctor activation (often nn.RReLU) fixed to ReLU.
        l1_t = jnp.maximum(
            jnp.dot(a_ref[t], xw0[t * N:(t + 1) * N, :],
                    preferred_element_type=f32), 0.0)
        xw1_ref[t * N:(t + 1) * N, :] = (
            jnp.dot(l1_t, wih1_0, preferred_element_type=f32) + b1_0)

    # Gate-nonlinearity constants (hoisted out of the loop; ~2 vregs each):
    # single sigmoid pass with affine fixup on the "g" lanes,
    # tanh(x) = 2*sigmoid(2x) - 1.
    def gate_consts(hidden):
        lane = jax.lax.broadcasted_iota(jnp.int32, (N, 4 * hidden), 1)
        is_g = (lane >= 2 * hidden) & (lane < 3 * hidden)
        mul = jnp.where(is_g, 2.0, 1.0).astype(f32)   # pre-scale == post-scale
        off = jnp.where(is_g, -1.0, 0.0).astype(f32)
        return mul, off

    gmul1, goff1 = gate_consts(H1)
    if H2 == H1:
        gmul2, goff2 = gmul1, goff1
    else:
        gmul2, goff2 = gate_consts(H2)

    def cell(gates, c_prev, hidden, gmul, goff):
        # sigmoid on (i,f,o) lanes, tanh on g lanes — ONE transcendental pass.
        act = (pl.reciprocal(1.0 + jnp.exp(-(gates * gmul)), approx=True)
               * gmul + goff)
        i_g = act[:, 0 * hidden:1 * hidden]
        f_g = act[:, 1 * hidden:2 * hidden]
        g_g = act[:, 2 * hidden:3 * hidden]
        o_g = act[:, 3 * hidden:4 * hidden]
        c_new = f_g * c_prev + i_g * g_g
        h_new = o_g * jnp.tanh(c_new)
        return h_new, c_new

    # ------------------- interleaved, skewed recurrence -----------------------
    # Iteration t: LSTM1 step t  ->  GCN2 step t  ->  LSTM2 step t-1.
    # (One extra iteration t == T flushes the last LSTM2 step.)
    h1 = [jnp.zeros((N, H1), f32) for _ in range(n_l1)]
    c1 = [jnp.zeros((N, H1), f32) for _ in range(n_l1)]
    h2 = [jnp.zeros((N, H2), f32) for _ in range(n_l2)]
    c2 = [jnp.zeros((N, H2), f32) for _ in range(n_l2)]
    hid_sizes = [H1] * n_l1 + [H2] * n_l2
    l2_prev = None

    for t in range(T + 1):
        # One fused recurrent matmul for every LSTM layer of both stacks.
        h_cat = jnp.concatenate(h1 + h2, axis=-1)                      # (N, HT)
        rec = jnp.dot(h_cat, whhb_ref[...], preferred_element_type=f32)
        rec_sl = []
        col = 0
        for hid in hid_sizes:
            rec_sl.append(rec[:, col:col + 4 * hid])
            col += 4 * hid

        if t < T:
            # ---- LSTM stack 1, time step t ----
            x_in = None
            for l in range(n_l1):
                if l == 0:
                    gates = xw1_ref[t * N:(t + 1) * N, :] + rec_sl[l]
                else:
                    gates = (jnp.dot(x_in, lstm1[l][0][...],
                                     preferred_element_type=f32)
                             + lstm1[l][2][...] + rec_sl[l])
                h1[l], c1[l] = cell(gates, c1[l], H1, gmul1, goff1)
                x_in = h1[l]
            # ---- GCN layer 2, time step t: relu(A[t] @ (h1 @ W1)) ----
            hw = jnp.dot(h1[-1], w1_ref[...], preferred_element_type=f32)
            l2_cur = jnp.maximum(
                jnp.dot(a_ref[t], hw, preferred_element_type=f32), 0.0)
        else:
            l2_cur = l2_prev

        if t >= 1:
            # ---- LSTM stack 2, time step t-1 (skewed by one) ----
            x_in = l2_prev
            for l in range(n_l2):
                gates = (jnp.dot(x_in, lstm2[l][0][...],
                                 preferred_element_type=f32)
                         + lstm2[l][2][...] + rec_sl[n_l1 + l])
                h2[l], c2[l] = cell(gates, c2[l], H2, gmul2, goff2)
                x_in = h2[l]
            out_ref[(t - 1) * N:t * N, :] = h2[-1]

        l2_prev = l2_cur


# -----------------------------------------------------------------------------
# Wrapper: no block-diag construction here anymore; everything goes straight
# into the single fused kernel.
# -----------------------------------------------------------------------------
@jax.jit
def sp_gcn_lstm_b_forward(A, X, params):
    T, N, _ = A.shape
    F0 = X.shape[-1]
    W0, W1 = params["w0"], params["w1"]
    lstm1, lstm2 = params["lstm1"], params["lstm2"]
    H1 = lstm1[0][1].shape[0]
    H2 = lstm2[0][1].shape[0]
    n_l1, n_l2 = len(lstm1), len(lstm2)
    TN = T * N
    HT = n_l1 * H1 + n_l2 * H2

    x_flat = X.reshape(TN, F0)

    flat_lstm = []
    for (wih_t, whh_t, b) in list(lstm1) + list(lstm2):
        flat_lstm += [wih_t, whh_t, b]

    kernel = functools.partial(
        _fused_kernel, T=T, N=N, H1=H1, H2=H2, n_l1=n_l1, n_l2=n_l2)

    vmem_spec = pl.BlockSpec(memory_space=pltpu.MemorySpace.VMEM)
    n_inputs = 4 + len(flat_lstm)
    out_flat = pl.pallas_call(
        kernel,
        out_shape=jax.ShapeDtypeStruct((TN, H2), jnp.float32),
        in_specs=[vmem_spec] * n_inputs,
        out_specs=vmem_spec,
        scratch_shapes=[
            pltpu.VMEM((TN, 4 * H1), jnp.float32),    # hoisted LSTM1 input proj
            pltpu.VMEM((HT, 4 * HT), jnp.float32),    # blockdiag recurrent W
        ],
    )(A, x_flat, W0, W1, *flat_lstm)
    return out_flat.reshape(T, N, H2)


# -----------------------------------------------------------------------------
# Deterministic parameter construction (mirrors module __init__ shapes)
# -----------------------------------------------------------------------------
def init_params(key, feats_per_node, layer_1_feats, layer_2_feats,
                lstm_l1_feats, lstm_l1_layers, lstm_l2_feats, lstm_l2_layers):
    assert lstm_l1_feats == layer_1_feats, \
        "forward() requires lstm_l1_feats == layer_1_feats (w_list[1] shape)"
    keys = jax.random.split(key, 16)
    ki = iter(keys)

    def uniform(k, shape, bound):
        return jax.random.uniform(k, shape, jnp.float32, -bound, bound)

    # u.reset_param: uniform(-1/sqrt(fan_out_dim), ...)
    w0 = uniform(next(ki), (feats_per_node, layer_1_feats),
                 1.0 / (layer_1_feats ** 0.5))
    w1 = uniform(next(ki), (layer_1_feats, layer_2_feats),
                 1.0 / (layer_2_feats ** 0.5))
    # W2 exists in __init__ but is unused in forward(); create it for fidelity.
    w2_unused = uniform(next(ki), (lstm_l1_feats, layer_2_feats),
                        1.0 / (layer_2_feats ** 0.5))

    def make_lstm(input_size, hidden, num_layers):
        layers = []
        bound = 1.0 / (hidden ** 0.5)
        in_sz = input_size
        for _ in range(num_layers):
            wih_t = uniform(next(ki), (in_sz, 4 * hidden), bound)     # = Wih^T
            whh_t = uniform(next(ki), (hidden, 4 * hidden), bound)    # = Whh^T
            b = (uniform(next(ki), (1, 4 * hidden), bound)
                 + uniform(next(ki), (1, 4 * hidden), bound))          # b_ih+b_hh
            layers.append((wih_t, whh_t, b))
            in_sz = hidden
        return layers

    return {
        "w0": w0,
        "w1": w1,
        "w2_unused": w2_unused,
        "lstm1": make_lstm(layer_1_feats, lstm_l1_feats, lstm_l1_layers),
        "lstm2": make_lstm(layer_2_feats, lstm_l2_feats, lstm_l2_layers),
    }


# -----------------------------------------------------------------------------
# Pure-JAX reference (for numerical sanity check)
# -----------------------------------------------------------------------------
def reference_forward(A, X, params):
    hp = jax.lax.Precision.HIGHEST

    def gcn(A, X, W):
        return jnp.maximum(
            jnp.einsum("tnm,tmf->tnf", A,
                       jnp.einsum("tmf,fg->tmg", X, W, precision=hp),
                       precision=hp), 0.0)

    def lstm(x_seq, layers):
        out = x_seq
        for (wih_t, whh_t, b) in layers:
            T, N, _ = out.shape
            H = whh_t.shape[0]

            def step(carry, x):
                h, c = carry
                gates = x @ wih_t + h @ whh_t + b
                i = jax.nn.sigmoid(gates[:, 0 * H:1 * H])
                f = jax.nn.sigmoid(gates[:, 1 * H:2 * H])
                g = jnp.tanh(gates[:, 2 * H:3 * H])
                o = jax.nn.sigmoid(gates[:, 3 * H:4 * H])
                c = f * c + i * g
                h = o * jnp.tanh(c)
                return (h, c), h

            init = (jnp.zeros((N, H), jnp.float32), jnp.zeros((N, H), jnp.float32))
            _, out = jax.lax.scan(step, init, out)
        return out

    l1 = gcn(A, X, params["w0"])
    o1 = lstm(l1, params["lstm1"])
    l2 = gcn(A, o1, params["w1"])
    return lstm(l2, params["lstm2"])


if __name__ == "__main__":
    # Small config consistent with the module's constraints.
    T = 8                 # number of graph snapshots (len(A_list))
    N = 16                # nodes per graph
    feats_per_node = 8
    layer_1_feats = 32
    layer_2_feats = 16
    lstm_l1_feats = 32    # must equal layer_1_feats (see forward of the module)
    lstm_l2_feats = 32
    lstm_l1_layers = 1
    lstm_l2_layers = 1

    key = jax.random.PRNGKey(0)
    k_a, k_x, k_p = jax.random.split(key, 3)

    # Build a deterministic dense "normalized adjacency" per time step.
    raw = jax.random.uniform(k_a, (T, N, N), jnp.float32)
    adj = (raw > 0.6).astype(jnp.float32)
    adj = jnp.maximum(adj, jnp.transpose(adj, (0, 2, 1)))          # symmetrize
    adj = adj + jnp.eye(N, dtype=jnp.float32)[None]                 # self-loops
    deg = jnp.sum(adj, axis=-1, keepdims=True)
    A = adj / deg                                                    # row-normalized Ahat

    X = jax.random.normal(k_x, (T, N, feats_per_node), jnp.float32)

    params = init_params(k_p, feats_per_node, layer_1_feats, layer_2_feats,
                         lstm_l1_feats, lstm_l1_layers,
                         lstm_l2_feats, lstm_l2_layers)

    out = sp_gcn_lstm_b_forward(A, X, params)
    out = jax.block_until_ready(out)

    ref = jax.block_until_ready(reference_forward(A, X, params))
    assert out.shape == (T, N, lstm_l2_feats), out.shape
    max_err = float(jnp.max(jnp.abs(out - ref)))
    assert max_err < 5e-3, f"max abs err too large: {max_err}"

    print("KERNEL_OK")
</pallas_src>

<mosaic_0001>
module attributes {stable_mosaic.version = 11 : i64} {
  func.func @_fused_kernel(%arg0: memref<8x16x16xf32, #tpu.memory_space<vmem>>, %arg1: memref<128x8xf32, #tpu.memory_space<vmem>>, %arg2: memref<8x32xf32, #tpu.memory_space<vmem>>, %arg3: memref<32x16xf32, #tpu.memory_space<vmem>>, %arg4: memref<32x128xf32, #tpu.memory_space<vmem>>, %arg5: memref<32x128xf32, #tpu.memory_space<vmem>>, %arg6: memref<1x128xf32, #tpu.memory_space<vmem>>, %arg7: memref<16x128xf32, #tpu.memory_space<vmem>>, %arg8: memref<32x128xf32, #tpu.memory_space<vmem>>, %arg9: memref<1x128xf32, #tpu.memory_space<vmem>>, %arg10: memref<128x32xf32, #tpu.memory_space<vmem>>, %arg11: memref<128x128xf32, #tpu.memory_space<vmem>>, %arg12: memref<64x256xf32, #tpu.memory_space<vmem>>) attributes {dimension_semantics = [], scalar_prefetch = 0 : i64, scratch_operands = 2 : i64, tpu.core_type = #tpu.core_type<tc>} {
    %cst = arith.constant 0.000000e+00 : f32
    %0 = vector.broadcast %cst : f32 to vector<64x256xf32>
    %c0 = arith.constant 0 : index
    %c0_0 = arith.constant 0 : index
    %1 = vector.load %arg12[%c0, %c0_0] : memref<64x256xf32, #tpu.memory_space<vmem>>, vector<64x256xf32>
    tpu.vector_store %arg12[%c0, %c0_0], %0 {strides = array<i32>} : memref<64x256xf32, #tpu.memory_space<vmem>>, vector<64x256xf32>,
    %c0_1 = arith.constant 0 : index
    %c0_2 = arith.constant 0 : index
    %2 = vector.load %arg5[%c0_1, %c0_2] : memref<32x128xf32, #tpu.memory_space<vmem>>, vector<32x128xf32>
    %c0_3 = arith.constant 0 : index
    %c0_4 = arith.constant 0 : index
    %3 = vector.load %arg12[%c0_3, %c0_4] : memref<64x256xf32, #tpu.memory_space<vmem>>, vector<32x128xf32>
    tpu.vector_store %arg12[%c0_3, %c0_4], %2 {strides = array<i32>} : memref<64x256xf32, #tpu.memory_space<vmem>>, vector<32x128xf32>,
    %c0_5 = arith.constant 0 : index
    %c0_6 = arith.constant 0 : index
    %4 = vector.load %arg8[%c0_5, %c0_6] : memref<32x128xf32, #tpu.memory_space<vmem>>, vector<32x128xf32>
    %c32 = arith.constant 32 : index
    %c128 = arith.constant 128 : index
    %5 = vector.load %arg12[%c32, %c128] : memref<64x256xf32, #tpu.memory_space<vmem>>, vector<32x128xf32>
    tpu.vector_store %arg12[%c32, %c128], %4 {strides = array<i32>} : memref<64x256xf32, #tpu.memory_space<vmem>>, vector<32x128xf32>,
    %c0_7 = arith.constant 0 : index
    %c0_8 = arith.constant 0 : index
    %6 = vector.load %arg1[%c0_7, %c0_8] : memref<128x8xf32, #tpu.memory_space<vmem>>, vector<128x8xf32>
    %c0_9 = arith.constant 0 : index
    %c0_10 = arith.constant 0 : index
    %7 = vector.load %arg2[%c0_9, %c0_10] : memref<8x32xf32, #tpu.memory_space<vmem>>, vector<8x32xf32>
    %cst_11 = arith.constant dense<0.000000e+00> : vector<128x32xf32>
    %8 = tpu.matmul %6, %7, %cst_11 {dimension_numbers = #tpu.dot_dimension_numbers<[1], [0], [0], [1], [0, 0, 1, 1], [], []>} : vector<128x8xf32>, vector<8x32xf32>, vector<128x32xf32> -> vector<128x32xf32>
    %c0_12 = arith.constant 0 : index
    %c0_13 = arith.constant 0 : index
    %9 = vector.load %arg4[%c0_12, %c0_13] : memref<32x128xf32, #tpu.memory_space<vmem>>, vector<32x128xf32>
    %c0_14 = arith.constant 0 : index
    %c0_15 = arith.constant 0 : index
    %10 = vector.load %arg6[%c0_14, %c0_15] : memref<1x128xf32, #tpu.memory_space<vmem>>, vector<1x128xf32>
    %c0_16 = arith.constant 0 : index
    %c0_17 = arith.constant 0 : index
    %c0_18 = arith.constant 0 : index
    %11 = vector.load %arg0[%c0_16, %c0_17, %c0_18] : memref<8x16x16xf32, #tpu.memory_space<vmem>>, vector<1x16x16xf32>
    %12 = vector.shape_cast %11 : vector<1x16x16xf32> to vector<16x16xf32>
    %13 = vector.extract_strided_slice %8 {offsets = [0, 0], sizes = [16, 32], strides = [1, 1]} : vector<128x32xf32> to vector<16x32xf32>
    %cst_19 = arith.constant dense<0.000000e+00> : vector<16x32xf32>
    %14 = tpu.matmul %12, %13, %cst_19 {dimension_numbers = #tpu.dot_dimension_numbers<[1], [0], [0], [1], [0, 0, 1, 1], [], []>} : vector<16x16xf32>, vector<16x32xf32>, vector<16x32xf32> -> vector<16x32xf32>
    %cst_20 = arith.constant 0.000000e+00 : f32
    %15 = vector.broadcast %cst_20 : f32 to vector<16x32xf32>
    %16 = arith.maximumf %14, %15 : vector<16x32xf32>
    %cst_21 = arith.constant dense<0.000000e+00> : vector<16x128xf32>
    %17 = tpu.matmul %16, %9, %cst_21 {dimension_numbers = #tpu.dot_dimension_numbers<[1], [0], [0], [1], [0, 0, 1, 1], [], []>} : vector<16x32xf32>, vector<32x128xf32>, vector<16x128xf32> -> vector<16x128xf32>
    %18 = vector.broadcast %10 : vector<1x128xf32> to vector<16x128xf32>
    %19 = arith.addf %17, %18 : vector<16x128xf32>
    %c0_22 = arith.constant 0 : index
    %c0_23 = arith.constant 0 : index
    %20 = vector.load %arg11[%c0_22, %c0_23] : memref<128x128xf32, #tpu.memory_space<vmem>>, vector<16x128xf32>
    tpu.vector_store %arg11[%c0_22, %c0_23], %19 {strides = array<i32>} : memref<128x128xf32, #tpu.memory_space<vmem>>, vector<16x128xf32>,
    %c1 = arith.constant 1 : index
    %c0_24 = arith.constant 0 : index
    %c0_25 = arith.constant 0 : index
    %21 = vector.load %arg0[%c1, %c0_24, %c0_25] : memref<8x16x16xf32, #tpu.memory_space<vmem>>, vector<1x16x16xf32>
    %22 = vector.shape_cast %21 : vector<1x16x16xf32> to vector<16x16xf32>
    %23 = vector.extract_strided_slice %8 {offsets = [16, 0], sizes = [16, 32], strides = [1, 1]} : vector<128x32xf32> to vector<16x32xf32>
    %cst_26 = arith.constant dense<0.000000e+00> : vector<16x32xf32>
    %24 = tpu.matmul %22, %23, %cst_26 {dimension_numbers = #tpu.dot_dimension_numbers<[1], [0], [0], [1], [0, 0, 1, 1], [], []>} : vector<16x16xf32>, vector<16x32xf32>, vector<16x32xf32> -> vector<16x32xf32>
    %cst_27 = arith.constant 0.000000e+00 : f32
    %25 = vector.broadcast %cst_27 : f32 to vector<16x32xf32>
    %26 = arith.maximumf %24, %25 : vector<16x32xf32>
    %cst_28 = arith.constant dense<0.000000e+00> : vector<16x128xf32>
    %27 = tpu.matmul %26, %9, %cst_28 {dimension_numbers = #tpu.dot_dimension_numbers<[1], [0], [0], [1], [0, 0, 1, 1], [], []>} : vector<16x32xf32>, vector<32x128xf32>, vector<16x128xf32> -> vector<16x128xf32>
    %28 = vector.broadcast %10 : vector<1x128xf32> to vector<16x128xf32>
    %29 = arith.addf %27, %28 : vector<16x128xf32>
    %c16 = arith.constant 16 : index
    %c0_29 = arith.constant 0 : index
    %30 = vector.load %arg11[%c16, %c0_29] : memref<128x128xf32, #tpu.memory_space<vmem>>, vector<16x128xf32>
    tpu.vector_store %arg11[%c16, %c0_29], %29 {strides = array<i32>} : memref<128x128xf32, #tpu.memory_space<vmem>>, vector<16x128xf32>,
    %c2 = arith.constant 2 : index
    %c0_30 = arith.constant 0 : index
    %c0_31 = arith.constant 0 : index
    %31 = vector.load %arg0[%c2, %c0_30, %c0_31] : memref<8x16x16xf32, #tpu.memory_space<vmem>>, vector<1x16x16xf32>
    %32 = vector.shape_cast %31 : vector<1x16x16xf32> to vector<16x16xf32>
    %33 = vector.extract_strided_slice %8 {offsets = [32, 0], sizes = [16, 32], strides = [1, 1]} : vector<128x32xf32> to vector<16x32xf32>
    %cst_32 = arith.constant dense<0.000000e+00> : vector<16x32xf32>
    %34 = tpu.matmul %32, %33, %cst_32 {dimension_numbers = #tpu.dot_dimension_numbers<[1], [0], [0], [1], [0, 0, 1, 1], [], []>} : vector<16x16xf32>, vector<16x32xf32>, vector<16x32xf32> -> vector<16x32xf32>
    %cst_33 = arith.constant 0.000000e+00 : f32
    %35 = vector.broadcast %cst_33 : f32 to vector<16x32xf32>
    %36 = arith.maximumf %34, %35 : vector<16x32xf32>
    %cst_34 = arith.constant dense<0.000000e+00> : vector<16x128xf32>
    %37 = tpu.matmul %36, %9, %cst_34 {dimension_numbers = #tpu.dot_dimension_numbers<[1], [0], [0], [1], [0, 0, 1, 1], [], []>} : vector<16x32xf32>, vector<32x128xf32>, vector<16x128xf32> -> vector<16x128xf32>
    %38 = vector.broadcast %10 : vector<1x128xf32> to vector<16x128xf32>
    %39 = arith.addf %37, %38 : vector<16x128xf32>
    %c32_35 = arith.constant 32 : index
    %c0_36 = arith.constant 0 : index
    %40 = vector.load %arg11[%c32_35, %c0_36] : memref<128x128xf32, #tpu.memory_space<vmem>>, vector<16x128xf32>
    tpu.vector_store %arg11[%c32_35, %c0_36], %39 {strides = array<i32>} : memref<128x128xf32, #tpu.memory_space<vmem>>, vector<16x128xf32>,
    %c3 = arith.constant 3 : index
    %c0_37 = arith.constant 0 : index
    %c0_38 = arith.constant 0 : index
    %41 = vector.load %arg0[%c3, %c0_37, %c0_38] : memref<8x16x16xf32, #tpu.memory_space<vmem>>, vector<1x16x16xf32>
    %42 = vector.shape_cast %41 : vector<1x16x16xf32> to vector<16x16xf32>
    %43 = vector.extract_strided_slice %8 {offsets = [48, 0], sizes = [16, 32], strides = [1, 1]} : vector<128x32xf32> to vector<16x32xf32>
    %cst_39 = arith.constant dense<0.000000e+00> : vector<16x32xf32>
    %44 = tpu.matmul %42, %43, %cst_39 {dimension_numbers = #tpu.dot_dimension_numbers<[1], [0], [0], [1], [0, 0, 1, 1], [], []>} : vector<16x16xf32>, vector<16x32xf32>, vector<16x32xf32> -> vector<16x32xf32>
    %cst_40 = arith.constant 0.000000e+00 : f32
    %45 = vector.broadcast %cst_40 : f32 to vector<16x32xf32>
    %46 = arith.maximumf %44, %45 : vector<16x32xf32>
    %cst_41 = arith.constant dense<0.000000e+00> : vector<16x128xf32>
    %47 = tpu.matmul %46, %9, %cst_41 {dimension_numbers = #tpu.dot_dimension_numbers<[1], [0], [0], [1], [0, 0, 1, 1], [], []>} : vector<16x32xf32>, vector<32x128xf32>, vector<16x128xf32> -> vector<16x128xf32>
    %48 = vector.broadcast %10 : vector<1x128xf32> to vector<16x128xf32>
    %49 = arith.addf %47, %48 : vector<16x128xf32>
    %c48 = arith.constant 48 : index
    %c0_42 = arith.constant 0 : index
    %50 = vector.load %arg11[%c48, %c0_42] : memref<128x128xf32, #tpu.memory_space<vmem>>, vector<16x128xf32>
    tpu.vector_store %arg11[%c48, %c0_42], %49 {strides = array<i32>} : memref<128x128xf32, #tpu.memory_space<vmem>>, vector<16x128xf32>,
    %c4 = arith.constant 4 : index
    %c0_43 = arith.constant 0 : index
    %c0_44 = arith.constant 0 : index
    %51 = vector.load %arg0[%c4, %c0_43, %c0_44] : memref<8x16x16xf32, #tpu.memory_space<vmem>>, vector<1x16x16xf32>
    %52 = vector.shape_cast %51 : vector<1x16x16xf32> to vector<16x16xf32>
    %53 = vector.extract_strided_slice %8 {offsets = [64, 0], sizes = [16, 32], strides = [1, 1]} : vector<128x32xf32> to vector<16x32xf32>
    %cst_45 = arith.constant dense<0.000000e+00> : vector<16x32xf32>
    %54 = tpu.matmul %52, %53, %cst_45 {dimension_numbers = #tpu.dot_dimension_numbers<[1], [0], [0], [1], [0, 0, 1, 1], [], []>} : vector<16x16xf32>, vector<16x32xf32>, vector<16x32xf32> -> vector<16x32xf32>
    %cst_46 = arith.constant 0.000000e+00 : f32
    %55 = vector.broadcast %cst_46 : f32 to vector<16x32xf32>
    %56 = arith.maximumf %54, %55 : vector<16x32xf32>
    %cst_47 = arith.constant dense<0.000000e+00> : vector<16x128xf32>
    %57 = tpu.matmul %56, %9, %cst_47 {dimension_numbers = #tpu.dot_dimension_numbers<[1], [0], [0], [1], [0, 0, 1, 1], [], []>} : vector<16x32xf32>, vector<32x128xf32>, vector<16x128xf32> -> vector<16x128xf32>
    %58 = vector.broadcast %10 : vector<1x128xf32> to vector<16x128xf32>
    %59 = arith.addf %57, %58 : vector<16x128xf32>
    %c64 = arith.constant 64 : index
    %c0_48 = arith.constant 0 : index
    %60 = vector.load %arg11[%c64, %c0_48] : memref<128x128xf32, #tpu.memory_space<vmem>>, vector<16x128xf32>
    tpu.vector_store %arg11[%c64, %c0_48], %59 {strides = array<i32>} : memref<128x128xf32, #tpu.memory_space<vmem>>, vector<16x128xf32>,
    %c5 = arith.constant 5 : index
    %c0_49 = arith.constant 0 : index
    %c0_50 = arith.constant 0 : index
    %61 = vector.load %arg0[%c5, %c0_49, %c0_50] : memref<8x16x16xf32, #tpu.memory_space<vmem>>, vector<1x16x16xf32>
    %62 = vector.shape_cast %61 : vector<1x16x16xf32> to vector<16x16xf32>
    %63 = vector.extract_strided_slice %8 {offsets = [80, 0], sizes = [16, 32], strides = [1, 1]} : vector<128x32xf32> to vector<16x32xf32>
    %cst_51 = arith.constant dense<0.000000e+00> : vector<16x32xf32>
    %64 = tpu.matmul %62, %63, %cst_51 {dimension_numbers = #tpu.dot_dimension_numbers<[1], [0], [0], [1], [0, 0, 1, 1], [], []>} : vector<16x16xf32>, vector<16x32xf32>, vector<16x32xf32> -> vector<16x32xf32>
    %cst_52 = arith.constant 0.000000e+00 : f32
    %65 = vector.broadcast %cst_52 : f32 to vector<16x32xf32>
    %66 = arith.maximumf %64, %65 : vector<16x32xf32>
    %cst_53 = arith.constant dense<0.000000e+00> : vector<16x128xf32>
    %67 = tpu.matmul %66, %9, %cst_53 {dimension_numbers = #tpu.dot_dimension_numbers<[1], [0], [0], [1], [0, 0, 1, 1], [], []>} : vector<16x32xf32>, vector<32x128xf32>, vector<16x128xf32> -> vector<16x128xf32>
    %68 = vector.broadcast %10 : vector<1x128xf32> to vector<16x128xf32>
    %69 = arith.addf %67, %68 : vector<16x128xf32>
    %c80 = arith.constant 80 : index
    %c0_54 = arith.constant 0 : index
    %70 = vector.load %arg11[%c80, %c0_54] : memref<128x128xf32, #tpu.memory_space<vmem>>, vector<16x128xf32>
    tpu.vector_store %arg11[%c80, %c0_54], %69 {strides = array<i32>} : memref<128x128xf32, #tpu.memory_space<vmem>>, vector<16x128xf32>,
    %c6 = arith.constant 6 : index
    %c0_55 = arith.constant 0 : index
    %c0_56 = arith.constant 0 : index
    %71 = vector.load %arg0[%c6, %c0_55, %c0_56] : memref<8x16x16xf32, #tpu.memory_space<vmem>>, vector<1x16x16xf32>
    %72 = vector.shape_cast %71 : vector<1x16x16xf32> to vector<16x16xf32>
    %73 = vector.extract_strided_slice %8 {offsets = [96, 0], sizes = [16, 32], strides = [1, 1]} : vector<128x32xf32> to vector<16x32xf32>
    %cst_57 = arith.constant dense<0.000000e+00> : vector<16x32xf32>
    %74 = tpu.matmul %72, %73, %cst_57 {dimension_numbers = #tpu.dot_dimension_numbers<[1], [0], [0], [1], [0, 0, 1, 1], [], []>} : vector<16x16xf32>, vector<16x32xf32>, vector<16x32xf32> -> vector<16x32xf32>
    %cst_58 = arith.constant 0.000000e+00 : f32
    %75 = vector.broadcast %cst_58 : f32 to vector<16x32xf32>
    %76 = arith.maximumf %74, %75 : vector<16x32xf32>
    %cst_59 = arith.constant dense<0.000000e+00> : vector<16x128xf32>
    %77 = tpu.matmul %76, %9, %cst_59 {dimension_numbers = #tpu.dot_dimension_numbers<[1], [0], [0], [1], [0, 0, 1, 1], [], []>} : vector<16x32xf32>, vector<32x128xf32>, vector<16x128xf32> -> vector<16x128xf32>
    %78 = vector.broadcast %10 : vector<1x128xf32> to vector<16x128xf32>
    %79 = arith.addf %77, %78 : vector<16x128xf32>
    %c96 = arith.constant 96 : index
    %c0_60 = arith.constant 0 : index
    %80 = vector.load %arg11[%c96, %c0_60] : memref<128x128xf32, #tpu.memory_space<vmem>>, vector<16x128xf32>
    tpu.vector_store %arg11[%c96, %c0_60], %79 {strides = array<i32>} : memref<128x128xf32, #tpu.memory_space<vmem>>, vector<16x128xf32>,
    %c7 = arith.constant 7 : index
    %c0_61 = arith.constant 0 : index
    %c0_62 = arith.constant 0 : index
    %81 = vector.load %arg0[%c7, %c0_61, %c0_62] : memref<8x16x16xf32, #tpu.memory_space<vmem>>, vector<1x16x16xf32>
    %82 = vector.shape_cast %81 : vector<1x16x16xf32> to vector<16x16xf32>
    %83 = vector.extract_strided_slice %8 {offsets = [112, 0], sizes = [16, 32], strides = [1, 1]} : vector<128x32xf32> to vector<16x32xf32>
    %cst_63 = arith.constant dense<0.000000e+00> : vector<16x32xf32>
    %84 = tpu.matmul %82, %83, %cst_63 {dimension_numbers = #tpu.dot_dimension_numbers<[1], [0], [0], [1], [0, 0, 1, 1], [], []>} : vector<16x16xf32>, vector<16x32xf32>, vector<16x32xf32> -> vector<16x32xf32>
    %cst_64 = arith.constant 0.000000e+00 : f32
    %85 = vector.broadcast %cst_64 : f32 to vector<16x32xf32>
    %86 = arith.maximumf %84, %85 : vector<16x32xf32>
    %cst_65 = arith.constant dense<0.000000e+00> : vector<16x128xf32>
    %87 = tpu.matmul %86, %9, %cst_65 {dimension_numbers = #tpu.dot_dimension_numbers<[1], [0], [0], [1], [0, 0, 1, 1], [], []>} : vector<16x32xf32>, vector<32x128xf32>, vector<16x128xf32> -> vector<16x128xf32>
    %88 = vector.broadcast %10 : vector<1x128xf32> to vector<16x128xf32>
    %89 = arith.addf %87, %88 : vector<16x128xf32>
    %c112 = arith.constant 112 : index
    %c0_66 = arith.constant 0 : index
    %90 = vector.load %arg11[%c112, %c0_66] : memref<128x128xf32, #tpu.memory_space<vmem>>, vector<16x128xf32>
    tpu.vector_store %arg11[%c112, %c0_66], %89 {strides = array<i32>} : memref<128x128xf32, #tpu.memory_space<vmem>>, vector<16x128xf32>,
    %91 = tpu.iota {dimensions = array<i32: 1>} : vector<16x128xi32>
    %c64_i32 = arith.constant 64 : i32
    %92 = vector.broadcast %c64_i32 : i32 to vector<16x128xi32>
    %93 = arith.cmpi sge, %91, %92 : vector<16x128xi32>
    %c96_i32 = arith.constant 96 : i32
    %94 = vector.broadcast %c96_i32 : i32 to vector<16x128xi32>
    %95 = arith.cmpi slt, %91, %94 : vector<16x128xi32>
    %96 = arith.andi %93, %95 : vector<16x128xi1>
    %cst_67 = arith.constant 2.000000e+00 : f32
    %cst_68 = arith.constant 1.000000e+00 : f32
    %97 = vector.broadcast %cst_67 : f32 to vector<16x128xf32>
    %98 = vector.broadcast %cst_68 : f32 to vector<16x128xf32>
    %99 = arith.select %96, %97, %98 : vector<16x128xi1>, vector<16x128xf32>
    %cst_69 = arith.constant -1.000000e+00 : f32
    %cst_70 = arith.constant 0.000000e+00 : f32
    %100 = vector.broadcast %cst_69 : f32 to vector<16x128xf32>
    %101 = vector.broadcast %cst_70 : f32 to vector<16x128xf32>
    %102 = arith.select %96, %100, %101 : vector<16x128xi1>, vector<16x128xf32>
    %cst_71 = arith.constant 0.000000e+00 : f32
    %103 = vector.broadcast %cst_71 : f32 to vector<16x32xf32>
    %cst_72 = arith.constant 0.000000e+00 : f32
    %104 = vector.broadcast %cst_72 : f32 to vector<16x32xf32>
    %cst_73 = arith.constant 0.000000e+00 : f32
    %105 = vector.broadcast %cst_73 : f32 to vector<16x32xf32>
    %cst_74 = arith.constant 0.000000e+00 : f32
    %106 = vector.broadcast %cst_74 : f32 to vector<16x32xf32>
    %107 = tpu.concatenate %103, %105 in 1 : vector<16x32xf32>, vector<16x32xf32> -> vector<16x64xf32>
    %c0_75 = arith.constant 0 : index
    %c0_76 = arith.constant 0 : index
    %108 = vector.load %arg12[%c0_75, %c0_76] : memref<64x256xf32, #tpu.memory_space<vmem>>, vector<64x256xf32>
    %cst_77 = arith.constant dense<0.000000e+00> : vector<16x256xf32>
    %109 = tpu.matmul %107, %108, %cst_77 {dimension_numbers = #tpu.dot_dimension_numbers<[1], [0], [0], [1], [0, 0, 1, 1], [], []>} : vector<16x64xf32>, vector<64x256xf32>, vector<16x256xf32> -> vector<16x256xf32>
    %110 = vector.extract_strided_slice %109 {offsets = [0, 0], sizes = [16, 128], strides = [1, 1]} : vector<16x256xf32> to vector<16x128xf32>
    %c0_78 = arith.constant 0 : index
    %c0_79 = arith.constant 0 : index
    %111 = vector.load %arg11[%c0_78, %c0_79] : memref<128x128xf32, #tpu.memory_space<vmem>>, vector<16x128xf32>
    %112 = arith.addf %111, %110 : vector<16x128xf32>
    %113 = arith.mulf %112, %99 : vector<16x128xf32>
    %cst_80 = arith.constant 0.000000e+00 : f32
    %114 = vector.broadcast %cst_80 : f32 to vector<16x128xf32>
    %115 = arith.subf %114, %113 : vector<16x128xf32>
    %116 = math.exp %115 : vector<16x128xf32>
    %cst_81 = arith.constant 1.000000e+00 : f32
    %117 = vector.broadcast %cst_81 : f32 to vector<16x128xf32>
    %118 = arith.addf %117, %116 : vector<16x128xf32>
    %119 = tpu.reciprocal %118 {approx = true} : vector<16x128xf32> -> vector<16x128xf32>
    %120 = arith.mulf %119, %99 : vector<16x128xf32>
    %121 = arith.addf %120, %102 : vector<16x128xf32>
    %122 = vector.extract_strided_slice %121 {offsets = [0, 0], sizes = [16, 32], strides = [1, 1]} : vector<16x128xf32> to vector<16x32xf32>
    %123 = vector.extract_strided_slice %121 {offsets = [0, 32], sizes = [16, 32], strides = [1, 1]} : vector<16x128xf32> to vector<16x32xf32>
    %124 = vector.extract_strided_slice %121 {offsets = [0, 64], sizes = [16, 32], strides = [1, 1]} : vector<16x128xf32> to vector<16x32xf32>
    %125 = vector.extract_strided_slice %121 {offsets = [0, 96], sizes = [16, 32], strides = [1, 1]} : vector<16x128xf32> to vector<16x32xf32>
    %126 = arith.mulf %123, %104 : vector<16x32xf32>
    %127 = arith.mulf %122, %124 : vector<16x32xf32>
    %128 = arith.addf %126, %127 : vector<16x32xf32>
    %129 = math.tanh %128 : vector<16x32xf32>
    %130 = arith.mulf %125, %129 : vector<16x32xf32>
    %c0_82 = arith.constant 0 : index
    %c0_83 = arith.constant 0 : index
    %131 = vector.load %arg3[%c0_82, %c0_83] : memref<32x16xf32, #tpu.memory_space<vmem>>, vector<32x16xf32>
    %cst_84 = arith.constant dense<0.000000e+00> : vector<16x16xf32>
    %132 = tpu.matmul %130, %131, %cst_84 {dimension_numbers = #tpu.dot_dimension_numbers<[1], [0], [0], [1], [0, 0, 1, 1], [], []>} : vector<16x32xf32>, vector<32x16xf32>, vector<16x16xf32> -> vector<16x16xf32>
    %c0_85 = arith.constant 0 : index
    %c0_86 = arith.constant 0 : index
    %c0_87 = arith.constant 0 : index
    %133 = vector.load %arg0[%c0_85, %c0_86, %c0_87] : memref<8x16x16xf32, #tpu.memory_space<vmem>>, vector<1x16x16xf32>
    %134 = vector.shape_cast %133 : vector<1x16x16xf32> to vector<16x16xf32>
    %cst_88 = arith.constant dense<0.000000e+00> : vector<16x16xf32>
    %135 = tpu.matmul %134, %132, %cst_88 {dimension_numbers = #tpu.dot_dimension_numbers<[1], [0], [0], [1], [0, 0, 1, 1], [], []>} : vector<16x16xf32>, vector<16x16xf32>, vector<16x16xf32> -> vector<16x16xf32>
    %cst_89 = arith.constant 0.000000e+00 : f32
    %136 = vector.broadcast %cst_89 : f32 to vector<16x16xf32>
    %137 = arith.maximumf %135, %136 : vector<16x16xf32>
    %138 = tpu.concatenate %130, %105 in 1 : vector<16x32xf32>, vector<16x32xf32> -> vector<16x64xf32>
    %c0_90 = arith.constant 0 : index
    %c0_91 = arith.constant 0 : index
    %139 = vector.load %arg12[%c0_90, %c0_91] : memref<64x256xf32, #tpu.memory_space<vmem>>, vector<64x256xf32>
    %cst_92 = arith.constant dense<0.000000e+00> : vector<16x256xf32>
    %140 = tpu.matmul %138, %139, %cst_92 {dimension_numbers = #tpu.dot_dimension_numbers<[1], [0], [0], [1], [0, 0, 1, 1], [], []>} : vector<16x64xf32>, vector<64x256xf32>, vector<16x256xf32> -> vector<16x256xf32>
    %141 = vector.extract_strided_slice %140 {offsets = [0, 0], sizes = [16, 128], strides = [1, 1]} : vector<16x256xf32> to vector<16x128xf32>
    %142 = vector.extract_strided_slice %140 {offsets = [0, 128], sizes = [16, 128], strides = [1, 1]} : vector<16x256xf32> to vector<16x128xf32>
    %c16_93 = arith.constant 16 : index
    %c0_94 = arith.constant 0 : index
    %143 = vector.load %arg11[%c16_93, %c0_94] : memref<128x128xf32, #tpu.memory_space<vmem>>, vector<16x128xf32>
    %144 = arith.addf %143, %141 : vector<16x128xf32>
    %145 = arith.mulf %144, %99 : vector<16x128xf32>
    %cst_95 = arith.constant 0.000000e+00 : f32
    %146 = vector.broadcast %cst_95 : f32 to vector<16x128xf32>
    %147 = arith.subf %146, %145 : vector<16x128xf32>
    %148 = math.exp %147 : vector<16x128xf32>
    %cst_96 = arith.constant 1.000000e+00 : f32
    %149 = vector.broadcast %cst_96 : f32 to vector<16x128xf32>
    %150 = arith.addf %149, %148 : vector<16x128xf32>
    %151 = tpu.reciprocal %150 {approx = true} : vector<16x128xf32> -> vector<16x128xf32>
    %152 = arith.mulf %151, %99 : vector<16x128xf32>
    %153 = arith.addf %152, %102 : vector<16x128xf32>
    %154 = vector.extract_strided_slice %153 {offsets = [0, 0], sizes = [16, 32], strides = [1, 1]} : vector<16x128xf32> to vector<16x32xf32>
    %155 = vector.extract_strided_slice %153 {offsets = [0, 32], sizes = [16, 32], strides = [1, 1]} : vector<16x128xf32> to vector<16x32xf32>
    %156 = vector.extract_strided_slice %153 {offsets = [0, 64], sizes = [16, 32], strides = [1, 1]} : vector<16x128xf32> to vector<16x32xf32>
    %157 = vector.extract_strided_slice %153 {offsets = [0, 96], sizes = [16, 32], strides = [1, 1]} : vector<16x128xf32> to vector<16x32xf32>
    %158 = arith.mulf %155, %128 : vector<16x32xf32>
    %159 = arith.mulf %154, %156 : vector<16x32xf32>
    %160 = arith.addf %158, %159 : vector<16x32xf32>
    %161 = math.tanh %160 : vector<16x32xf32>
    %162 = arith.mulf %157, %161 : vector<16x32xf32>
    %c0_97 = arith.constant 0 : index
    %c0_98 = arith.constant 0 : index
    %163 = vector.load %arg3[%c0_97, %c0_98] : memref<32x16xf32, #tpu.memory_space<vmem>>, vector<32x16xf32>
    %cst_99 = arith.constant dense<0.000000e+00> : vector<16x16xf32>
    %164 = tpu.matmul %162, %163, %cst_99 {dimension_numbers = #tpu.dot_dimension_numbers<[1], [0], [0], [1], [0, 0, 1, 1], [], []>} : vector<16x32xf32>, vector<32x16xf32>, vector<16x16xf32> -> vector<16x16xf32>
    %c1_100 = arith.constant 1 : index
    %c0_101 = arith.constant 0 : index
    %c0_102 = arith.constant 0 : index
    %165 = vector.load %arg0[%c1_100, %c0_101, %c0_102] : memref<8x16x16xf32, #tpu.memory_space<vmem>>, vector<1x16x16xf32>
    %166 = vector.shape_cast %165 : vector<1x16x16xf32> to vector<16x16xf32>
    %cst_103 = arith.constant dense<0.000000e+00> : vector<16x16xf32>
    %167 = tpu.matmul %166, %164, %cst_103 {dimension_numbers = #tpu.dot_dimension_numbers<[1], [0], [0], [1], [0, 0, 1, 1], [], []>} : vector<16x16xf32>, vector<16x16xf32>, vector<16x16xf32> -> vector<16x16xf32>
    %cst_104 = arith.constant 0.000000e+00 : f32
    %168 = vector.broadcast %cst_104 : f32 to vector<16x16xf32>
    %169 = arith.maximumf %167, %168 : vector<16x16xf32>
    %c0_105 = arith.constant 0 : index
    %c0_106 = arith.constant 0 : index
    %170 = vector.load %arg7[%c0_105, %c0_106] : memref<16x128xf32, #tpu.memory_space<vmem>>, vector<16x128xf32>
    %cst_107 = arith.constant dense<0.000000e+00> : vector<16x128xf32>
    %171 = tpu.matmul %137, %170, %cst_107 {dimension_numbers = #tpu.dot_dimension_numbers<[1], [0], [0], [1], [0, 0, 1, 1], [], []>} : vector<16x16xf32>, vector<16x128xf32>, vector<16x128xf32> -> vector<16x128xf32>
    %c0_108 = arith.constant 0 : index
    %c0_109 = arith.constant 0 : index
    %172 = vector.load %arg9[%c0_108, %c0_109] : memref<1x128xf32, #tpu.memory_space<vmem>>, vector<1x128xf32>
    %173 = vector.broadcast %172 : vector<1x128xf32> to vector<16x128xf32>
    %174 = arith.addf %171, %173 : vector<16x128xf32>
    %175 = arith.addf %174, %142 : vector<16x128xf32>
    %176 = arith.mulf %175, %99 : vector<16x128xf32>
    %cst_110 = arith.constant 0.000000e+00 : f32
    %177 = vector.broadcast %cst_110 : f32 to vector<16x128xf32>
    %178 = arith.subf %177, %176 : vector<16x128xf32>
    %179 = math.exp %178 : vector<16x128xf32>
    %cst_111 = arith.constant 1.000000e+00 : f32
    %180 = vector.broadcast %cst_111 : f32 to vector<16x128xf32>
    %181 = arith.addf %180, %179 : vector<16x128xf32>
    %182 = tpu.reciprocal %181 {approx = true} : vector<16x128xf32> -> vector<16x128xf32>
    %183 = arith.mulf %182, %99 : vector<16x128xf32>
    %184 = arith.addf %183, %102 : vector<16x128xf32>
    %185 = vector.extract_strided_slice %184 {offsets = [0, 0], sizes = [16, 32], strides = [1, 1]} : vector<16x128xf32> to vector<16x32xf32>
    %186 = vector.extract_strided_slice %184 {offsets = [0, 32], sizes = [16, 32], strides = [1, 1]} : vector<16x128xf32> to vector<16x32xf32>
    %187 = vector.extract_strided_slice %184 {offsets = [0, 64], sizes = [16, 32], strides = [1, 1]} : vector<16x128xf32> to vector<16x32xf32>
    %188 = vector.extract_strided_slice %184 {offsets = [0, 96], sizes = [16, 32], strides = [1, 1]} : vector<16x128xf32> to vector<16x32xf32>
    %189 = arith.mulf %186, %106 : vector<16x32xf32>
    %190 = arith.mulf %185, %187 : vector<16x32xf32>
    %191 = arith.addf %189, %190 : vector<16x32xf32>
    %192 = math.tanh %191 : vector<16x32xf32>
    %193 = arith.mulf %188, %192 : vector<16x32xf32>
    %c0_112 = arith.constant 0 : index
    %c0_113 = arith.constant 0 : index
    %194 = vector.load %arg10[%c0_112, %c0_113] : memref<128x32xf32, #tpu.memory_space<vmem>>, vector<16x32xf32>
    tpu.vector_store %arg10[%c0_112, %c0_113], %193 {strides = array<i32>} : memref<128x32xf32, #tpu.memory_space<vmem>>, vector<16x32xf32>,
    %195 = tpu.concatenate %162, %193 in 1 : vector<16x32xf32>, vector<16x32xf32> -> vector<16x64xf32>
    %c0_114 = arith.constant 0 : index
    %c0_115 = arith.constant 0 : index
    %196 = vector.load %arg12[%c0_114, %c0_115] : memref<64x256xf32, #tpu.memory_space<vmem>>, vector<64x256xf32>
    %cst_116 = arith.constant dense<0.000000e+00> : vector<16x256xf32>
    %197 = tpu.matmul %195, %196, %cst_116 {dimension_numbers = #tpu.dot_dimension_numbers<[1], [0], [0], [1], [0, 0, 1, 1], [], []>} : vector<16x64xf32>, vector<64x256xf32>, vector<16x256xf32> -> vector<16x256xf32>
    %198 = vector.extract_strided_slice %197 {offsets = [0, 0], sizes = [16, 128], strides = [1, 1]} : vector<16x256xf32> to vector<16x128xf32>
    %199 = vector.extract_strided_slice %197 {offsets = [0, 128], sizes = [16, 128], strides = [1, 1]} : vector<16x256xf32> to vector<16x128xf32>
    %c32_117 = arith.constant 32 : index
    %c0_118 = arith.constant 0 : index
    %200 = vector.load %arg11[%c32_117, %c0_118] : memref<128x128xf32, #tpu.memory_space<vmem>>, vector<16x128xf32>
    %201 = arith.addf %200, %198 : vector<16x128xf32>
    %202 = arith.mulf %201, %99 : vector<16x128xf32>
    %cst_119 = arith.constant 0.000000e+00 : f32
    %203 = vector.broadcast %cst_119 : f32 to vector<16x128xf32>
    %204 = arith.subf %203, %202 : vector<16x128xf32>
    %205 = math.exp %204 : vector<16x128xf32>
    %cst_120 = arith.constant 1.000000e+00 : f32
    %206 = vector.broadcast %cst_120 : f32 to vector<16x128xf32>
    %207 = arith.addf %206, %205 : vector<16x128xf32>
    %208 = tpu.reciprocal %207 {approx = true} : vector<16x128xf32> -> vector<16x128xf32>
    %209 = arith.mulf %208, %99 : vector<16x128xf32>
    %210 = arith.addf %209, %102 : vector<16x128xf32>
    %211 = vector.extract_strided_slice %210 {offsets = [0, 0], sizes = [16, 32], strides = [1, 1]} : vector<16x128xf32> to vector<16x32xf32>
    %212 = vector.extract_strided_slice %210 {offsets = [0, 32], sizes = [16, 32], strides = [1, 1]} : vector<16x128xf32> to vector<16x32xf32>
    %213 = vector.extract_strided_slice %210 {offsets = [0, 64], sizes = [16, 32], strides = [1, 1]} : vector<16x128xf32> to vector<16x32xf32>
    %214 = vector.extract_strided_slice %210 {offsets = [0, 96], sizes = [16, 32], strides = [1, 1]} : vector<16x128xf32> to vector<16x32xf32>
    %215 = arith.mulf %212, %160 : vector<16x32xf32>
    %216 = arith.mulf %211, %213 : vector<16x32xf32>
    %217 = arith.addf %215, %216 : vector<16x32xf32>
    %218 = math.tanh %217 : vector<16x32xf32>
    %219 = arith.mulf %214, %218 : vector<16x32xf32>
    %c0_121 = arith.constant 0 : index
    %c0_122 = arith.constant 0 : index
    %220 = vector.load %arg3[%c0_121, %c0_122] : memref<32x16xf32, #tpu.memory_space<vmem>>, vector<32x16xf32>
    %cst_123 = arith.constant dense<0.000000e+00> : vector<16x16xf32>
    %221 = tpu.matmul %219, %220, %cst_123 {dimension_numbers = #tpu.dot_dimension_numbers<[1], [0], [0], [1], [0, 0, 1, 1], [], []>} : vector<16x32xf32>, vector<32x16xf32>, vector<16x16xf32> -> vector<16x16xf32>
    %c2_124 = arith.constant 2 : index
    %c0_125 = arith.constant 0 : index
    %c0_126 = arith.constant 0 : index
    %222 = vector.load %arg0[%c2_124, %c0_125, %c0_126] : memref<8x16x16xf32, #tpu.memory_space<vmem>>, vector<1x16x16xf32>
    %223 = vector.shape_cast %222 : vector<1x16x16xf32> to vector<16x16xf32>
    %cst_127 = arith.constant dense<0.000000e+00> : vector<16x16xf32>
    %224 = tpu.matmul %223, %221, %cst_127 {dimension_numbers = #tpu.dot_dimension_numbers<[1], [0], [0], [1], [0, 0, 1, 1], [], []>} : vector<16x16xf32>, vector<16x16xf32>, vector<16x16xf32> -> vector<16x16xf32>
    %cst_128 = arith.constant 0.000000e+00 : f32
    %225 = vector.broadcast %cst_128 : f32 to vector<16x16xf32>
    %226 = arith.maximumf %224, %225 : vector<16x16xf32>
    %c0_129 = arith.constant 0 : index
    %c0_130 = arith.constant 0 : index
    %227 = vector.load %arg7[%c0_129, %c0_130] : memref<16x128xf32, #tpu.memory_space<vmem>>, vector<16x128xf32>
    %cst_131 = arith.constant dense<0.000000e+00> : vector<16x128xf32>
    %228 = tpu.matmul %169, %227, %cst_131 {dimension_numbers = #tpu.dot_dimension_numbers<[1], [0], [0], [1], [0, 0, 1, 1], [], []>} : vector<16x16xf32>, vector<16x128xf32>, vector<16x128xf32> -> vector<16x128xf32>
    %c0_132 = arith.constant 0 : index
    %c0_133 = arith.constant 0 : index
    %229 = vector.load %arg9[%c0_132, %c0_133] : memref<1x128xf32, #tpu.memory_space<vmem>>, vector<1x128xf32>
    %230 = vector.broadcast %229 : vector<1x128xf32> to vector<16x128xf32>
    %231 = arith.addf %228, %230 : vector<16x128xf32>
    %232 = arith.addf %231, %199 : vector<16x128xf32>
    %233 = arith.mulf %232, %99 : vector<16x128xf32>
    %cst_134 = arith.constant 0.000000e+00 : f32
    %234 = vector.broadcast %cst_134 : f32 to vector<16x128xf32>
    %235 = arith.subf %234, %233 : vector<16x128xf32>
    %236 = math.exp %235 : vector<16x128xf32>
    %cst_135 = arith.constant 1.000000e+00 : f32
    %237 = vector.broadcast %cst_135 : f32 to vector<16x128xf32>
    %238 = arith.addf %237, %236 : vector<16x128xf32>
    %239 = tpu.reciprocal %238 {approx = true} : vector<16x128xf32> -> vector<16x128xf32>
    %240 = arith.mulf %239, %99 : vector<16x128xf32>
    %241 = arith.addf %240, %102 : vector<16x128xf32>
    %242 = vector.extract_strided_slice %241 {offsets = [0, 0], sizes = [16, 32], strides = [1, 1]} : vector<16x128xf32> to vector<16x32xf32>
    %243 = vector.extract_strided_slice %241 {offsets = [0, 32], sizes = [16, 32], strides = [1, 1]} : vector<16x128xf32> to vector<16x32xf32>
    %244 = vector.extract_strided_slice %241 {offsets = [0, 64], sizes = [16, 32], strides = [1, 1]} : vector<16x128xf32> to vector<16x32xf32>
    %245 = vector.extract_strided_slice %241 {offsets = [0, 96], sizes = [16, 32], strides = [1, 1]} : vector<16x128xf32> to vector<16x32xf32>
    %246 = arith.mulf %243, %191 : vector<16x32xf32>
    %247 = arith.mulf %242, %244 : vector<16x32xf32>
    %248 = arith.addf %246, %247 : vector<16x32xf32>
    %249 = math.tanh %248 : vector<16x32xf32>
    %250 = arith.mulf %245, %249 : vector<16x32xf32>
    %c16_136 = arith.constant 16 : index
    %c0_137 = arith.constant 0 : index
    %251 = vector.load %arg10[%c16_136, %c0_137] : memref<128x32xf32, #tpu.memory_space<vmem>>, vector<16x32xf32>
    tpu.vector_store %arg10[%c16_136, %c0_137], %250 {strides = array<i32>} : memref<128x32xf32, #tpu.memory_space<vmem>>, vector<16x32xf32>,
    %252 = tpu.concatenate %219, %250 in 1 : vector<16x32xf32>, vector<16x32xf32> -> vector<16x64xf32>
    %c0_138 = arith.constant 0 : index
    %c0_139 = arith.constant 0 : index
    %253 = vector.load %arg12[%c0_138, %c0_139] : memref<64x256xf32, #tpu.memory_space<vmem>>, vector<64x256xf32>
    %cst_140 = arith.constant dense<0.000000e+00> : vector<16x256xf32>
    %254 = tpu.matmul %252, %253, %cst_140 {dimension_numbers = #tpu.dot_dimension_numbers<[1], [0], [0], [1], [0, 0, 1, 1], [], []>} : vector<16x64xf32>, vector<64x256xf32>, vector<16x256xf32> -> vector<16x256xf32>
    %255 = vector.extract_strided_slice %254 {offsets = [0, 0], sizes = [16, 128], strides = [1, 1]} : vector<16x256xf32> to vector<16x128xf32>
    %256 = vector.extract_strided_slice %254 {offsets = [0, 128], sizes = [16, 128], strides = [1, 1]} : vector<16x256xf32> to vector<16x128xf32>
    %c48_141 = arith.constant 48 : index
    %c0_142 = arith.constant 0 : index
    %257 = vector.load %arg11[%c48_141, %c0_142] : memref<128x128xf32, #tpu.memory_space<vmem>>, vector<16x128xf32>
    %258 = arith.addf %257, %255 : vector<16x128xf32>
    %259 = arith.mulf %258, %99 : vector<16x128xf32>
    %cst_143 = arith.constant 0.000000e+00 : f32
    %260 = vector.broadcast %cst_143 : f32 to vector<16x128xf32>
    %261 = arith.subf %260, %259 : vector<16x128xf32>
    %262 = math.exp %261 : vector<16x128xf32>
    %cst_144 = arith.constant 1.000000e+00 : f32
    %263 = vector.broadcast %cst_144 : f32 to vector<16x128xf32>
    %264 = arith.addf %263, %262 : vector<16x128xf32>
    %265 = tpu.reciprocal %264 {approx = true} : vector<16x128xf32> -> vector<16x128xf32>
    %266 = arith.mulf %265, %99 : vector<16x128xf32>
    %267 = arith.addf %266, %102 : vector<16x128xf32>
    %268 = vector.extract_strided_slice %267 {offsets = [0, 0], sizes = [16, 32], strides = [1, 1]} : vector<16x128xf32> to vector<16x32xf32>
    %269 = vector.extract_strided_slice %267 {offsets = [0, 32], sizes = [16, 32], strides = [1, 1]} : vector<16x128xf32> to vector<16x32xf32>
    %270 = vector.extract_strided_slice %267 {offsets = [0, 64], sizes = [16, 32], strides = [1, 1]} : vector<16x128xf32> to vector<16x32xf32>
    %271 = vector.extract_strided_slice %267 {offsets = [0, 96], sizes = [16, 32], strides = [1, 1]} : vector<16x128xf32> to vector<16x32xf32>
    %272 = arith.mulf %269, %217 : vector<16x32xf32>
    %273 = arith.mulf %268, %270 : vector<16x32xf32>
    %274 = arith.addf %272, %273 : vector<16x32xf32>
    %275 = math.tanh %274 : vector<16x32xf32>
    %276 = arith.mulf %271, %275 : vector<16x32xf32>
    %c0_145 = arith.constant 0 : index
    %c0_146 = arith.constant 0 : index
    %277 = vector.load %arg3[%c0_145, %c0_146] : memref<32x16xf32, #tpu.memory_space<vmem>>, vector<32x16xf32>
    %cst_147 = arith.constant dense<0.000000e+00> : vector<16x16xf32>
    %278 = tpu.matmul %276, %277, %cst_147 {dimension_numbers = #tpu.dot_dimension_numbers<[1], [0], [0], [1], [0, 0, 1, 1], [], []>} : vector<16x32xf32>, vector<32x16xf32>, vector<16x16xf32> -> vector<16x16xf32>
    %c3_148 = arith.constant 3 : index
    %c0_149 = arith.constant 0 : index
    %c0_150 = arith.constant 0 : index
    %279 = vector.load %arg0[%c3_148, %c0_149, %c0_150] : memref<8x16x16xf32, #tpu.memory_space<vmem>>, vector<1x16x16xf32>
    %280 = vector.shape_cast %279 : vector<1x16x16xf32> to vector<16x16xf32>
    %cst_151 = arith.constant dense<0.000000e+00> : vector<16x16xf32>
    %281 = tpu.matmul %280, %278, %cst_151 {dimension_numbers = #tpu.dot_dimension_numbers<[1], [0], [0], [1], [0, 0, 1, 1], [], []>} : vector<16x16xf32>, vector<16x16xf32>, vector<16x16xf32> -> vector<16x16xf32>
    %cst_152 = arith.constant 0.000000e+00 : f32
    %282 = vector.broadcast %cst_152 : f32 to vector<16x16xf32>
    %283 = arith.maximumf %281, %282 : vector<16x16xf32>
    %c0_153 = arith.constant 0 : index
    %c0_154 = arith.constant 0 : index
    %284 = vector.load %arg7[%c0_153, %c0_154] : memref<16x128xf32, #tpu.memory_space<vmem>>, vector<16x128xf32>
    %cst_155 = arith.constant dense<0.000000e+00> : vector<16x128xf32>
    %285 = tpu.matmul %226, %284, %cst_155 {dimension_numbers = #tpu.dot_dimension_numbers<[1], [0], [0], [1], [0, 0, 1, 1], [], []>} : vector<16x16xf32>, vector<16x128xf32>, vector<16x128xf32> -> vector<16x128xf32>
    %c0_156 = arith.constant 0 : index
    %c0_157 = arith.constant 0 : index
    %286 = vector.load %arg9[%c0_156, %c0_157] : memref<1x128xf32, #tpu.memory_space<vmem>>, vector<1x128xf32>
    %287 = vector.broadcast %286 : vector<1x128xf32> to vector<16x128xf32>
    %288 = arith.addf %285, %287 : vector<16x128xf32>
    %289 = arith.addf %288, %256 : vector<16x128xf32>
    %290 = arith.mulf %289, %99 : vector<16x128xf32>
    %cst_158 = arith.constant 0.000000e+00 : f32
    %291 = vector.broadcast %cst_158 : f32 to vector<16x128xf32>
    %292 = arith.subf %291, %290 : vector<16x128xf32>
    %293 = math.exp %292 : vector<16x128xf32>
    %cst_159 = arith.constant 1.000000e+00 : f32
    %294 = vector.broadcast %cst_159 : f32 to vector<16x128xf32>
    %295 = arith.addf %294, %293 : vector<16x128xf32>
    %296 = tpu.reciprocal %295 {approx = true} : vector<16x128xf32> -> vector<16x128xf32>
    %297 = arith.mulf %296, %99 : vector<16x128xf32>
    %298 = arith.addf %297, %102 : vector<16x128xf32>
    %299 = vector.extract_strided_slice %298 {offsets = [0, 0], sizes = [16, 32], strides = [1, 1]} : vector<16x128xf32> to vector<16x32xf32>
    %300 = vector.extract_strided_slice %298 {offsets = [0, 32], sizes = [16, 32], strides = [1, 1]} : vector<16x128xf32> to vector<16x32xf32>
    %301 = vector.extract_strided_slice %298 {offsets = [0, 64], sizes = [16, 32], strides = [1, 1]} : vector<16x128xf32> to vector<16x32xf32>
    %302 = vector.extract_strided_slice %298 {offsets = [0, 96], sizes = [16, 32], strides = [1, 1]} : vector<16x128xf32> to vector<16x32xf32>
    %303 = arith.mulf %300, %248 : vector<16x32xf32>
    %304 = arith.mulf %299, %301 : vector<16x32xf32>
    %305 = arith.addf %303, %304 : vector<16x32xf32>
    %306 = math.tanh %305 : vector<16x32xf32>
    %307 = arith.mulf %302, %306 : vector<16x32xf32>
    %c32_160 = arith.constant 32 : index
    %c0_161 = arith.constant 0 : index
    %308 = vector.load %arg10[%c32_160, %c0_161] : memref<128x32xf32, #tpu.memory_space<vmem>>, vector<16x32xf32>
    tpu.vector_store %arg10[%c32_160, %c0_161], %307 {strides = array<i32>} : memref<128x32xf32, #tpu.memory_space<vmem>>, vector<16x32xf32>,
    %309 = tpu.concatenate %276, %307 in 1 : vector<16x32xf32>, vector<16x32xf32> -> vector<16x64xf32>
    %c0_162 = arith.constant 0 : index
    %c0_163 = arith.constant 0 : index
    %310 = vector.load %arg12[%c0_162, %c0_163] : memref<64x256xf32, #tpu.memory_space<vmem>>, vector<64x256xf32>
    %cst_164 = arith.constant dense<0.000000e+00> : vector<16x256xf32>
    %311 = tpu.matmul %309, %310, %cst_164 {dimension_numbers = #tpu.dot_dimension_numbers<[1], [0], [0], [1], [0, 0, 1, 1], [], []>} : vector<16x64xf32>, vector<64x256xf32>, vector<16x256xf32> -> vector<16x256xf32>
    %312 = vector.extract_strided_slice %311 {offsets = [0, 0], sizes = [16, 128], strides = [1, 1]} : vector<16x256xf32> to vector<16x128xf32>
    %313 = vector.extract_strided_slice %311 {offsets = [0, 128], sizes = [16, 128], strides = [1, 1]} : vector<16x256xf32> to vector<16x128xf32>
    %c64_165 = arith.constant 64 : index
    %c0_166 = arith.constant 0 : index
    %314 = vector.load %arg11[%c64_165, %c0_166] : memref<128x128xf32, #tpu.memory_space<vmem>>, vector<16x128xf32>
    %315 = arith.addf %314, %312 : vector<16x128xf32>
    %316 = arith.mulf %315, %99 : vector<16x128xf32>
    %cst_167 = arith.constant 0.000000e+00 : f32
    %317 = vector.broadcast %cst_167 : f32 to vector<16x128xf32>
    %318 = arith.subf %317, %316 : vector<16x128xf32>
    %319 = math.exp %318 : vector<16x128xf32>
    %cst_168 = arith.constant 1.000000e+00 : f32
    %320 = vector.broadcast %cst_168 : f32 to vector<16x128xf32>
    %321 = arith.addf %320, %319 : vector<16x128xf32>
    %322 = tpu.reciprocal %321 {approx = true} : vector<16x128xf32> -> vector<16x128xf32>
    %323 = arith.mulf %322, %99 : vector<16x128xf32>
    %324 = arith.addf %323, %102 : vector<16x128xf32>
    %325 = vector.extract_strided_slice %324 {offsets = [0, 0], sizes = [16, 32], strides = [1, 1]} : vector<16x128xf32> to vector<16x32xf32>
    %326 = vector.extract_strided_slice %324 {offsets = [0, 32], sizes = [16, 32], strides = [1, 1]} : vector<16x128xf32> to vector<16x32xf32>
    %327 = vector.extract_strided_slice %324 {offsets = [0, 64], sizes = [16, 32], strides = [1, 1]} : vector<16x128xf32> to vector<16x32xf32>
    %328 = vector.extract_strided_slice %324 {offsets = [0, 96], sizes = [16, 32], strides = [1, 1]} : vector<16x128xf32> to vector<16x32xf32>
    %329 = arith.mulf %326, %274 : vector<16x32xf32>
    %330 = arith.mulf %325, %327 : vector<16x32xf32>
    %331 = arith.addf %329, %330 : vector<16x32xf32>
    %332 = math.tanh %331 : vector<16x32xf32>
    %333 = arith.mulf %328, %332 : vector<16x32xf32>
    %c0_169 = arith.constant 0 : index
    %c0_170 = arith.constant 0 : index
    %334 = vector.load %arg3[%c0_169, %c0_170] : memref<32x16xf32, #tpu.memory_space<vmem>>, vector<32x16xf32>
    %cst_171 = arith.constant dense<0.000000e+00> : vector<16x16xf32>
    %335 = tpu.matmul %333, %334, %cst_171 {dimension_numbers = #tpu.dot_dimension_numbers<[1], [0], [0], [1], [0, 0, 1, 1], [], []>} : vector<16x32xf32>, vector<32x16xf32>, vector<16x16xf32> -> vector<16x16xf32>
    %c4_172 = arith.constant 4 : index
    %c0_173 = arith.constant 0 : index
    %c0_174 = arith.constant 0 : index
    %336 = vector.load %arg0[%c4_172, %c0_173, %c0_174] : memref<8x16x16xf32, #tpu.memory_space<vmem>>, vector<1x16x16xf32>
    %337 = vector.shape_cast %336 : vector<1x16x16xf32> to vector<16x16xf32>
    %cst_175 = arith.constant dense<0.000000e+00> : vector<16x16xf32>
    %338 = tpu.matmul %337, %335, %cst_175 {dimension_numbers = #tpu.dot_dimension_numbers<[1], [0], [0], [1], [0, 0, 1, 1], [], []>} : vector<16x16xf32>, vector<16x16xf32>, vector<16x16xf32> -> vector<16x16xf32>
    %cst_176 = arith.constant 0.000000e+00 : f32
    %339 = vector.broadcast %cst_176 : f32 to vector<16x16xf32>
    %340 = arith.maximumf %338, %339 : vector<16x16xf32>
    %c0_177 = arith.constant 0 : index
    %c0_178 = arith.constant 0 : index
    %341 = vector.load %arg7[%c0_177, %c0_178] : memref<16x128xf32, #tpu.memory_space<vmem>>, vector<16x128xf32>
    %cst_179 = arith.constant dense<0.000000e+00> : vector<16x128xf32>
    %342 = tpu.matmul %283, %341, %cst_179 {dimension_numbers = #tpu.dot_dimension_numbers<[1], [0], [0], [1], [0, 0, 1, 1], [], []>} : vector<16x16xf32>, vector<16x128xf32>, vector<16x128xf32> -> vector<16x128xf32>
    %c0_180 = arith.constant 0 : index
    %c0_181 = arith.constant 0 : index
    %343 = vector.load %arg9[%c0_180, %c0_181] : memref<1x128xf32, #tpu.memory_space<vmem>>, vector<1x128xf32>
    %344 = vector.broadcast %343 : vector<1x128xf32> to vector<16x128xf32>
    %345 = arith.addf %342, %344 : vector<16x128xf32>
    %346 = arith.addf %345, %313 : vector<16x128xf32>
    %347 = arith.mulf %346, %99 : vector<16x128xf32>
    %cst_182 = arith.constant 0.000000e+00 : f32
    %348 = vector.broadcast %cst_182 : f32 to vector<16x128xf32>
    %349 = arith.subf %348, %347 : vector<16x128xf32>
    %350 = math.exp %349 : vector<16x128xf32>
    %cst_183 = arith.constant 1.000000e+00 : f32
    %351 = vector.broadcast %cst_183 : f32 to vector<16x128xf32>
    %352 = arith.addf %351, %350 : vector<16x128xf32>
    %353 = tpu.reciprocal %352 {approx = true} : vector<16x128xf32> -> vector<16x128xf32>
    %354 = arith.mulf %353, %99 : vector<16x128xf32>
    %355 = arith.addf %354, %102 : vector<16x128xf32>
    %356 = vector.extract_strided_slice %355 {offsets = [0, 0], sizes = [16, 32], strides = [1, 1]} : vector<16x128xf32> to vector<16x32xf32>
    %357 = vector.extract_strided_slice %355 {offsets = [0, 32], sizes = [16, 32], strides = [1, 1]} : vector<16x128xf32> to vector<16x32xf32>
    %358 = vector.extract_strided_slice %355 {offsets = [0, 64], sizes = [16, 32], strides = [1, 1]} : vector<16x128xf32> to vector<16x32xf32>
    %359 = vector.extract_strided_slice %355 {offsets = [0, 96], sizes = [16, 32], strides = [1, 1]} : vector<16x128xf32> to vector<16x32xf32>
    %360 = arith.mulf %357, %305 : vector<16x32xf32>
    %361 = arith.mulf %356, %358 : vector<16x32xf32>
    %362 = arith.addf %360, %361 : vector<16x32xf32>
    %363 = math.tanh %362 : vector<16x32xf32>
    %364 = arith.mulf %359, %363 : vector<16x32xf32>
    %c48_184 = arith.constant 48 : index
    %c0_185 = arith.constant 0 : index
    %365 = vector.load %arg10[%c48_184, %c0_185] : memref<128x32xf32, #tpu.memory_space<vmem>>, vector<16x32xf32>
    tpu.vector_store %arg10[%c48_184, %c0_185], %364 {strides = array<i32>} : memref<128x32xf32, #tpu.memory_space<vmem>>, vector<16x32xf32>,
    %366 = tpu.concatenate %333, %364 in 1 : vector<16x32xf32>, vector<16x32xf32> -> vector<16x64xf32>
    %c0_186 = arith.constant 0 : index
    %c0_187 = arith.constant 0 : index
    %367 = vector.load %arg12[%c0_186, %c0_187] : memref<64x256xf32, #tpu.memory_space<vmem>>, vector<64x256xf32>
    %cst_188 = arith.constant dense<0.000000e+00> : vector<16x256xf32>
    %368 = tpu.matmul %366, %367, %cst_188 {dimension_numbers = #tpu.dot_dimension_numbers<[1], [0], [0], [1], [0, 0, 1, 1], [], []>} : vector<16x64xf32>, vector<64x256xf32>, vector<16x256xf32> -> vector<16x256xf32>
    %369 = vector.extract_strided_slice %368 {offsets = [0, 0], sizes = [16, 128], strides = [1, 1]} : vector<16x256xf32> to vector<16x128xf32>
    %370 = vector.extract_strided_slice %368 {offsets = [0, 128], sizes = [16, 128], strides = [1, 1]} : vector<16x256xf32> to vector<16x128xf32>
    %c80_189 = arith.constant 80 : index
    %c0_190 = arith.constant 0 : index
    %371 = vector.load %arg11[%c80_189, %c0_190] : memref<128x128xf32, #tpu.memory_space<vmem>>, vector<16x128xf32>
    %372 = arith.addf %371, %369 : vector<16x128xf32>
    %373 = arith.mulf %372, %99 : vector<16x128xf32>
    %cst_191 = arith.constant 0.000000e+00 : f32
    %374 = vector.broadcast %cst_191 : f32 to vector<16x128xf32>
    %375 = arith.subf %374, %373 : vector<16x128xf32>
    %376 = math.exp %375 : vector<16x128xf32>
    %cst_192 = arith.constant 1.000000e+00 : f32
    %377 = vector.broadcast %cst_192 : f32 to vector<16x128xf32>
    %378 = arith.addf %377, %376 : vector<16x128xf32>
    %379 = tpu.reciprocal %378 {approx = true} : vector<16x128xf32> -> vector<16x128xf32>
    %380 = arith.mulf %379, %99 : vector<16x128xf32>
    %381 = arith.addf %380, %102 : vector<16x128xf32>
    %382 = vector.extract_strided_slice %381 {offsets = [0, 0], sizes = [16, 32], strides = [1, 1]} : vector<16x128xf32> to vector<16x32xf32>
    %383 = vector.extract_strided_slice %381 {offsets = [0, 32], sizes = [16, 32], strides = [1, 1]} : vector<16x128xf32> to vector<16x32xf32>
    %384 = vector.extract_strided_slice %381 {offsets = [0, 64], sizes = [16, 32], strides = [1, 1]} : vector<16x128xf32> to vector<16x32xf32>
    %385 = vector.extract_strided_slice %381 {offsets = [0, 96], sizes = [16, 32], strides = [1, 1]} : vector<16x128xf32> to vector<16x32xf32>
    %386 = arith.mulf %383, %331 : vector<16x32xf32>
    %387 = arith.mulf %382, %384 : vector<16x32xf32>
    %388 = arith.addf %386, %387 : vector<16x32xf32>
    %389 = math.tanh %388 : vector<16x32xf32>
    %390 = arith.mulf %385, %389 : vector<16x32xf32>
    %c0_193 = arith.constant 0 : index
    %c0_194 = arith.constant 0 : index
    %391 = vector.load %arg3[%c0_193, %c0_194] : memref<32x16xf32, #tpu.memory_space<vmem>>, vector<32x16xf32>
    %cst_195 = arith.constant dense<0.000000e+00> : vector<16x16xf32>
    %392 = tpu.matmul %390, %391, %cst_195 {dimension_numbers = #tpu.dot_dimension_numbers<[1], [0], [0], [1], [0, 0, 1, 1], [], []>} : vector<16x32xf32>, vector<32x16xf32>, vector<16x16xf32> -> vector<16x16xf32>
    %c5_196 = arith.constant 5 : index
    %c0_197 = arith.constant 0 : index
    %c0_198 = arith.constant 0 : index
    %393 = vector.load %arg0[%c5_196, %c0_197, %c0_198] : memref<8x16x16xf32, #tpu.memory_space<vmem>>, vector<1x16x16xf32>
    %394 = vector.shape_cast %393 : vector<1x16x16xf32> to vector<16x16xf32>
    %cst_199 = arith.constant dense<0.000000e+00> : vector<16x16xf32>
    %395 = tpu.matmul %394, %392, %cst_199 {dimension_numbers = #tpu.dot_dimension_numbers<[1], [0], [0], [1], [0, 0, 1, 1], [], []>} : vector<16x16xf32>, vector<16x16xf32>, vector<16x16xf32> -> vector<16x16xf32>
    %cst_200 = arith.constant 0.000000e+00 : f32
    %396 = vector.broadcast %cst_200 : f32 to vector<16x16xf32>
    %397 = arith.maximumf %395, %396 : vector<16x16xf32>
    %c0_201 = arith.constant 0 : index
    %c0_202 = arith.constant 0 : index
    %398 = vector.load %arg7[%c0_201, %c0_202] : memref<16x128xf32, #tpu.memory_space<vmem>>, vector<16x128xf32>
    %cst_203 = arith.constant dense<0.000000e+00> : vector<16x128xf32>
    %399 = tpu.matmul %340, %398, %cst_203 {dimension_numbers = #tpu.dot_dimension_numbers<[1], [0], [0], [1], [0, 0, 1, 1], [], []>} : vector<16x16xf32>, vector<16x128xf32>, vector<16x128xf32> -> vector<16x128xf32>
    %c0_204 = arith.constant 0 : index
    %c0_205 = arith.constant 0 : index
    %400 = vector.load %arg9[%c0_204, %c0_205] : memref<1x128xf32, #tpu.memory_space<vmem>>, vector<1x128xf32>
    %401 = vector.broadcast %400 : vector<1x128xf32> to vector<16x128xf32>
    %402 = arith.addf %399, %401 : vector<16x128xf32>
    %403 = arith.addf %402, %370 : vector<16x128xf32>
    %404 = arith.mulf %403, %99 : vector<16x128xf32>
    %cst_206 = arith.constant 0.000000e+00 : f32
    %405 = vector.broadcast %cst_206 : f32 to vector<16x128xf32>
    %406 = arith.subf %405, %404 : vector<16x128xf32>
    %407 = math.exp %406 : vector<16x128xf32>
    %cst_207 = arith.constant 1.000000e+00 : f32
    %408 = vector.broadcast %cst_207 : f32 to vector<16x128xf32>
    %409 = arith.addf %408, %407 : vector<16x128xf32>
    %410 = tpu.reciprocal %409 {approx = true} : vector<16x128xf32> -> vector<16x128xf32>
    %411 = arith.mulf %410, %99 : vector<16x128xf32>
    %412 = arith.addf %411, %102 : vector<16x128xf32>
    %413 = vector.extract_strided_slice %412 {offsets = [0, 0], sizes = [16, 32], strides = [1, 1]} : vector<16x128xf32> to vector<16x32xf32>
    %414 = vector.extract_strided_slice %412 {offsets = [0, 32], sizes = [16, 32], strides = [1, 1]} : vector<16x128xf32> to vector<16x32xf32>
    %415 = vector.extract_strided_slice %412 {offsets = [0, 64], sizes = [16, 32], strides = [1, 1]} : vector<16x128xf32> to vector<16x32xf32>
    %416 = vector.extract_strided_slice %412 {offsets = [0, 96], sizes = [16, 32], strides = [1, 1]} : vector<16x128xf32> to vector<16x32xf32>
    %417 = arith.mulf %414, %362 : vector<16x32xf32>
    %418 = arith.mulf %413, %415 : vector<16x32xf32>
    %419 = arith.addf %417, %418 : vector<16x32xf32>
    %420 = math.tanh %419 : vector<16x32xf32>
    %421 = arith.mulf %416, %420 : vector<16x32xf32>
    %c64_208 = arith.constant 64 : index
    %c0_209 = arith.constant 0 : index
    %422 = vector.load %arg10[%c64_208, %c0_209] : memref<128x32xf32, #tpu.memory_space<vmem>>, vector<16x32xf32>
    tpu.vector_store %arg10[%c64_208, %c0_209], %421 {strides = array<i32>} : memref<128x32xf32, #tpu.memory_space<vmem>>, vector<16x32xf32>,
    %423 = tpu.concatenate %390, %421 in 1 : vector<16x32xf32>, vector<16x32xf32> -> vector<16x64xf32>
    %c0_210 = arith.constant 0 : index
    %c0_211 = arith.constant 0 : index
    %424 = vector.load %arg12[%c0_210, %c0_211] : memref<64x256xf32, #tpu.memory_space<vmem>>, vector<64x256xf32>
    %cst_212 = arith.constant dense<0.000000e+00> : vector<16x256xf32>
    %425 = tpu.matmul %423, %424, %cst_212 {dimension_numbers = #tpu.dot_dimension_numbers<[1], [0], [0], [1], [0, 0, 1, 1], [], []>} : vector<16x64xf32>, vector<64x256xf32>, vector<16x256xf32> -> vector<16x256xf32>
    %426 = vector.extract_strided_slice %425 {offsets = [0, 0], sizes = [16, 128], strides = [1, 1]} : vector<16x256xf32> to vector<16x128xf32>
    %427 = vector.extract_strided_slice %425 {offsets = [0, 128], sizes = [16, 128], strides = [1, 1]} : vector<16x256xf32> to vector<16x128xf32>
    %c96_213 = arith.constant 96 : index
    %c0_214 = arith.constant 0 : index
    %428 = vector.load %arg11[%c96_213, %c0_214] : memref<128x128xf32, #tpu.memory_space<vmem>>, vector<16x128xf32>
    %429 = arith.addf %428, %426 : vector<16x128xf32>
    %430 = arith.mulf %429, %99 : vector<16x128xf32>
    %cst_215 = arith.constant 0.000000e+00 : f32
    %431 = vector.broadcast %cst_215 : f32 to vector<16x128xf32>
    %432 = arith.subf %431, %430 : vector<16x128xf32>
    %433 = math.exp %432 : vector<16x128xf32>
    %cst_216 = arith.constant 1.000000e+00 : f32
    %434 = vector.broadcast %cst_216 : f32 to vector<16x128xf32>
    %435 = arith.addf %434, %433 : vector<16x128xf32>
    %436 = tpu.reciprocal %435 {approx = true} : vector<16x128xf32> -> vector<16x128xf32>
    %437 = arith.mulf %436, %99 : vector<16x128xf32>
    %438 = arith.addf %437, %102 : vector<16x128xf32>
    %439 = vector.extract_strided_slice %438 {offsets = [0, 0], sizes = [16, 32], strides = [1, 1]} : vector<16x128xf32> to vector<16x32xf32>
    %440 = vector.extract_strided_slice %438 {offsets = [0, 32], sizes = [16, 32], strides = [1, 1]} : vector<16x128xf32> to vector<16x32xf32>
    %441 = vector.extract_strided_slice %438 {offsets = [0, 64], sizes = [16, 32], strides = [1, 1]} : vector<16x128xf32> to vector<16x32xf32>
    %442 = vector.extract_strided_slice %438 {offsets = [0, 96], sizes = [16, 32], strides = [1, 1]} : vector<16x128xf32> to vector<16x32xf32>
    %443 = arith.mulf %440, %388 : vector<16x32xf32>
    %444 = arith.mulf %439, %441 : vector<16x32xf32>
    %445 = arith.addf %443, %444 : vector<16x32xf32>
    %446 = math.tanh %445 : vector<16x32xf32>
    %447 = arith.mulf %442, %446 : vector<16x32xf32>
    %c0_217 = arith.constant 0 : index
    %c0_218 = arith.constant 0 : index
    %448 = vector.load %arg3[%c0_217, %c0_218] : memref<32x16xf32, #tpu.memory_space<vmem>>, vector<32x16xf32>
    %cst_219 = arith.constant dense<0.000000e+00> : vector<16x16xf32>
    %449 = tpu.matmul %447, %448, %cst_219 {dimension_numbers = #tpu.dot_dimension_numbers<[1], [0], [0], [1], [0, 0, 1, 1], [], []>} : vector<16x32xf32>, vector<32x16xf32>, vector<16x16xf32> -> vector<16x16xf32>
    %c6_220 = arith.constant 6 : index
    %c0_221 = arith.constant 0 : index
    %c0_222 = arith.constant 0 : index
    %450 = vector.load %arg0[%c6_220, %c0_221, %c0_222] : memref<8x16x16xf32, #tpu.memory_space<vmem>>, vector<1x16x16xf32>
    %451 = vector.shape_cast %450 : vector<1x16x16xf32> to vector<16x16xf32>
    %cst_223 = arith.constant dense<0.000000e+00> : vector<16x16xf32>
    %452 = tpu.matmul %451, %449, %cst_223 {dimension_numbers = #tpu.dot_dimension_numbers<[1], [0], [0], [1], [0, 0, 1, 1], [], []>} : vector<16x16xf32>, vector<16x16xf32>, vector<16x16xf32> -> vector<16x16xf32>
    %cst_224 = arith.constant 0.000000e+00 : f32
    %453 = vector.broadcast %cst_224 : f32 to vector<16x16xf32>
    %454 = arith.maximumf %452, %453 : vector<16x16xf32>
    %c0_225 = arith.constant 0 : index
    %c0_226 = arith.constant 0 : index
    %455 = vector.load %arg7[%c0_225, %c0_226] : memref<16x128xf32, #tpu.memory_space<vmem>>, vector<16x128xf32>
    %cst_227 = arith.constant dense<0.000000e+00> : vector<16x128xf32>
    %456 = tpu.matmul %397, %455, %cst_227 {dimension_numbers = #tpu.dot_dimension_numbers<[1], [0], [0], [1], [0, 0, 1, 1], [], []>} : vector<16x16xf32>, vector<16x128xf32>, vector<16x128xf32> -> vector<16x128xf32>
    %c0_228 = arith.constant 0 : index
    %c0_229 = arith.constant 0 : index
    %457 = vector.load %arg9[%c0_228, %c0_229] : memref<1x128xf32, #tpu.memory_space<vmem>>, vector<1x128xf32>
    %458 = vector.broadcast %457 : vector<1x128xf32> to vector<16x128xf32>
    %459 = arith.addf %456, %458 : vector<16x128xf32>
    %460 = arith.addf %459, %427 : vector<16x128xf32>
    %461 = arith.mulf %460, %99 : vector<16x128xf32>
    %cst_230 = arith.constant 0.000000e+00 : f32
    %462 = vector.broadcast %cst_230 : f32 to vector<16x128xf32>
    %463 = arith.subf %462, %461 : vector<16x128xf32>
    %464 = math.exp %463 : vector<16x128xf32>
    %cst_231 = arith.constant 1.000000e+00 : f32
    %465 = vector.broadcast %cst_231 : f32 to vector<16x128xf32>
    %466 = arith.addf %465, %464 : vector<16x128xf32>
    %467 = tpu.reciprocal %466 {approx = true} : vector<16x128xf32> -> vector<16x128xf32>
    %468 = arith.mulf %467, %99 : vector<16x128xf32>
    %469 = arith.addf %468, %102 : vector<16x128xf32>
    %470 = vector.extract_strided_slice %469 {offsets = [0, 0], sizes = [16, 32], strides = [1, 1]} : vector<16x128xf32> to vector<16x32xf32>
    %471 = vector.extract_strided_slice %469 {offsets = [0, 32], sizes = [16, 32], strides = [1, 1]} : vector<16x128xf32> to vector<16x32xf32>
    %472 = vector.extract_strided_slice %469 {offsets = [0, 64], sizes = [16, 32], strides = [1, 1]} : vector<16x128xf32> to vector<16x32xf32>
    %473 = vector.extract_strided_slice %469 {offsets = [0, 96], sizes = [16, 32], strides = [1, 1]} : vector<16x128xf32> to vector<16x32xf32>
    %474 = arith.mulf %471, %419 : vector<16x32xf32>
    %475 = arith.mulf %470, %472 : vector<16x32xf32>
    %476 = arith.addf %474, %475 : vector<16x32xf32>
    %477 = math.tanh %476 : vector<16x32xf32>
    %478 = arith.mulf %473, %477 : vector<16x32xf32>
    %c80_232 = arith.constant 80 : index
    %c0_233 = arith.constant 0 : index
    %479 = vector.load %arg10[%c80_232, %c0_233] : memref<128x32xf32, #tpu.memory_space<vmem>>, vector<16x32xf32>
    tpu.vector_store %arg10[%c80_232, %c0_233], %478 {strides = array<i32>} : memref<128x32xf32, #tpu.memory_space<vmem>>, vector<16x32xf32>,
    %480 = tpu.concatenate %447, %478 in 1 : vector<16x32xf32>, vector<16x32xf32> -> vector<16x64xf32>
    %c0_234 = arith.constant 0 : index
    %c0_235 = arith.constant 0 : index
    %481 = vector.load %arg12[%c0_234, %c0_235] : memref<64x256xf32, #tpu.memory_space<vmem>>, vector<64x256xf32>
    %cst_236 = arith.constant dense<0.000000e+00> : vector<16x256xf32>
    %482 = tpu.matmul %480, %481, %cst_236 {dimension_numbers = #tpu.dot_dimension_numbers<[1], [0], [0], [1], [0, 0, 1, 1], [], []>} : vector<16x64xf32>, vector<64x256xf32>, vector<16x256xf32> -> vector<16x256xf32>
    %483 = vector.extract_strided_slice %482 {offsets = [0, 0], sizes = [16, 128], strides = [1, 1]} : vector<16x256xf32> to vector<16x128xf32>
    %484 = vector.extract_strided_slice %482 {offsets = [0, 128], sizes = [16, 128], strides = [1, 1]} : vector<16x256xf32> to vector<16x128xf32>
    %c112_237 = arith.constant 112 : index
    %c0_238 = arith.constant 0 : index
    %485 = vector.load %arg11[%c112_237, %c0_238] : memref<128x128xf32, #tpu.memory_space<vmem>>, vector<16x128xf32>
    %486 = arith.addf %485, %483 : vector<16x128xf32>
    %487 = arith.mulf %486, %99 : vector<16x128xf32>
    %cst_239 = arith.constant 0.000000e+00 : f32
    %488 = vector.broadcast %cst_239 : f32 to vector<16x128xf32>
    %489 = arith.subf %488, %487 : vector<16x128xf32>
    %490 = math.exp %489 : vector<16x128xf32>
    %cst_240 = arith.constant 1.000000e+00 : f32
    %491 = vector.broadcast %cst_240 : f32 to vector<16x128xf32>
    %492 = arith.addf %491, %490 : vector<16x128xf32>
    %493 = tpu.reciprocal %492 {approx = true} : vector<16x128xf32> -> vector<16x128xf32>
    %494 = arith.mulf %493, %99 : vector<16x128xf32>
    %495 = arith.addf %494, %102 : vector<16x128xf32>
    %496 = vector.extract_strided_slice %495 {offsets = [0, 0], sizes = [16, 32], strides = [1, 1]} : vector<16x128xf32> to vector<16x32xf32>
    %497 = vector.extract_strided_slice %495 {offsets = [0, 32], sizes = [16, 32], strides = [1, 1]} : vector<16x128xf32> to vector<16x32xf32>
    %498 = vector.extract_strided_slice %495 {offsets = [0, 64], sizes = [16, 32], strides = [1, 1]} : vector<16x128xf32> to vector<16x32xf32>
    %499 = vector.extract_strided_slice %495 {offsets = [0, 96], sizes = [16, 32], strides = [1, 1]} : vector<16x128xf32> to vector<16x32xf32>
    %500 = arith.mulf %497, %445 : vector<16x32xf32>
    %501 = arith.mulf %496, %498 : vector<16x32xf32>
    %502 = arith.addf %500, %501 : vector<16x32xf32>
    %503 = math.tanh %502 : vector<16x32xf32>
    %504 = arith.mulf %499, %503 : vector<16x32xf32>
    %c0_241 = arith.constant 0 : index
    %c0_242 = arith.constant 0 : index
    %505 = vector.load %arg3[%c0_241, %c0_242] : memref<32x16xf32, #tpu.memory_space<vmem>>, vector<32x16xf32>
    %cst_243 = arith.constant dense<0.000000e+00> : vector<16x16xf32>
    %506 = tpu.matmul %504, %505, %cst_243 {dimension_numbers = #tpu.dot_dimension_numbers<[1], [0], [0], [1], [0, 0, 1, 1], [], []>} : vector<16x32xf32>, vector<32x16xf32>, vector<16x16xf32> -> vector<16x16xf32>
    %c7_244 = arith.constant 7 : index
    %c0_245 = arith.constant 0 : index
    %c0_246 = arith.constant 0 : index
    %507 = vector.load %arg0[%c7_244, %c0_245, %c0_246] : memref<8x16x16xf32, #tpu.memory_space<vmem>>, vector<1x16x16xf32>
    %508 = vector.shape_cast %507 : vector<1x16x16xf32> to vector<16x16xf32>
    %cst_247 = arith.constant dense<0.000000e+00> : vector<16x16xf32>
    %509 = tpu.matmul %508, %506, %cst_247 {dimension_numbers = #tpu.dot_dimension_numbers<[1], [0], [0], [1], [0, 0, 1, 1], [], []>} : vector<16x16xf32>, vector<16x16xf32>, vector<16x16xf32> -> vector<16x16xf32>
    %cst_248 = arith.constant 0.000000e+00 : f32
    %510 = vector.broadcast %cst_248 : f32 to vector<16x16xf32>
    %511 = arith.maximumf %509, %510 : vector<16x16xf32>
    %c0_249 = arith.constant 0 : index
    %c0_250 = arith.constant 0 : index
    %512 = vector.load %arg7[%c0_249, %c0_250] : memref<16x128xf32, #tpu.memory_space<vmem>>, vector<16x128xf32>
    %cst_251 = arith.constant dense<0.000000e+00> : vector<16x128xf32>
    %513 = tpu.matmul %454, %512, %cst_251 {dimension_numbers = #tpu.dot_dimension_numbers<[1], [0], [0], [1], [0, 0, 1, 1], [], []>} : vector<16x16xf32>, vector<16x128xf32>, vector<16x128xf32> -> vector<16x128xf32>
    %c0_252 = arith.constant 0 : index
    %c0_253 = arith.constant 0 : index
    %514 = vector.load %arg9[%c0_252, %c0_253] : memref<1x128xf32, #tpu.memory_space<vmem>>, vector<1x128xf32>
    %515 = vector.broadcast %514 : vector<1x128xf32> to vector<16x128xf32>
    %516 = arith.addf %513, %515 : vector<16x128xf32>
    %517 = arith.addf %516, %484 : vector<16x128xf32>
    %518 = arith.mulf %517, %99 : vector<16x128xf32>
    %cst_254 = arith.constant 0.000000e+00 : f32
    %519 = vector.broadcast %cst_254 : f32 to vector<16x128xf32>
    %520 = arith.subf %519, %518 : vector<16x128xf32>
    %521 = math.exp %520 : vector<16x128xf32>
    %cst_255 = arith.constant 1.000000e+00 : f32
    %522 = vector.broadcast %cst_255 : f32 to vector<16x128xf32>
    %523 = arith.addf %522, %521 : vector<16x128xf32>
    %524 = tpu.reciprocal %523 {approx = true} : vector<16x128xf32> -> vector<16x128xf32>
    %525 = arith.mulf %524, %99 : vector<16x128xf32>
    %526 = arith.addf %525, %102 : vector<16x128xf32>
    %527 = vector.extract_strided_slice %526 {offsets = [0, 0], sizes = [16, 32], strides = [1, 1]} : vector<16x128xf32> to vector<16x32xf32>
    %528 = vector.extract_strided_slice %526 {offsets = [0, 32], sizes = [16, 32], strides = [1, 1]} : vector<16x128xf32> to vector<16x32xf32>
    %529 = vector.extract_strided_slice %526 {offsets = [0, 64], sizes = [16, 32], strides = [1, 1]} : vector<16x128xf32> to vector<16x32xf32>
    %530 = vector.extract_strided_slice %526 {offsets = [0, 96], sizes = [16, 32], strides = [1, 1]} : vector<16x128xf32> to vector<16x32xf32>
    %531 = arith.mulf %528, %476 : vector<16x32xf32>
    %532 = arith.mulf %527, %529 : vector<16x32xf32>
    %533 = arith.addf %531, %532 : vector<16x32xf32>
    %534 = math.tanh %533 : vector<16x32xf32>
    %535 = arith.mulf %530, %534 : vector<16x32xf32>
    %c96_256 = arith.constant 96 : index
    %c0_257 = arith.constant 0 : index
    %536 = vector.load %arg10[%c96_256, %c0_257] : memref<128x32xf32, #tpu.memory_space<vmem>>, vector<16x32xf32>
    tpu.vector_store %arg10[%c96_256, %c0_257], %535 {strides = array<i32>} : memref<128x32xf32, #tpu.memory_space<vmem>>, vector<16x32xf32>,
    %537 = tpu.concatenate %504, %535 in 1 : vector<16x32xf32>, vector<16x32xf32> -> vector<16x64xf32>
    %c0_258 = arith.constant 0 : index
    %c0_259 = arith.constant 0 : index
    %538 = vector.load %arg12[%c0_258, %c0_259] : memref<64x256xf32, #tpu.memory_space<vmem>>, vector<64x256xf32>
    %cst_260 = arith.constant dense<0.000000e+00> : vector<16x256xf32>
    %539 = tpu.matmul %537, %538, %cst_260 {dimension_numbers = #tpu.dot_dimension_numbers<[1], [0], [0], [1], [0, 0, 1, 1], [], []>} : vector<16x64xf32>, vector<64x256xf32>, vector<16x256xf32> -> vector<16x256xf32>
    %540 = vector.extract_strided_slice %539 {offsets = [0, 128], sizes = [16, 128], strides = [1, 1]} : vector<16x256xf32> to vector<16x128xf32>
    %c0_261 = arith.constant 0 : index
    %c0_262 = arith.constant 0 : index
    %541 = vector.load %arg7[%c0_261, %c0_262] : memref<16x128xf32, #tpu.memory_space<vmem>>, vector<16x128xf32>
    %cst_263 = arith.constant dense<0.000000e+00> : vector<16x128xf32>
    %542 = tpu.matmul %511, %541, %cst_263 {dimension_numbers = #tpu.dot_dimension_numbers<[1], [0], [0], [1], [0, 0, 1, 1], [], []>} : vector<16x16xf32>, vector<16x128xf32>, vector<16x128xf32> -> vector<16x128xf32>
    %c0_264 = arith.constant 0 : index
    %c0_265 = arith.constant 0 : index
    %543 = vector.load %arg9[%c0_264, %c0_265] : memref<1x128xf32, #tpu.memory_space<vmem>>, vector<1x128xf32>
    %544 = vector.broadcast %543 : vector<1x128xf32> to vector<16x128xf32>
    %545 = arith.addf %542, %544 : vector<16x128xf32>
    %546 = arith.addf %545, %540 : vector<16x128xf32>
    %547 = arith.mulf %546, %99 : vector<16x128xf32>
    %cst_266 = arith.constant 0.000000e+00 : f32
    %548 = vector.broadcast %cst_266 : f32 to vector<16x128xf32>
    %549 = arith.subf %548, %547 : vector<16x128xf32>
    %550 = math.exp %549 : vector<16x128xf32>
    %cst_267 = arith.constant 1.000000e+00 : f32
    %551 = vector.broadcast %cst_267 : f32 to vector<16x128xf32>
    %552 = arith.addf %551, %550 : vector<16x128xf32>
    %553 = tpu.reciprocal %552 {approx = true} : vector<16x128xf32> -> vector<16x128xf32>
    %554 = arith.mulf %553, %99 : vector<16x128xf32>
    %555 = arith.addf %554, %102 : vector<16x128xf32>
    %556 = vector.extract_strided_slice %555 {offsets = [0, 0], sizes = [16, 32], strides = [1, 1]} : vector<16x128xf32> to vector<16x32xf32>
    %557 = vector.extract_strided_slice %555 {offsets = [0, 32], sizes = [16, 32], strides = [1, 1]} : vector<16x128xf32> to vector<16x32xf32>
    %558 = vector.extract_strided_slice %555 {offsets = [0, 64], sizes = [16, 32], strides = [1, 1]} : vector<16x128xf32> to vector<16x32xf32>
    %559 = vector.extract_strided_slice %555 {offsets = [0, 96], sizes = [16, 32], strides = [1, 1]} : vector<16x128xf32> to vector<16x32xf32>
    %560 = arith.mulf %557, %533 : vector<16x32xf32>
    %561 = arith.mulf %556, %558 : vector<16x32xf32>
    %562 = arith.addf %560, %561 : vector<16x32xf32>
    %563 = math.tanh %562 : vector<16x32xf32>
    %564 = arith.mulf %559, %563 : vector<16x32xf32>
    %c112_268 = arith.constant 112 : index
    %c0_269 = arith.constant 0 : index
    %565 = vector.load %arg10[%c112_268, %c0_269] : memref<128x32xf32, #tpu.memory_space<vmem>>, vector<16x32xf32>
    tpu.vector_store %arg10[%c112_268, %c0_269], %564 {strides = array<i32>} : memref<128x32xf32, #tpu.memory_space<vmem>>, vector<16x32xf32>,
    return
  }
}

</mosaic_0001>

<bundles_post_ra>
// kernel: sp_gcn_lstm_b_forward.1
= control target key start
LH: loop header
LB: loop body
LE: loop exit
PB: predicated region body
PF: predicated region fallthrough
CT: control target
= control target key end

     0   :  { %vm85_vm0 = vcmask 64512   ;;  %s8225_s0 = inlined_call_operand.vmem [shape: f32[8,16,16], index: 0, kind: input, shape index: {}]   ;;  %s8226_s1 = inlined_call_operand.vmem [shape: f32[128,8], index: 1, kind: input, shape index: {}]   ;;  %s8227_s2 = inlined_call_operand.vmem [shape: f32[8,32], index: 2, kind: input, shape index: {}]   ;;  %s8228_s3 = inlined_call_operand.vmem [shape: f32[32,16], index: 3, kind: input, shape index: {}]   ;;  %s8229_s4 = inlined_call_operand.vmem [shape: f32[32,128], index: 4, kind: input, shape index: {}]   ;;  %s8230_s5 = inlined_call_operand.vmem [shape: f32[32,128], index: 5, kind: input, shape index: {}]   ;;  %s8231_s6 = inlined_call_operand.vmem [shape: f32[1,128], index: 6, kind: input, shape index: {}]   ;;  %s8232_s7 = inlined_call_operand.vmem [shape: f32[16,128], index: 7, kind: input, shape index: {}]   ;;  %s8233_s8 = inlined_call_operand.vmem [shape: f32[32,128], index: 8, kind: input, shape index: {}]   ;;  %s8234_s9 = inlined_call_operand.vmem [shape: f32[1,128], index: 9, kind: input, shape index: {}]   ;;  %s8235_s10 = inlined_call_operand.hbm [shape: f32[128,32], index: 10, kind: output, shape index: {}]  }
   0x1   :  { %v84_v0 = vld [vmem:[%s8227_s2] sm:$0xff]  ;;  %v69_v2 = vld [vmem:[%s8226_s1 + $0x8] sm:$0xff] }
   0x2   :  { %v68_v1 = vld [vmem:[%s8226_s1] sm:$0xff]  ;;  %6003 = vmatprep.subr.mxu0 %v84_v0 }
   0x3   :  { %6005 = vmatprep.mubr.msk.f32.mxu0 %vm85_vm0, %v68_v1  ;;  %v80_v3 = vld [vmem:[%s8226_s1 + $0x60] sm:$0xff] }
   0x4   :  { %15 = vsyncpa [#allocation5], 0  ;;  %6004 = vmatpush3.msra.mxu0 %v84_v0  ;;  %6705 = vmatprep.subr.mxu1 %v84_v0  ;;  %v81_v4 = vld [vmem:[%s8226_s1 + $0x68] sm:$0xff]  ;;  %v82_v5 = vld [vmem:[%s8226_s1 + $0x70] sm:$0xff]  ;;  %vm286_vm1 = vcmask 130048   ;;  %vm376_vm2 = vcmask 261120  }
   0x5   :  { %6006 = vmatmul.mubr.msk.f32.vlgmr.msra.gmra.mrb[0].mxu0 %vm85_vm0, %v69_v2  ;;  %6706 = vmatpush3.msra.mxu1 %v84_v0  ;;  %v83_v6 = vld [vmem:[%s8226_s1 + $0x78] sm:$0xff]  ;;  %v7025_v7 = vld [vmem:[%s8225_s0] sm:$0xff]  ;;  %v70_v8 = vld [vmem:[%s8226_s1 + $0x10] sm:$0xff]  ;;  %s6935_s30 = smov 64   ;;  %s6936_s11 = smov 32   ;;  %vm1666_vm6 = vcmask 523264  }
   0x6   :  { %6023 = vmatprep.mubr.msk.f32.mxu1 %vm85_vm0, %v80_v3  ;;  %6008 = vmatprep.mubr.msk.f32.mxu0 %vm85_vm0, %v70_v8  ;;  %v71_v9 = vld [vmem:[%s8226_s1 + $0x18] sm:$0xff]  ;;  %v279_v10 = vld [vmem:[%s8229_s4] sm:$0xff]  ;;  %v280_v11 = vld [vmem:[%s8229_s4 + $0x8] sm:$0xff] }
   0x7   :  { %6024 = vmatmul.mubr.msk.f32.vlgmr.msra.gmra.mrb[0].mxu1 %vm85_vm0, %v81_v4  ;;  %v7043_v12 = vpack.c.bf16 %v280_v11, %v279_v10  ;;  %v7050_v16 = vld [vmem:[%s8225_s0 + $0x8] sm:$0xff]  ;;  %v281_v23 = vld [vmem:[%s8229_s4 + $0x10] sm:$0xff]  ;;  %v282_v24 = vld [vmem:[%s8229_s4 + $0x18] sm:$0xff] }
   0x8   :  { %6026 = vmatprep.mubr.msk.f32.mxu1 %vm85_vm0, %v82_v5  ;;  %v7066_v25 = vpack.c.bf16 %v282_v24, %v281_v23  ;;  %v72_v29 = vld [vmem:[%s8226_s1 + $0x20] sm:$0xff]  ;;  %v73_v30 = vld [vmem:[%s8226_s1 + $0x28] sm:$0xff]  ;;  %v74_v31 = vld [vmem:[%s8226_s1 + $0x30] sm:$0xff] }
   0x9   :  { %6009 = vmatmul.mubr.msk.f32.gmra.mrb[2].mxu0 %vm85_vm0, %v71_v9  ;;  %6402 = vmatprep.subr.bf16.mxu0 %v7043_v12  ;;  %v75_v32 = vld [vmem:[%s8226_s1 + $0x38] sm:$0xff]  ;;  %v7091_v37 = vld [vmem:[%s8225_s0 + $0x10] sm:$0xff]  ;;  %v76_v44 = vld [vmem:[%s8226_s1 + $0x40] sm:$0xff] }
   0xa   :  { %6404 = vmatpush3.bf16.msra.mxu0 %v7043_v12  ;;  %6011 = vmatprep.mubr.msk.f32.mxu0 %vm85_vm0, %v72_v29  ;;  %v7100_v38 = vld [vmem:[%s8225_s0 + $0x18] sm:$0xff]  ;;  %v77_v45 = vld [vmem:[%s8226_s1 + $0x48] sm:$0xff]  ;;  %v78_v47 = vld [vmem:[%s8226_s1 + $0x50] sm:$0xff] }
   0xb   :  { %6027 = vmatmul.mubr.msk.f32.gmra.mrb[2].mxu1 %vm85_vm0, %v83_v6  ;;  %6406 = vmatprep.subr.bf16.mxu0 %v7066_v25  ;;  %v79_v48 = vld [vmem:[%s8226_s1 + $0x58] sm:$0xff]  ;;  %v7131_v55 = vld [vmem:[%s8225_s0 + $0x20] sm:$0xff]  ;;  %v7140_v56 = vld [vmem:[%s8225_s0 + $0x28] sm:$0xff] }
   0xc   :  { %6033 = vmatprep.mubr.msk.f32.mxu1 %vm286_vm1, %v7025_v7  ;;  %v5678_v57 = vld [vmem:[%s8225_s0 + $0x30] sm:$0xff]  ;;  %v5679_v58 = vld [vmem:[%s8225_s0 + $0x38] sm:$0xff]  ;;  %v5684_v8 = vld [vmem:[%s8225_s0 + $0x40] sm:$0xff] }
   0xd   :  { %6012 = vmatmul.mubr.msk.f32.gmra.mrb[4].mxu0 %vm85_vm0, %v73_v30  ;;  %v5696_v29 = vld [vmem:[%s8225_s0 + $0x60] sm:$0xff] }
   0xe   :  { %6408 = vmatpush3.bf16.msra.mxu0 %v7066_v25  ;;  %6014 = vmatprep.mubr.msk.f32.mxu0 %vm85_vm0, %v74_v31 }
  0x11   :  { %6015 = vmatmul.mubr.msk.f32.gmra.mrb[6].mxu0 %vm85_vm0, %v75_v32 }
  0x12   :  { %6017 = vmatprep.mubr.msk.f32.mxu0 %vm85_vm0, %v76_v44 }
  0x15   :  { %6018 = vmatmul.mubr.msk.f32.gmra.mrb[8].mxu0 %vm85_vm0, %v77_v45  ;;  %v54_v45 = vld [vmem:[%s8230_s5 + $0x10] sm:$0xff] }
  0x16   :  { %6020 = vmatprep.mubr.msk.f32.mxu0 %vm85_vm0, %v78_v47  ;;  %v60_v47 = vld [vmem:[%s8233_s8] sm:$0xff] }
  0x19   :  { %6021 = vmatmul.mubr.msk.f32.gmra.mrb[10].mxu0 %vm85_vm0, %v79_v48  ;;  %v61_v48 = vld [vmem:[%s8233_s8 + $0x8] sm:$0xff] }
  0xd8   :  { %v6007_v13 = vpop.f32.mrb[0].mxu0 }
  0xd9   :  { %v200_v14 = vpop.f32.mrb[1].mxu0 }
  0xda   :  { %v6373_v15 = vpack.c.bf16 %v6007_v13, %v200_v14  ;;  %v6025_v17 = vpop.f32.mrb[0].mxu1  ;;  %v5685_v14 = vld [vmem:[%s8225_s0 + $0x48] sm:$0xff] }
  0xdb   :  { %v260_v18 = vpop.f32.mrb[1].mxu1 }
  0xdc   :  { %6374 = vmatprep.subr.bf16.mxu1 %v6373_v15  ;;  %v7056_v19 = vpack.c.bf16 %v6025_v17, %v260_v18  ;;  %v6010_v26 = vpop.f32.mrb[2].mxu0  ;;  %v5691_v17 = vld [vmem:[%s8225_s0 + $0x58] sm:$0xff] }
  0xdd   :  { %6376 = vmatpush3.bf16.msra.mxu1 %v6373_v15  ;;  %v210_v27 = vpop.f32.mrb[3].mxu0  ;;  %v5690_v15 = vld [vmem:[%s8225_s0 + $0x50] sm:$0xff] }
  0xde   :  { %6378 = vmatprep.subr.bf16.mxu1 %v7043_v12  ;;  %v6028_v20 = vpop.f32.mrb[2].mxu1  ;;  %v6385_v28 = vpack.c.bf16 %v6010_v26, %v210_v27 }
  0xdf   :  { %v270_v21 = vpop.f32.mrb[3].mxu1 }
  0xe0   :  { %6034 = vmatmul.mubr.msk.f32.vlgmr.msra.gmra.mrb[4].mxu1 %vm286_vm1, %v7050_v16  ;;  %v7058_v22 = vpack.c.bf16 %v6028_v20, %v270_v21  ;;  %v6013_v39 = vpop.f32.mrb[4].mxu0 }
  0xe1   :  { %6380 = vmatpush3.bf16.msra.mxu1 %v7043_v12  ;;  %v220_v40 = vpop.f32.mrb[5].mxu0 }
  0xe2   :  { %6382 = vmatprep.subr.bf16.mxu1 %v7066_v25  ;;  %v6397_v41 = vpack.c.bf16 %v6013_v39, %v220_v40  ;;  %v52_v39 = vld [vmem:[%s8230_s5] sm:$0xff] }
  0xe4   :  { %v6016_v42 = vpop.f32.mrb[6].mxu0 }
  0xe5   :  { %6384 = vmatpush3.bf16.msra.mxu1 %v7066_v25  ;;  %v230_v43 = vpop.f32.mrb[7].mxu0 }
  0xe6   :  { %6386 = vmatprep.subr.bf16.mxu1 %v6385_v28  ;;  %v6409_v46 = vpack.c.bf16 %v6016_v42, %v230_v43 }
  0xe8   :  { %v6019_v59 = vpop.f32.mrb[8].mxu0 }
  0xe9   :  { %v240_v60 = vpop.f32.mrb[9].mxu0 }
  0xea   :  { %v6421_v61 = vpack.c.bf16 %v6019_v59, %v240_v60 }
  0xec   :  { %v6022_v62 = vpop.f32.mrb[10].mxu0  ;;  %6422 = vmatprep.subr.bf16.mxu0 %v6421_v61 }
  0xed   :  { %v250_v63 = vpop.f32.mrb[11].mxu0 }
  0xee   :  { %v6433_v0 = vpack.c.bf16 %v6022_v62, %v250_v63  ;;  %v7284_v63 = vld [vmem:[%s8231_s6] ss:$0 sm:$0xff] }
 0x1b3   :  { %v6035_v33 = vpop.f32.mrb[4].mxu1 }
 0x1b4   :  { %v359_v34 = vpop.f32.mrb[5].mxu1  ;;  %v369_v36 = vmax.f32 %v6035_v33, 0.0 }
 0x1b5   :  { %v368_v35 = vmax.f32 %v359_v34, 0.0  ;;  %v5697_v34 = vld [vmem:[%s8225_s0 + $0x68] sm:$0xff] }
 0x1b7   :  { %6044 = vmatprep.mubr.msk.f32.mxu1 %vm376_vm2, %v368_v35 }
 0x1b8   :  { %6045 = vmatmul.mubr.msk.f32.vlgmr.msra.gmra.mrb[6].mxu1 %vm376_vm2, %v369_v36 }
 0x1b9   :  { %6388 = vmatpush3.bf16.msra.mxu1 %v6385_v28  ;;  %6051 = vmatprep.mubr.msk.f32.mxu1 %vm286_vm1, %v7091_v37 }
 0x1ba   :  { %6390 = vmatprep.subr.bf16.mxu1 %v7043_v12 }
 0x1bc   :  { %6052 = vmatmul.mubr.msk.f32.vlgmr.msra.gmra.mrb[8].mxu1 %vm286_vm1, %v7100_v38 }
 0x1bd   :  { %6392 = vmatpush3.bf16.msra.mxu1 %v7043_v12 }
 0x1be   :  { %6394 = vmatprep.subr.bf16.mxu1 %v7066_v25 }
 0x1c1   :  { %6396 = vmatpush3.bf16.msra.mxu1 %v7066_v25 }
 0x1c2   :  { %6398 = vmatprep.subr.bf16.mxu1 %v6397_v41 }
 0x28b   :  { %v7124_v49 = vpop.f32.mrb[6].mxu1 }
 0x28c   :  { %v7126_v50 = vpop.f32.mrb[7].mxu1 }
 0x28f   :  { %v6053_v51 = vpop.f32.mrb[8].mxu1 }
 0x290   :  { %v535_v52 = vpop.f32.mrb[9].mxu1  ;;  %v545_v54 = vmax.f32 %v6053_v51, 0.0 }
 0x291   :  { %v544_v53 = vmax.f32 %v535_v52, 0.0  ;;  %v6933_v52 = vmov 0.0  }
 0x293   :  { %6062 = vmatprep.mubr.msk.f32.mxu1 %vm376_vm2, %v544_v53  ;;  %v7249_v53 = vpack.c.bf16 %v61_v48, %v60_v47  ;;  %v5703_v47 = vld [vmem:[%s8225_s0 + $0x78] sm:$0xff] }
 0x294   :  { %6063 = vmatmul.mubr.msk.f32.vlgmr.msra.gmra.mrb[10].mxu1 %vm376_vm2, %v545_v54  ;;  %v62_v54 = vld [vmem:[%s8233_s8 + $0x10] sm:$0xff] }
 0x295   :  { %6400 = vmatpush3.bf16.msra.mxu1 %v6397_v41  ;;  %6069 = vmatprep.mubr.msk.f32.mxu1 %vm286_vm1, %v7131_v55 }
 0x296   :  { %6410 = vmatprep.subr.bf16.mxu1 %v6409_v46 }
 0x298   :  { %6070 = vmatmul.mubr.msk.f32.vlgmr.msra.gmra.mrb[12].mxu1 %vm286_vm1, %v7140_v56 }
 0x299   :  { %6412 = vmatpush3.bf16.msra.mxu1 %v6409_v46  ;;  %6087 = vmatprep.mubr.msk.f32.mxu1 %vm286_vm1, %v5678_v57  ;;  %v55_v46 = vld [vmem:[%s8230_s5 + $0x18] sm:$0xff] }
 0x29a   :  { %6414 = vmatprep.subr.bf16.mxu1 %v7043_v12  ;;  %v7245_v51 = vpack.c.bf16 %v55_v46, %v54_v45  ;;  %v63_v57 = vld [vmem:[%s8233_s8 + $0x18] sm:$0xff]  ;;  %v5702_v46 = vld [vmem:[%s8225_s0 + $0x70] sm:$0xff] }
 0x29c   :  { %6088 = vmatmul.mubr.msk.f32.vlgmr.msra.gmra.mrb[14].mxu1 %vm286_vm1, %v5679_v58  ;;  %v7259_v58 = vpack.c.bf16 %v63_v57, %v62_v54 }
 0x29d   :  { %6416 = vmatpush3.bf16.msra.mxu1 %v7043_v12 }
 0x29e   :  { %6418 = vmatprep.subr.bf16.mxu1 %v7066_v25 }
 0x2a1   :  { %6420 = vmatpush3.bf16.msra.mxu1 %v7066_v25 }
 0x2a2   :  { %6434 = vmatprep.subr.bf16.mxu1 %v6433_v0 }
 0x367   :  { %v7156_v1 = vpop.f32.mrb[10].mxu1 }
 0x368   :  { %v7158_v2 = vpop.f32.mrb[11].mxu1 }
 0x36b   :  { %v6071_v3 = vpop.f32.mrb[12].mxu1 }
 0x36c   :  { %v704_v4 = vpop.f32.mrb[13].mxu1  ;;  %v714_v6 = vmax.f32 %v6071_v3, 0.0  ;;  %v450_v3 = vadd.f32 %v7284_v63, %v7126_v50 }
 0x36d   :  { %v713_v5 = vmax.f32 %v704_v4, 0.0  ;;  %v6934_v4 = vmov 1.0  }
 0x36f   :  { %6080 = vmatprep.mubr.msk.f32.mxu0 %vm376_vm2, %v713_v5  ;;  %v6089_v9 = vpop.f32.mrb[14].mxu1 }
 0x370   :  { %v883_v10 = vmax.f32 %v6089_v9, 0.0  ;;  %6081 = vmatmul.mubr.msk.f32.vlgmr.msra.gmra.mrb[12].mxu0 %vm376_vm2, %v714_v6  ;;  %v873_v11 = vpop.f32.mrb[15].mxu1 }
 0x371   :  { %v882_v13 = vmax.f32 %v873_v11, 0.0  ;;  %6424 = vmatpush3.bf16.msra.mxu0 %v6421_v61  ;;  %6105 = vmatprep.mubr.msk.f32.mxu0 %vm286_vm1, %v5684_v8  ;;  %v1643_v61 = vlaneseq }
 0x372   :  { %6426 = vmatprep.subr.bf16.mxu0 %v7043_v12 }
 0x373   :  { %6098 = vmatprep.mubr.msk.f32.mxu1 %vm376_vm2, %v882_v13  ;;  %v1644_v62 = vand.u32 127, %v1643_v61 }
 0x374   :  { %6099 = vmatmul.mubr.msk.f32.vlgmr.msra.gmra.mrb[16].mxu1 %vm376_vm2, %v883_v10  ;;  %6106 = vmatmul.mubr.msk.f32.vlgmr.msra.gmra.mrb[14].mxu0 %vm286_vm1, %v5685_v14  ;;  %v455_v10 = vadd.f32 %v7124_v49, %v7284_v63 }
 0x375   :  { %6428 = vmatpush3.bf16.msra.mxu0 %v7043_v12  ;;  %6436 = vmatpush3.bf16.msra.mxu1 %v6433_v0  ;;  %vm1645_vm3 = vcmp.ge.s32.totalorder %v1644_v62, 64  ;;  %vm1646_vm4 = vcmp.lt.s32.totalorder %v1644_v62, 96 }
 0x376   :  { %6430 = vmatprep.subr.bf16.mxu0 %v7066_v25  ;;  %6123 = vmatprep.mubr.msk.f32.mxu1 %vm286_vm1, %v5690_v15  ;;  %vm7286_vm5 = vmand %vm1645_vm3, %vm1646_vm4 }
 0x377   :  { %6438 = vmatprep.subr.bf16.mxu1 %v7043_v12  ;;  %v7294_v5 = vsel %vm7286_vm5, 2.0, %v6934_v4 }
 0x378   :  { %6124 = vmatmul.mubr.msk.f32.vlgmr.msra.gmra.mrb[18].mxu1 %vm286_vm1, %v5691_v17 }
 0x379   :  { %6432 = vmatpush3.bf16.msra.mxu0 %v7066_v25  ;;  %6440 = vmatpush3.bf16.msra.mxu1 %v7043_v12 }
 0x37a   :  { %6446 = vmatprep.subr.bf16.mxu0 %v7056_v19  ;;  %6442 = vmatprep.subr.bf16.mxu1 %v7066_v25 }
 0x37d   :  { %6444 = vmatpush3.bf16.msra.mxu1 %v7066_v25 }
 0x37e   :  { %6458 = vmatprep.subr.bf16.mxu1 %v7058_v22 }
 0x443   :  { %v7190_v18 = vpop.f32.mrb[12].mxu0 }
 0x444   :  { %v7192_v20 = vpop.f32.mrb[13].mxu0 }
 0x447   :  { %v6107_v21 = vpop.f32.mrb[14].mxu0  ;;  %v7194_v23 = vpop.f32.mrb[16].mxu1 }
 0x448   :  { %v1042_v24 = vpop.f32.mrb[15].mxu0  ;;  %v7196_v26 = vpop.f32.mrb[17].mxu1  ;;  %v1052_v28 = vmax.f32 %v6107_v21, 0.0 }
 0x449   :  { %v1051_v27 = vmax.f32 %v1042_v24, 0.0 }
 0x44b   :  { %6116 = vmatprep.mubr.msk.f32.mxu0 %vm376_vm2, %v1051_v27  ;;  %v6125_v30 = vpop.f32.mrb[18].mxu1 }
 0x44c   :  { %v1221_v31 = vmax.f32 %v6125_v30, 0.0  ;;  %6117 = vmatmul.mubr.msk.f32.vlgmr.msra.gmra.mrb[16].mxu0 %vm376_vm2, %v1052_v28  ;;  %v1211_v32 = vpop.f32.mrb[19].mxu1 }
 0x44d   :  { %v1220_v33 = vmax.f32 %v1211_v32, 0.0  ;;  %6448 = vmatpush3.bf16.msra.mxu0 %v7056_v19  ;;  %6141 = vmatprep.mubr.msk.f32.mxu0 %vm286_vm1, %v5696_v29  ;;  %v6932_v19 = vmov 0.0|0.0   ;;  %v7303_v32 = vsel %vm7286_vm5, -1.0, %v6933_v52 }
 0x44e   :  { %6450 = vmatprep.subr.bf16.mxu0 %v7043_v12 }
 0x44f   :  { %6134 = vmatprep.mubr.msk.f32.mxu1 %vm376_vm2, %v1220_v33 }
 0x450   :  { %6135 = vmatmul.mubr.msk.f32.vlgmr.msra.gmra.mrb[20].mxu1 %vm376_vm2, %v1221_v31  ;;  %6142 = vmatmul.mubr.msk.f32.vlgmr.msra.gmra.mrb[18].mxu0 %vm286_vm1, %v5697_v34 }
 0x451   :  { %6460 = vmatpush3.bf16.msra.mxu1 %v7058_v22  ;;  %6452 = vmatpush3.bf16.msra.mxu0 %v7043_v12  ;;  %v53_v22 = vld [vmem:[%s8230_s5 + $0x8] sm:$0xff] }
 0x452   :  { %6454 = vmatprep.subr.bf16.mxu0 %v7066_v25  ;;  %6462 = vmatprep.subr.bf16.mxu1 %v7043_v12  ;;  %v7228_v43 = vpack.c.bf16 %v53_v22, %v52_v39 }
 0x453   :  { %6159 = vmatprep.mubr.msk.f32.mxu1 %vm286_vm1, %v5702_v46 }
 0x454   :  { %6160 = vmatmul.mubr.msk.f32.vlgmr.msra.gmra.mrb[22].mxu1 %vm286_vm1, %v5703_v47 }
 0x455   :  { %6456 = vmatpush3.bf16.msra.mxu0 %v7066_v25  ;;  %6464 = vmatpush3.bf16.msra.mxu1 %v7043_v12  ;;  %v1799_v12 = vld [vmem:[%s8228_s3] sm:$0xff] }
 0x456   :  { %6469 = vmatprep.subr.bf16.mxu0 %v6932_v19  ;;  %6466 = vmatprep.subr.bf16.mxu1 %v7066_v25 }
 0x459   :  { %6468 = vmatpush3.bf16.msra.mxu1 %v7066_v25  ;;  %v1800_v25 = vld [vmem:[%s8228_s3 + $0x8] sm:$0xff] }
 0x51f   :  { %v7218_v35 = vpop.f32.mrb[16].mxu0 }
 0x520   :  { %v7220_v36 = vpop.f32.mrb[17].mxu0 }
 0x523   :  { %v6143_v40 = vpop.f32.mrb[18].mxu0 }
 0x524   :  { %v1380_v41 = vpop.f32.mrb[19].mxu0  ;;  %v1390_v44 = vmax.f32 %v6143_v40, 0.0 }
 0x525   :  { %v1389_v42 = vmax.f32 %v1380_v41, 0.0 }
 0x527   :  { %6152 = vmatprep.mubr.msk.f32.mxu0 %vm376_vm2, %v1389_v42 }
 0x528   :  { %6153 = vmatmul.mubr.msk.f32.vlgmr.msra.gmra.mrb[20].mxu0 %vm376_vm2, %v1390_v44 }
 0x529   :  { %6471 = vmatpush1.bf16.msra.mxu0 %v7228_v43  ;;  %1734 = vmatprep.mubr.f32.mxu0 %v6933_v52 }
 0x52a   :  { %6472 = vmatprep.subr.bf16.mxu0 %v6932_v19 }
 0x52d   :  { %6474 = vmatpush1.bf16.msra.mxu0 %v7245_v51 }
 0x52e   :  { %6476 = vmatprep.subr.bf16.mxu0 %v7249_v53 }
 0x531   :  { %6477 = vmatpush1.bf16.msra.mxu0 %v6932_v19 }
 0x532   :  { %6479 = vmatprep.subr.bf16.mxu0 %v7259_v58 }
 0x535   :  { %6480 = vmatpush1.bf16.msra.mxu0 %v6932_v19 }
 0x536   :  { %6493 = vmatprep.subr.bf16.mxu0 %v6932_v19 }
 0x538   :  { %1735 = vmatmul.mubr.f32.vlgmr.msra.gmra.mrb[22].mxu0 %v6933_v52 }
 0x539   :  { %1739 = vmatprep.mubr.f32.mxu0 %v6933_v52  ;;  %6495 = vmatpush1.bf16.msra.mxu0 %v7228_v43 }
 0x53a   :  { %6496 = vmatprep.subr.bf16.mxu0 %v6932_v19 }
 0x53c   :  { %1740 = vmatmul.mubr.f32.gmra.mrb[24].mxu0 %v6933_v52 }
 0x53d   :  { %6498 = vmatpush1.bf16.msra.mxu0 %v7245_v51  ;;  %2047 = vmatprep.mubr.f32.mxu0 %v6933_v52 }
 0x53e   :  { %6500 = vmatprep.subr.bf16.mxu0 %v7249_v53 }
 0x541   :  { %6501 = vmatpush1.bf16.msra.mxu0 %v6932_v19 }
 0x542   :  { %6503 = vmatprep.subr.bf16.mxu0 %v7259_v58 }
 0x545   :  { %6504 = vmatpush1.bf16.msra.mxu0 %v6932_v19 }
 0x546   :  { %6521 = vmatprep.subr.bf16.mxu0 %v6932_v19 }
 0x5fb   :  { %v7277_v59 = vpop.f32.mrb[20].mxu0 }
 0x5fc   :  { %v7279_v60 = vpop.f32.mrb[21].mxu0 }
 0x60b   :  { %v1736_v6 = vpop.f32.mrb[22].mxu0 }
 0x60c   :  { %v1747_v8 = vadd.f32 %v1736_v6, %v450_v3  ;;  %v1738_v9 = vpop.f32.mrb[23].mxu0  ;;  %v7330_v3 = vpop.f32.mrb[20].mxu1  ;;  %v7340_v6 = vpack.c.bf16 %v1800_v25, %v1799_v12 }
 0x60d   :  { %v7338_v4 = vpop.f32.mrb[21].mxu1 }
 0x60e   :  { %v1749_v11 = vmul.f32 %v1747_v8, %v7294_v5  ;;  %6482 = vmatprep.subr.bf16.mxu1 %v7340_v6 }
 0x60f   :  { %v1741_v13 = vpop.f32.mrb[24].mxu0 }
 0x610   :  { %v1751_v14 = vsub.f32 0.0, %v1749_v11  ;;  %v1748_v15 = vadd.f32 %v1741_v13, %v455_v10  ;;  %v1743_v17 = vpop.f32.mrb[25].mxu0  ;;  %v6161_v10 = vpop.f32.mrb[22].mxu1 }
 0x611   :  { %v1559_v11 = vmax.f32 %v6161_v10, 0.0  ;;  %v1549_v13 = vpop.f32.mrb[23].mxu1  ;;  %v1802_v17 = vld [vmem:[%s8228_s3 + $0x18] sm:$0xff] }
 0x612   :  { %v1753_v21 = vmul.f32 1.442695, %v1751_v14  ;;  %v1750_v50 = vmul.f32 %v1748_v15, %v7294_v5  ;;  %v1558_v14 = vmax.f32 %v1549_v13, 0.0  ;;  %v1801_v15 = vld [vmem:[%s8228_s3 + $0x10] sm:$0xff] }
 0x614   :  { %6715 = vpow2.f32 %v1753_v21  ;;  %v1752_v24 = vsub.f32 0.0, %v1750_v50  ;;  %6170 = vmatprep.mubr.msk.f32.mxu1 %vm376_vm2, %v1558_v14  ;;  %v7354_v21 = vpack.c.bf16 %v1802_v17, %v1801_v15 }
 0x615   :  { %6171 = vmatmul.mubr.msk.f32.vlgmr.msra.gmra.mrb[24].mxu1 %vm376_vm2, %v1559_v11 }
 0x616   :  { %v1755_v27 = vmul.f32 1.442695, %v1752_v24  ;;  %6484 = vmatpush3.bf16.msra.mxu1 %v7340_v6 }
 0x617   :  { %6486 = vmatprep.subr.bf16.mxu1 %v7354_v21 }
 0x618   :  { %6717 = vpow2.f32 %v1755_v27 }
 0x61a   :  { %6488 = vmatpush3.bf16.msra.mxu1 %v7354_v21 }
 0x61e   :  { %v6716_v28 = vpop.eup %6715 }
 0x61f   :  { %v1757_v29 = vadd.f32 1.0, %v6716_v28 }
 0x621   :  { %6719 = vrcp.f32 %v1757_v29 }
 0x622   :  { %v6718_v30 = vpop.eup %6717 }
 0x623   :  { %v1758_v31 = vadd.f32 1.0, %v6718_v30 }
 0x625   :  { %6721 = vrcp.f32 %v1758_v31 }
 0x62b   :  { %v6720_v49 = vpop.eup %6719 }
 0x62c   :  { %v1761_v33 = vmul.f32 %v6720_v49, %v7294_v5 }
 0x62e   :  { %v1763_v34 = vadd.f32 %v1761_v33, %v7303_v32 }
 0x62f   :  { %v6722_v39 = vpop.eup %6721 }
 0x630   :  { %1769 = vrot.lane.b32.xlu0 %v1763_v34, %s6935_s30  ;;  %v1762_v22 = vmul.f32 %v6722_v39, %v7294_v5  ;;  %v1765_v48 = vmul.f32 0.0, %v1763_v34 }
 0x632   :  { %v1764_v40 = vadd.f32 %v1762_v22, %v7303_v32 }
 0x634   :  { %1771 = vrot.lane.b32.xlu0 %v1764_v40, %s6935_s30  ;;  %v1766_v61 = vmul.f32 0.0, %v1764_v40 }
 0x6a2   :  { %v1770_v41 = vpop.permute.xlu0 %1769 }
 0x6a3   :  { %v1775_v42 = vmul.f32 %v1770_v41, %v1763_v34  ;;  %v624_v41 = vadd.f32 %v7156_v1, %v7284_v63 }
 0x6a5   :  { %1779 = vrot.lane.b32.xlu1 %v1775_v42, %s6936_s11 }
 0x6a6   :  { %v1772_v44 = vpop.permute.xlu0 %1771 }
 0x6a7   :  { %v1776_v45 = vmul.f32 %v1772_v44, %v1764_v40 }
 0x6a9   :  { %1781 = vrot.lane.b32.xlu1 %v1776_v45, %s6936_s11 }
 0x6e8   :  { %v7378_v33 = vpop.f32.mrb[24].mxu1 }
 0x717   :  { %v1780_v54 = vpop.permute.xlu1 %1779 }
 0x718   :  { %v7324_v57 = vadd.f32 %v1780_v54, %v1765_v48 }
 0x71a   :  { %6723 = vtanh.f32 %v7324_v57 }
 0x71b   :  { %v1782_v62 = vpop.permute.xlu1 %1781 }
 0x71c   :  { %v7327_v0 = vadd.f32 %v1782_v62, %v1766_v61 }
 0x71e   :  { %6725 = vtanh.f32 %v7327_v0 }
 0x724   :  { %v6724_v8 = vpop.eup %6723 }
 0x725   :  { %1791 = vrot.lane.b32.xlu0 %v6724_v8, %s6935_s30 }
 0x728   :  { %v6726_v9 = vpop.eup %6725 }
 0x729   :  { %1793 = vrot.lane.b32.xlu1 %v6726_v9, %s6935_s30 }
 0x797   :  { %v1792_v50 = vpop.permute.xlu0 %1791 }
 0x798   :  { %v1797_v24 = vmul.f32 %v1792_v50, %v1763_v34  ;;  %v7380_v34 = vpop.f32.mrb[25].mxu1 }
 0x79a   :  { %1805 = vrot.lane.b32.xlu0 %v1797_v24, %s6936_s11 }
 0x79b   :  { %v1794_v27 = vpop.permute.xlu1 %1793 }
 0x79c   :  { %v1798_v28 = vmul.f32 %v1794_v27, %v1764_v40 }
 0x79e   :  { %1807 = vrot.lane.b32.xlu1 %v1798_v28, %s6936_s11 }
 0x80c   :  { %v1806_v29 = vpop.permute.xlu0 %1805 }
 0x80d   :  { %v1975_v30 = vsel %vm376_vm2, %v1806_v29, 0.0  ;;  %6181 = vmatprep.mubr.msk.f32.mxu1 %vm376_vm2, %v1806_v29 }
 0x80e   :  { %5712 = vmatmul.mubr.msk.f32.vlgmr.msra.gmra.mrb[26].mxu0 %vm1666_vm6, %v1975_v30 }
 0x80f   :  { %2053 = vmatprep.mubr.f32.mxu0 %v6933_v52  ;;  %6523 = vmatpush1.bf16.msra.mxu0 %v7228_v43 }
 0x810   :  { %v1808_v31 = vpop.permute.xlu1 %1807  ;;  %6524 = vmatprep.subr.bf16.mxu0 %v6932_v19 }
 0x811   :  { %6182 = vmatmul.mubr.msk.f32.vlgmr.msra.gmra.mrb[26].mxu1 %vm376_vm2, %v1808_v31  ;;  %v1976_v49 = vsel %vm376_vm2, %v1808_v31, 0.0 }
 0x812   :  { %5713 = vmatmul.mubr.msk.f32.gmra.mrb[28].mxu0 %vm1666_vm6, %v1976_v49  ;;  %6188 = vmatprep.mubr.msk.f32.mxu1 %vm286_vm1, %v7025_v7  ;;  %v619_v7 = vadd.f32 %v7284_v63, %v7158_v2 }
 0x813   :  { %6526 = vmatpush1.bf16.msra.mxu0 %v7245_v51  ;;  %2532 = vmatprep.mubr.f32.mxu0 %v6933_v52 }
 0x814   :  { %6528 = vmatprep.subr.bf16.mxu0 %v7249_v53 }
 0x817   :  { %6529 = vmatpush1.bf16.msra.mxu0 %v6932_v19 }
 0x818   :  { %6531 = vmatprep.subr.bf16.mxu0 %v7259_v58 }
 0x81b   :  { %6532 = vmatpush1.bf16.msra.mxu0 %v6932_v19 }
 0x81c   :  { %6549 = vmatprep.subr.bf16.mxu0 %v6932_v19 }
 0x8e1   :  { %v2049_v39 = vpop.f32.mrb[26].mxu0 }
 0x8e2   :  { %v2062_v22 = vadd.f32 %v2049_v39, %v619_v7  ;;  %v7384_v40 = vpop.f32.mrb[27].mxu0 }
 0x8e4   :  { %v2064_v42 = vmul.f32 %v2062_v22, %v7294_v5  ;;  %v6183_v44 = vpop.f32.mrb[26].mxu1 }
 0x8e5   :  { %v1879_v45 = vpop.f32.mrb[27].mxu1  ;;  %v2055_v46 = vpop.f32.mrb[28].mxu0 }
 0x8e6   :  { %v2066_v47 = vsub.f32 0.0, %v2064_v42  ;;  %v6489_v48 = vpack.c.bf16 %v6183_v44, %v1879_v45  ;;  %v2063_v54 = vadd.f32 %v2055_v46, %v624_v41  ;;  %v7389_v61 = vpop.f32.mrb[29].mxu0 }
 0x8e8   :  { %v2068_v62 = vmul.f32 1.442695, %v2066_v47  ;;  %v2065_v2 = vmul.f32 %v2063_v54, %v7294_v5  ;;  %6490 = vmatprep.subr.bf16.mxu1 %v6489_v48  ;;  %v2284_v54 = vld [vmem:[%s8232_s7] sm:$0xff] }
 0x8e9   :  { %6492 = vmatpush3.bf16.msra.mxu1 %v6489_v48 }
 0x8ea   :  { %6727 = vpow2.f32 %v2068_v62  ;;  %v2067_v12 = vsub.f32 0.0, %v2065_v2  ;;  %6506 = vmatprep.subr.bf16.mxu1 %v7340_v6  ;;  %v2285_v62 = vld [vmem:[%s8232_s7 + $0x8] sm:$0xff] }
 0x8ec   :  { %v2070_v1 = vmul.f32 1.442695, %v2067_v12  ;;  %6189 = vmatmul.mubr.msk.f32.vlgmr.msra.gmra.mrb[28].mxu1 %vm286_vm1, %v7050_v16 }
 0x8ed   :  { %6508 = vmatpush3.bf16.msra.mxu1 %v7340_v6 }
 0x8ee   :  { %6729 = vpow2.f32 %v2070_v1  ;;  %6510 = vmatprep.subr.bf16.mxu1 %v7354_v21 }
 0x8f1   :  { %6512 = vmatpush3.bf16.msra.mxu1 %v7354_v21 }
 0x8f4   :  { %v6728_v25 = vpop.eup %6727 }
 0x8f5   :  { %v2072_v8 = vadd.f32 1.0, %v6728_v25  ;;  %v7434_v25 = vpack.c.bf16 %v2285_v62, %v2284_v54 }
 0x8f7   :  { %6731 = vrcp.f32 %v2072_v8 }
 0x8f8   :  { %v6730_v9 = vpop.eup %6729 }
 0x8f9   :  { %v2073_v10 = vadd.f32 1.0, %v6730_v9 }
 0x8fb   :  { %6733 = vrcp.f32 %v2073_v10 }
 0x901   :  { %v6732_v11 = vpop.eup %6731 }
 0x902   :  { %v2076_v13 = vmul.f32 %v6732_v11, %v7294_v5 }
 0x904   :  { %v2078_v14 = vadd.f32 %v2076_v13, %v7303_v32 }
 0x905   :  { %v6734_v15 = vpop.eup %6733 }
 0x906   :  { %2084 = vrot.lane.b32.xlu0 %v2078_v14, %s6935_s30  ;;  %v2077_v16 = vmul.f32 %v6734_v15, %v7294_v5  ;;  %v2080_v29 = vmul.f32 %v2078_v14, %v7324_v57 }
 0x908   :  { %v2079_v17 = vadd.f32 %v2077_v16, %v7303_v32 }
 0x90a   :  { %2086 = vrot.lane.b32.xlu1 %v2079_v17, %s6935_s30  ;;  %v2081_v49 = vmul.f32 %v2079_v17, %v7327_v0 }
 0x978   :  { %v2085_v50 = vpop.permute.xlu0 %2084 }
 0x979   :  { %v2090_v24 = vmul.f32 %v2085_v50, %v2078_v14 }
 0x97b   :  { %2094 = vrot.lane.b32.xlu0 %v2090_v24, %s6936_s11 }
 0x97c   :  { %v2087_v27 = vpop.permute.xlu1 %2086 }
 0x97d   :  { %v2091_v28 = vmul.f32 %v2087_v27, %v2079_v17 }
 0x97f   :  { %2096 = vrot.lane.b32.xlu1 %v2091_v28, %s6936_s11 }
 0x9bf   :  { %v6190_v42 = vpop.f32.mrb[28].mxu1 }
 0x9c0   :  { %v1962_v57 = vpop.f32.mrb[29].mxu1 }
 0x9c1   :  { %v1971_v8 = vmax.f32 %v1962_v57, 0.0 }
 0x9ed   :  { %v2095_v30 = vpop.permute.xlu0 %2094 }
 0x9ee   :  { %v7407_v31 = vadd.f32 %v2095_v30, %v2080_v29 }
 0x9f0   :  { %6735 = vtanh.f32 %v7407_v31 }
 0x9f1   :  { %v2097_v7 = vpop.permute.xlu1 %2096 }
 0x9f2   :  { %v7411_v39 = vadd.f32 %v2097_v7, %v2081_v49 }
 0x9f4   :  { %6737 = vtanh.f32 %v7411_v39 }
 0x9fa   :  { %v6736_v22 = vpop.eup %6735 }
 0x9fb   :  { %2106 = vrot.lane.b32.xlu0 %v6736_v22, %s6935_s30 }
 0x9fe   :  { %v6738_v41 = vpop.eup %6737 }
 0x9ff   :  { %2108 = vrot.lane.b32.xlu1 %v6738_v41, %s6935_s30 }
 0xa6d   :  { %v2107_v44 = vpop.permute.xlu0 %2106 }
 0xa6e   :  { %v2112_v45 = vmul.f32 %v2107_v44, %v2078_v14 }
 0xa70   :  { %2116 = vrot.lane.b32.xlu0 %v2112_v45, %s6936_s11 }
 0xa71   :  { %v2109_v46 = vpop.permute.xlu1 %2108 }
 0xa72   :  { %v2113_v47 = vmul.f32 %v2109_v46, %v2079_v17 }
 0xa74   :  { %2118 = vrot.lane.b32.xlu1 %v2113_v47, %s6936_s11 }
 0xae2   :  { %v7418_v0 = vpop.permute.xlu0 %2116 }
 0xae3   :  { %6199 = vmatprep.mubr.msk.f32.mxu1 %vm376_vm2, %v7418_v0 }
 0xae6   :  { %v7422_v48 = vpop.permute.xlu1 %2118 }
 0xae7   :  { %6200 = vmatmul.mubr.msk.f32.vlgmr.msra.gmra.mrb[30].mxu1 %vm376_vm2, %v7422_v48 }
 0xae8   :  { %6206 = vmatprep.mubr.msk.f32.mxu1 %vm286_vm1, %v7091_v37  ;;  %v1972_v37 = vmax.f32 %v6190_v42, 0.0 }
 0xbba   :  { %v6201_v2 = vpop.f32.mrb[30].mxu1 }
 0xbbb   :  { %v2190_v12 = vpop.f32.mrb[31].mxu1 }
 0xbbc   :  { %v6513_v1 = vpack.c.bf16 %v6201_v2, %v2190_v12 }
 0xbbe   :  { %6514 = vmatprep.subr.bf16.mxu1 %v6513_v1 }
 0xbbf   :  { %6516 = vmatpush3.bf16.msra.mxu1 %v6513_v1 }
 0xbc0   :  { %6518 = vmatprep.subr.bf16.mxu1 %v7434_v25 }
 0xbc2   :  { %6207 = vmatmul.mubr.msk.f32.vlgmr.msra.gmra.mrb[32].mxu1 %vm286_vm1, %v7100_v38  ;;  %v7453_v38 = vld [vmem:[%s8234_s9] ss:$0 sm:$0xff] }
 0xbc3   :  { %6520 = vmatpush3.bf16.msra.mxu1 %v7434_v25  ;;  %6213 = vmatprep.mubr.msk.f32.mxu1 %vm286_vm1, %v1971_v8 }
 0xbc4   :  { %6534 = vmatprep.subr.bf16.mxu1 %v7340_v6 }
 0xbc6   :  { %6214 = vmatmul.mubr.msk.f32.vlgmr.msra.gmra.mrb[34].mxu1 %vm286_vm1, %v1972_v37 }
 0xbc7   :  { %6536 = vmatpush3.bf16.msra.mxu1 %v7340_v6 }
 0xbc8   :  { %6538 = vmatprep.subr.bf16.mxu1 %v7354_v21 }
 0xbcb   :  { %6540 = vmatpush3.bf16.msra.mxu1 %v7354_v21 }
 0xc95   :  { %v7446_v9 = vpop.f32.mrb[32].mxu1 }
 0xc96   :  { %v7448_v10 = vpop.f32.mrb[33].mxu1 }
 0xc99   :  { %v6215_v11 = vpop.f32.mrb[34].mxu1 }
 0xc9a   :  { %v2371_v13 = vadd.f32 %v6215_v11, %v7453_v38  ;;  %v2365_v14 = vpop.f32.mrb[35].mxu1 }
 0xc9b   :  { %v2366_v15 = vadd.f32 %v7453_v38, %v2365_v14 }
 0xc9c   :  { %v2375_v16 = vadd.f32 %v2371_v13, %v7389_v61 }
 0xc9d   :  { %v2374_v17 = vadd.f32 %v2366_v15, %v7384_v40 }
 0xc9e   :  { %v2377_v50 = vmul.f32 %v2375_v16, %v7294_v5 }
 0xc9f   :  { %v2376_v24 = vmul.f32 %v2374_v17, %v7294_v5 }
 0xca0   :  { %v2379_v27 = vsub.f32 0.0, %v2377_v50 }
 0xca1   :  { %v2378_v28 = vsub.f32 0.0, %v2376_v24 }
 0xca2   :  { %v2382_v29 = vmul.f32 1.442695, %v2379_v27 }
 0xca3   :  { %v2380_v30 = vmul.f32 1.442695, %v2378_v28 }
 0xca4   :  { %6739 = vpow2.f32 %v2382_v29 }
 0xca5   :  { %6741 = vpow2.f32 %v2380_v30 }
 0xcae   :  { %v6740_v49 = vpop.eup %6739 }
 0xcaf   :  { %v6742_v7 = vpop.eup %6741  ;;  %v2385_v22 = vadd.f32 1.0, %v6740_v49 }
 0xcb0   :  { %v2384_v41 = vadd.f32 1.0, %v6742_v7  ;;  %v793_v7 = vadd.f32 %v7190_v18, %v7284_v63 }
 0xcb1   :  { %6743 = vrcp.f32 %v2385_v22 }
 0xcb2   :  { %6745 = vrcp.f32 %v2384_v41 }
 0xcbb   :  { %v6744_v42 = vpop.eup %6743 }
 0xcbc   :  { %v6746_v61 = vpop.eup %6745  ;;  %v2389_v40 = vmul.f32 %v6744_v42, %v7294_v5 }
 0xcbd   :  { %v2388_v57 = vmul.f32 %v6746_v61, %v7294_v5 }
 0xcbe   :  { %v2391_v44 = vadd.f32 %v2389_v40, %v7303_v32 }
 0xcbf   :  { %v2390_v45 = vadd.f32 %v2388_v57, %v7303_v32 }
 0xcc0   :  { %2398 = vrot.lane.b32.xlu1 %v2391_v44, %s6935_s30  ;;  %v2393_v2 = vmul.f32 0.0, %v2391_v44 }
 0xcc1   :  { %2396 = vrot.lane.b32.xlu0 %v2390_v45, %s6935_s30  ;;  %v2392_v1 = vmul.f32 0.0, %v2390_v45 }
 0xd32   :  { %v2399_v46 = vpop.permute.xlu1 %2398 }
 0xd33   :  { %v2403_v47 = vmul.f32 %v2399_v46, %v2391_v44  ;;  %v2397_v54 = vpop.permute.xlu0 %2396 }
 0xd34   :  { %v2402_v62 = vmul.f32 %v2397_v54, %v2390_v45 }
 0xd35   :  { %2408 = vrot.lane.b32.xlu1 %v2403_v47, %s6936_s11 }
 0xd36   :  { %2406 = vrot.lane.b32.xlu0 %v2402_v62, %s6936_s11 }
 0xda7   :  { %v2409_v12 = vpop.permute.xlu1 %2408 }
 0xda8   :  { %v7469_v8 = vadd.f32 %v2409_v12, %v2393_v2  ;;  %v2407_v37 = vpop.permute.xlu0 %2406 }
 0xda9   :  { %v7471_v11 = vadd.f32 %v2407_v37, %v2392_v1 }
 0xdaa   :  { %6747 = vtanh.f32 %v7469_v8 }
 0xdab   :  { %6749 = vtanh.f32 %v7471_v11 }
 0xdb4   :  { %v6748_v13 = vpop.eup %6747 }
 0xdb5   :  { %v6750_v14 = vpop.eup %6749  ;;  %2420 = vrot.lane.b32.xlu1 %v6748_v13, %s6935_s30 }
 0xdb6   :  { %2418 = vrot.lane.b32.xlu0 %v6750_v14, %s6935_s30 }
 0xe27   :  { %v2421_v15 = vpop.permute.xlu1 %2420 }
 0xe28   :  { %v7477_v16 = vmul.f32 %v2421_v15, %v2391_v44  ;;  %v2419_v17 = vpop.permute.xlu0 %2418 }
 0xe29   :  { %v7479_v50 = vmul.f32 %v2419_v17, %v2390_v45 }
 0xe2a   :  { %2440 = vrot.lane.b32.xlu1 %v7477_v16, %s6935_s30 }
 0xe2b   :  { %2438 = vrot.lane.b32.xlu0 %v7479_v50, %s6935_s30 }
 0xe9c   :  { %v2441_v28 = vpop.permute.xlu1 %2440 }
 0xe9d   :  { %v2439_v24 = vpop.permute.xlu0 %2438  ;;  %v2445_v29 = vsel %vm376_vm2, %v7422_v48, %v2441_v28 }
 0xe9e   :  { %v2444_v27 = vsel %vm376_vm2, %v7418_v0, %v2439_v24  ;;  %v788_v0 = vadd.f32 %v7284_v63, %v7192_v20 }
 0xe9f   :  { %5723 = vmatmul.mubr.msk.f32.vlgmr.msra.gmra.mrb[30].mxu0 %vm1666_vm6, %v2444_v27 }
 0xea0   :  { %2538 = vmatprep.mubr.f32.mxu0 %v6933_v52  ;;  %6551 = vmatpush1.bf16.msra.mxu0 %v7228_v43 }
 0xea1   :  { %6552 = vmatprep.subr.bf16.mxu0 %v6932_v19 }
 0xea3   :  { %5724 = vmatmul.mubr.msk.f32.gmra.mrb[32].mxu0 %vm1666_vm6, %v2445_v29 }
 0xea4   :  { %6554 = vmatpush1.bf16.msra.mxu0 %v7245_v51  ;;  %3021 = vmatprep.mubr.f32.mxu0 %v6933_v52 }
 0xea5   :  { %6556 = vmatprep.subr.bf16.mxu0 %v7249_v53 }
 0xea8   :  { %6557 = vmatpush1.bf16.msra.mxu0 %v6932_v19 }
 0xea9   :  { %6559 = vmatprep.subr.bf16.mxu0 %v7259_v58 }
 0xeac   :  { %6560 = vmatpush1.bf16.msra.mxu0 %v6932_v19 }
 0xead   :  { %6577 = vmatprep.subr.bf16.mxu0 %v6932_v19 }
 0xf72   :  { %v2534_v48 = vpop.f32.mrb[30].mxu0 }
 0xf73   :  { %v2547_v30 = vadd.f32 %v2534_v48, %v788_v0  ;;  %v7503_v49 = vpop.f32.mrb[31].mxu0 }
 0xf75   :  { %v2549_v22 = vmul.f32 %v2547_v30, %v7294_v5 }
 0xf76   :  { %v2540_v41 = vpop.f32.mrb[32].mxu0 }
 0xf77   :  { %v2551_v42 = vsub.f32 0.0, %v2549_v22  ;;  %v2548_v61 = vadd.f32 %v2540_v41, %v793_v7  ;;  %v7508_v40 = vpop.f32.mrb[33].mxu0 }
 0xf79   :  { %v2553_v57 = vmul.f32 1.442695, %v2551_v42  ;;  %v2550_v44 = vmul.f32 %v2548_v61, %v7294_v5 }
 0xf7b   :  { %6751 = vpow2.f32 %v2553_v57  ;;  %v2552_v45 = vsub.f32 0.0, %v2550_v44 }
 0xf7d   :  { %v2555_v20 = vmul.f32 1.442695, %v2552_v45 }
 0xf7f   :  { %6753 = vpow2.f32 %v2555_v20 }
 0xf85   :  { %v6752_v46 = vpop.eup %6751 }
 0xf86   :  { %v2557_v47 = vadd.f32 1.0, %v6752_v46  ;;  %v2282_v46 = vmax.f32 %v7448_v10, 0.0 }
 0xf88   :  { %6755 = vrcp.f32 %v2557_v47  ;;  %v2283_v47 = vmax.f32 %v7446_v9, 0.0 }
 0xf89   :  { %v6754_v54 = vpop.eup %6753 }
 0xf8a   :  { %v2558_v62 = vadd.f32 1.0, %v6754_v54 }
 0xf8c   :  { %6757 = vrcp.f32 %v2558_v62 }
 0xf92   :  { %v6756_v18 = vpop.eup %6755 }
 0xf93   :  { %v2561_v2 = vmul.f32 %v6756_v18, %v7294_v5 }
 0xf95   :  { %v2563_v12 = vadd.f32 %v2561_v2, %v7303_v32 }
 0xf96   :  { %v6758_v1 = vpop.eup %6757 }
 0xf97   :  { %2569 = vrot.lane.b32.xlu0 %v2563_v12, %s6935_s30  ;;  %v2562_v37 = vmul.f32 %v6758_v1, %v7294_v5  ;;  %v2565_v27 = vmul.f32 %v2563_v12, %v7407_v31 }
 0xf99   :  { %v2564_v13 = vadd.f32 %v2562_v37, %v7303_v32 }
 0xf9b   :  { %2571 = vrot.lane.b32.xlu1 %v2564_v13, %s6935_s30  ;;  %v2566_v0 = vmul.f32 %v2564_v13, %v7411_v39 }
0x1009   :  { %v2570_v14 = vpop.permute.xlu0 %2569 }
0x100a   :  { %v2575_v15 = vmul.f32 %v2570_v14, %v2563_v12 }
0x100c   :  { %2579 = vrot.lane.b32.xlu0 %v2575_v15, %s6936_s11 }
0x100d   :  { %v2572_v17 = vpop.permute.xlu1 %2571 }
0x100e   :  { %v2576_v24 = vmul.f32 %v2572_v17, %v2564_v13 }
0x1010   :  { %2581 = vrot.lane.b32.xlu1 %v2576_v24, %s6936_s11 }
0x107e   :  { %v2580_v28 = vpop.permute.xlu0 %2579 }
0x107f   :  { %v7520_v29 = vadd.f32 %v2580_v28, %v2565_v27 }
0x1081   :  { %6759 = vtanh.f32 %v7520_v29 }
0x1082   :  { %v2582_v48 = vpop.permute.xlu1 %2581 }
0x1083   :  { %v7524_v30 = vadd.f32 %v2582_v48, %v2566_v0 }
0x1085   :  { %6761 = vtanh.f32 %v7524_v30 }
0x108b   :  { %v6760_v7 = vpop.eup %6759 }
0x108c   :  { %2591 = vrot.lane.b32.xlu0 %v6760_v7, %s6935_s30 }
0x108f   :  { %v6762_v22 = vpop.eup %6761 }
0x1090   :  { %2593 = vrot.lane.b32.xlu1 %v6762_v22, %s6935_s30 }
0x10fe   :  { %v2592_v41 = vpop.permute.xlu0 %2591 }
0x10ff   :  { %v2597_v31 = vmul.f32 %v2592_v41, %v2563_v12 }
0x1101   :  { %2605 = vrot.lane.b32.xlu0 %v2597_v31, %s6936_s11 }
0x1102   :  { %v2594_v42 = vpop.permute.xlu1 %2593 }
0x1103   :  { %v2598_v61 = vmul.f32 %v2594_v42, %v2564_v13 }
0x1105   :  { %2607 = vrot.lane.b32.xlu1 %v2598_v61, %s6936_s11 }
0x1173   :  { %v7531_v39 = vpop.permute.xlu0 %2605 }
0x1174   :  { %6224 = vmatprep.mubr.msk.f32.mxu1 %vm376_vm2, %v7531_v39 }
0x1177   :  { %v7535_v57 = vpop.permute.xlu1 %2607 }
0x1178   :  { %6225 = vmatmul.mubr.msk.f32.vlgmr.msra.gmra.mrb[36].mxu1 %vm376_vm2, %v7535_v57 }
0x1179   :  { %6231 = vmatprep.mubr.msk.f32.mxu1 %vm286_vm1, %v7131_v55 }
0x124b   :  { %v6226_v44 = vpop.f32.mrb[36].mxu1 }
0x124c   :  { %v2679_v45 = vpop.f32.mrb[37].mxu1 }
0x124d   :  { %v6541_v20 = vpack.c.bf16 %v6226_v44, %v2679_v45 }
0x124f   :  { %6542 = vmatprep.subr.bf16.mxu1 %v6541_v20 }
0x1250   :  { %6544 = vmatpush3.bf16.msra.mxu1 %v6541_v20 }
0x1251   :  { %6546 = vmatprep.subr.bf16.mxu1 %v7434_v25 }
0x1253   :  { %6232 = vmatmul.mubr.msk.f32.vlgmr.msra.gmra.mrb[38].mxu1 %vm286_vm1, %v7140_v56 }
0x1254   :  { %6548 = vmatpush3.bf16.msra.mxu1 %v7434_v25  ;;  %6238 = vmatprep.mubr.msk.f32.mxu1 %vm286_vm1, %v2282_v46 }
0x1255   :  { %6562 = vmatprep.subr.bf16.mxu1 %v7340_v6 }
0x1257   :  { %6239 = vmatmul.mubr.msk.f32.vlgmr.msra.gmra.mrb[40].mxu1 %vm286_vm1, %v2283_v47 }
0x1258   :  { %6564 = vmatpush3.bf16.msra.mxu1 %v7340_v6 }
0x1259   :  { %6566 = vmatprep.subr.bf16.mxu1 %v7354_v21 }
0x125c   :  { %6568 = vmatpush3.bf16.msra.mxu1 %v7354_v21 }
0x1326   :  { %v7553_v55 = vpop.f32.mrb[38].mxu1 }
0x1327   :  { %v7555_v10 = vpop.f32.mrb[39].mxu1 }
0x132a   :  { %v6240_v56 = vpop.f32.mrb[40].mxu1 }
0x132b   :  { %v2860_v54 = vadd.f32 %v6240_v56, %v7453_v38  ;;  %v2854_v62 = vpop.f32.mrb[41].mxu1 }
0x132c   :  { %v2855_v9 = vadd.f32 %v7453_v38, %v2854_v62 }
0x132d   :  { %v2864_v18 = vadd.f32 %v2860_v54, %v7508_v40 }
0x132e   :  { %v2863_v2 = vadd.f32 %v2855_v9, %v7503_v49 }
0x132f   :  { %v2866_v12 = vmul.f32 %v2864_v18, %v7294_v5 }
0x1330   :  { %v2865_v1 = vmul.f32 %v2863_v2, %v7294_v5 }
0x1331   :  { %v2868_v37 = vsub.f32 0.0, %v2866_v12 }
0x1332   :  { %v2867_v13 = vsub.f32 0.0, %v2865_v1 }
0x1333   :  { %v2871_v14 = vmul.f32 1.442695, %v2868_v37 }
0x1334   :  { %v2869_v15 = vmul.f32 1.442695, %v2867_v13 }
0x1335   :  { %6763 = vpow2.f32 %v2871_v14 }
0x1336   :  { %6765 = vpow2.f32 %v2869_v15  ;;  %v962_v15 = vadd.f32 %v7194_v23, %v7284_v63 }
0x133f   :  { %v6764_v17 = vpop.eup %6763 }
0x1340   :  { %v6766_v24 = vpop.eup %6765  ;;  %v2874_v27 = vadd.f32 1.0, %v6764_v17 }
0x1341   :  { %v2873_v28 = vadd.f32 1.0, %v6766_v24 }
0x1342   :  { %6767 = vrcp.f32 %v2874_v27 }
0x1343   :  { %6769 = vrcp.f32 %v2873_v28 }
0x134c   :  { %v6768_v0 = vpop.eup %6767 }
0x134d   :  { %v6770_v40 = vpop.eup %6769  ;;  %v2878_v49 = vmul.f32 %v6768_v0, %v7294_v5 }
0x134e   :  { %v2877_v48 = vmul.f32 %v6770_v40, %v7294_v5 }
0x134f   :  { %v2880_v7 = vadd.f32 %v2878_v49, %v7303_v32 }
0x1350   :  { %v2879_v22 = vadd.f32 %v2877_v48, %v7303_v32 }
0x1351   :  { %2887 = vrot.lane.b32.xlu1 %v2880_v7, %s6935_s30  ;;  %v2882_v44 = vmul.f32 %v2880_v7, %v7469_v8 }
0x1352   :  { %2885 = vrot.lane.b32.xlu0 %v2879_v22, %s6935_s30  ;;  %v2881_v20 = vmul.f32 %v2879_v22, %v7471_v11 }
0x13c3   :  { %v2888_v41 = vpop.permute.xlu1 %2887 }
0x13c4   :  { %v2892_v31 = vmul.f32 %v2888_v41, %v2880_v7  ;;  %v2886_v42 = vpop.permute.xlu0 %2885 }
0x13c5   :  { %v2891_v61 = vmul.f32 %v2886_v42, %v2879_v22 }
0x13c6   :  { %2897 = vrot.lane.b32.xlu1 %v2892_v31, %s6936_s11 }
0x13c7   :  { %2895 = vrot.lane.b32.xlu0 %v2891_v61, %s6936_s11 }
0x1438   :  { %v2898_v45 = vpop.permute.xlu1 %2897 }
0x1439   :  { %v7573_v46 = vadd.f32 %v2898_v45, %v2882_v44  ;;  %v2896_v47 = vpop.permute.xlu0 %2895 }
0x143a   :  { %v7575_v56 = vadd.f32 %v2896_v47, %v2881_v20 }
0x143b   :  { %6771 = vtanh.f32 %v7573_v46 }
0x143c   :  { %6773 = vtanh.f32 %v7575_v56 }
0x1445   :  { %v6772_v54 = vpop.eup %6771 }
0x1446   :  { %v6774_v62 = vpop.eup %6773  ;;  %2909 = vrot.lane.b32.xlu1 %v6772_v54, %s6935_s30 }
0x1447   :  { %2907 = vrot.lane.b32.xlu0 %v6774_v62, %s6935_s30 }
0x14b8   :  { %v2910_v9 = vpop.permute.xlu1 %2909 }
0x14b9   :  { %v7581_v8 = vmul.f32 %v2910_v9, %v2880_v7  ;;  %v2908_v18 = vpop.permute.xlu0 %2907 }
0x14ba   :  { %v7583_v11 = vmul.f32 %v2908_v18, %v2879_v22 }
0x14bb   :  { %2929 = vrot.lane.b32.xlu1 %v7581_v8, %s6935_s30 }
0x14bc   :  { %2927 = vrot.lane.b32.xlu0 %v7583_v11, %s6935_s30 }
0x152d   :  { %v2930_v1 = vpop.permute.xlu1 %2929 }
0x152e   :  { %v2928_v2 = vpop.permute.xlu0 %2927  ;;  %v2934_v37 = vsel %vm376_vm2, %v7535_v57, %v2930_v1 }
0x152f   :  { %v2933_v12 = vsel %vm376_vm2, %v7531_v39, %v2928_v2  ;;  %v957_v39 = vadd.f32 %v7284_v63, %v7196_v26 }
0x1530   :  { %5734 = vmatmul.mubr.msk.f32.vlgmr.msra.gmra.mrb[34].mxu0 %vm1666_vm6, %v2933_v12 }
0x1531   :  { %3027 = vmatprep.mubr.f32.mxu0 %v6933_v52  ;;  %6579 = vmatpush1.bf16.msra.mxu0 %v7228_v43 }
0x1532   :  { %6580 = vmatprep.subr.bf16.mxu0 %v6932_v19 }
0x1534   :  { %5735 = vmatmul.mubr.msk.f32.gmra.mrb[36].mxu0 %vm1666_vm6, %v2934_v37 }
0x1535   :  { %6582 = vmatpush1.bf16.msra.mxu0 %v7245_v51  ;;  %3510 = vmatprep.mubr.f32.mxu0 %v6933_v52 }
0x1536   :  { %6584 = vmatprep.subr.bf16.mxu0 %v7249_v53 }
0x1539   :  { %6585 = vmatpush1.bf16.msra.mxu0 %v6932_v19 }
0x153a   :  { %6587 = vmatprep.subr.bf16.mxu0 %v7259_v58 }
0x153d   :  { %6588 = vmatpush1.bf16.msra.mxu0 %v6932_v19 }
0x153e   :  { %6605 = vmatprep.subr.bf16.mxu0 %v6932_v19 }
0x1603   :  { %v3023_v57 = vpop.f32.mrb[34].mxu0 }
0x1604   :  { %v3036_v13 = vadd.f32 %v3023_v57, %v957_v39  ;;  %v7607_v14 = vpop.f32.mrb[35].mxu0 }
0x1606   :  { %v3038_v17 = vmul.f32 %v3036_v13, %v7294_v5 }
0x1607   :  { %v3029_v24 = vpop.f32.mrb[36].mxu0 }
0x1608   :  { %v3040_v27 = vsub.f32 0.0, %v3038_v17  ;;  %v3037_v28 = vadd.f32 %v3029_v24, %v962_v15  ;;  %v7612_v0 = vpop.f32.mrb[37].mxu0 }
0x160a   :  { %v3042_v40 = vmul.f32 1.442695, %v3040_v27  ;;  %v3039_v49 = vmul.f32 %v3037_v28, %v7294_v5  ;;  %v5738_v27 = vld [vmem:[%s8225_s0 + $0x30] sm:$0xff] }
0x160c   :  { %6775 = vpow2.f32 %v3042_v40  ;;  %v3041_v48 = vsub.f32 0.0, %v3039_v49 }
0x160e   :  { %v3044_v26 = vmul.f32 1.442695, %v3041_v48  ;;  %v5739_v48 = vld [vmem:[%s8225_s0 + $0x38] sm:$0xff] }
0x1610   :  { %6777 = vpow2.f32 %v3044_v26  ;;  %v2771_v26 = vmax.f32 %v7555_v10, 0.0 }
0x1616   :  { %v6776_v7 = vpop.eup %6775 }
0x1617   :  { %v3046_v22 = vadd.f32 1.0, %v6776_v7  ;;  %v2772_v7 = vmax.f32 %v7553_v55, 0.0 }
0x1619   :  { %6779 = vrcp.f32 %v3046_v22 }
0x161a   :  { %v6778_v41 = vpop.eup %6777 }
0x161b   :  { %v3047_v31 = vadd.f32 1.0, %v6778_v41 }
0x161d   :  { %6781 = vrcp.f32 %v3047_v31 }
0x1623   :  { %v6780_v23 = vpop.eup %6779 }
0x1624   :  { %v3050_v63 = vmul.f32 %v6780_v23, %v7294_v5 }
0x1626   :  { %v3052_v42 = vadd.f32 %v3050_v63, %v7303_v32 }
0x1627   :  { %v6782_v61 = vpop.eup %6781 }
0x1628   :  { %3058 = vrot.lane.b32.xlu0 %v3052_v42, %s6935_s30  ;;  %v3051_v44 = vmul.f32 %v6782_v61, %v7294_v5  ;;  %v3054_v9 = vmul.f32 %v3052_v42, %v7520_v29 }
0x162a   :  { %v3053_v45 = vadd.f32 %v3051_v44, %v7303_v32 }
0x162c   :  { %3060 = vrot.lane.b32.xlu1 %v3053_v45, %s6935_s30  ;;  %v3055_v12 = vmul.f32 %v3053_v45, %v7524_v30 }
0x169a   :  { %v3059_v20 = vpop.permute.xlu0 %3058 }
0x169b   :  { %v3064_v47 = vmul.f32 %v3059_v20, %v3052_v42 }
0x169d   :  { %3068 = vrot.lane.b32.xlu0 %v3064_v47, %s6936_s11 }
0x169e   :  { %v3061_v54 = vpop.permute.xlu1 %3060 }
0x169f   :  { %v3065_v62 = vmul.f32 %v3061_v54, %v3053_v45 }
0x16a1   :  { %3070 = vrot.lane.b32.xlu1 %v3065_v62, %s6936_s11 }
0x170f   :  { %v3069_v18 = vpop.permute.xlu0 %3068 }
0x1710   :  { %v7624_v2 = vadd.f32 %v3069_v18, %v3054_v9 }
0x1712   :  { %6783 = vtanh.f32 %v7624_v2 }
0x1713   :  { %v3071_v1 = vpop.permute.xlu1 %3070 }
0x1714   :  { %v7628_v37 = vadd.f32 %v3071_v1, %v3055_v12 }
0x1716   :  { %6785 = vtanh.f32 %v7628_v37 }
0x171c   :  { %v6784_v39 = vpop.eup %6783 }
0x171d   :  { %3080 = vrot.lane.b32.xlu0 %v6784_v39, %s6935_s30 }
0x1720   :  { %v6786_v57 = vpop.eup %6785 }
0x1721   :  { %3082 = vrot.lane.b32.xlu1 %v6786_v57, %s6935_s30 }
0x178f   :  { %v3081_v13 = vpop.permute.xlu0 %3080 }
0x1790   :  { %v3086_v29 = vmul.f32 %v3081_v13, %v3052_v42 }
0x1792   :  { %3094 = vrot.lane.b32.xlu0 %v3086_v29, %s6936_s11 }
0x1793   :  { %v3083_v15 = vpop.permute.xlu1 %3082 }
0x1794   :  { %v3087_v17 = vmul.f32 %v3083_v15, %v3053_v45 }
0x1796   :  { %3096 = vrot.lane.b32.xlu1 %v3087_v17, %s6936_s11 }
0x1804   :  { %v7635_v30 = vpop.permute.xlu0 %3094 }
0x1805   :  { %6249 = vmatprep.mubr.msk.f32.mxu1 %vm376_vm2, %v7635_v30 }
0x1808   :  { %v7639_v24 = vpop.permute.xlu1 %3096 }
0x1809   :  { %6250 = vmatmul.mubr.msk.f32.vlgmr.msra.gmra.mrb[42].mxu1 %vm376_vm2, %v7639_v24 }
0x180a   :  { %6256 = vmatprep.mubr.msk.f32.mxu1 %vm286_vm1, %v5738_v27 }
0x18dc   :  { %v6251_v28 = vpop.f32.mrb[42].mxu1 }
0x18dd   :  { %v3168_v40 = vpop.f32.mrb[43].mxu1 }
0x18de   :  { %v6569_v49 = vpack.c.bf16 %v6251_v28, %v3168_v40 }
0x18e0   :  { %6570 = vmatprep.subr.bf16.mxu1 %v6569_v49 }
0x18e1   :  { %6572 = vmatpush3.bf16.msra.mxu1 %v6569_v49 }
0x18e2   :  { %6574 = vmatprep.subr.bf16.mxu1 %v7434_v25 }
0x18e4   :  { %6257 = vmatmul.mubr.msk.f32.vlgmr.msra.gmra.mrb[44].mxu1 %vm286_vm1, %v5739_v48 }
0x18e5   :  { %6576 = vmatpush3.bf16.msra.mxu1 %v7434_v25  ;;  %6263 = vmatprep.mubr.msk.f32.mxu1 %vm286_vm1, %v2771_v26 }
0x18e6   :  { %6590 = vmatprep.subr.bf16.mxu1 %v7340_v6 }
0x18e8   :  { %6264 = vmatmul.mubr.msk.f32.vlgmr.msra.gmra.mrb[46].mxu1 %vm286_vm1, %v2772_v7 }
0x18e9   :  { %6592 = vmatpush3.bf16.msra.mxu1 %v7340_v6 }
0x18ea   :  { %6594 = vmatprep.subr.bf16.mxu1 %v7354_v21 }
0x18ed   :  { %6596 = vmatpush3.bf16.msra.mxu1 %v7354_v21 }
0x19b7   :  { %v7661_v22 = vpop.f32.mrb[44].mxu1 }
0x19b8   :  { %v7663_v10 = vpop.f32.mrb[45].mxu1 }
0x19bb   :  { %v6265_v41 = vpop.f32.mrb[46].mxu1 }
0x19bc   :  { %v3349_v31 = vadd.f32 %v6265_v41, %v7453_v38  ;;  %v3343_v23 = vpop.f32.mrb[47].mxu1 }
0x19bd   :  { %v3344_v55 = vadd.f32 %v7453_v38, %v3343_v23 }
0x19be   :  { %v3353_v63 = vadd.f32 %v3349_v31, %v7612_v0 }
0x19bf   :  { %v3352_v42 = vadd.f32 %v3344_v55, %v7607_v14 }
0x19c0   :  { %v3355_v6 = vmul.f32 %v3353_v63, %v7294_v5 }
0x19c1   :  { %v3354_v61 = vmul.f32 %v3352_v42, %v7294_v5 }
0x19c2   :  { %v3357_v44 = vsub.f32 0.0, %v3355_v6 }
0x19c3   :  { %v3356_v21 = vsub.f32 0.0, %v3354_v61 }
0x19c4   :  { %v3360_v45 = vmul.f32 1.442695, %v3357_v44 }
0x19c5   :  { %v3358_v20 = vmul.f32 1.442695, %v3356_v21 }
0x19c6   :  { %6787 = vpow2.f32 %v3360_v45 }
0x19c7   :  { %6789 = vpow2.f32 %v3358_v20 }
0x19d0   :  { %v6788_v47 = vpop.eup %6787 }
0x19d1   :  { %v6790_v54 = vpop.eup %6789  ;;  %v3363_v62 = vadd.f32 1.0, %v6788_v47 }
0x19d2   :  { %v3362_v9 = vadd.f32 1.0, %v6790_v54 }
0x19d3   :  { %6791 = vrcp.f32 %v3363_v62 }
0x19d4   :  { %6793 = vrcp.f32 %v3362_v9 }
0x19dd   :  { %v6792_v18 = vpop.eup %6791 }
0x19de   :  { %v6794_v0 = vpop.eup %6793  ;;  %v3367_v14 = vmul.f32 %v6792_v18, %v7294_v5 }
0x19df   :  { %v3366_v12 = vmul.f32 %v6794_v0, %v7294_v5 }
0x19e0   :  { %v3369_v1 = vadd.f32 %v3367_v14, %v7303_v32 }
0x19e1   :  { %v3368_v39 = vadd.f32 %v3366_v12, %v7303_v32 }
0x19e2   :  { %3376 = vrot.lane.b32.xlu1 %v3369_v1, %s6935_s30  ;;  %v3371_v17 = vmul.f32 %v3369_v1, %v7573_v46 }
0x19e3   :  { %3374 = vrot.lane.b32.xlu0 %v3368_v39, %s6935_s30  ;;  %v3370_v28 = vmul.f32 %v3368_v39, %v7575_v56 }
0x1a54   :  { %v3377_v57 = vpop.permute.xlu1 %3376 }
0x1a55   :  { %v3381_v13 = vmul.f32 %v3377_v57, %v3369_v1  ;;  %v3375_v29 = vpop.permute.xlu0 %3374 }
0x1a56   :  { %v3380_v15 = vmul.f32 %v3375_v29, %v3368_v39 }
0x1a57   :  { %3386 = vrot.lane.b32.xlu1 %v3381_v13, %s6936_s11 }
0x1a58   :  { %3384 = vrot.lane.b32.xlu0 %v3380_v15, %s6936_s11 }
0x1ac9   :  { %v3387_v27 = vpop.permute.xlu1 %3386 }
0x1aca   :  { %v7681_v40 = vadd.f32 %v3387_v27, %v3371_v17  ;;  %v3385_v49 = vpop.permute.xlu0 %3384 }
0x1acb   :  { %v7683_v48 = vadd.f32 %v3385_v49, %v3370_v28 }
0x1acc   :  { %6795 = vtanh.f32 %v7681_v40 }
0x1acd   :  { %6797 = vtanh.f32 %v7683_v48 }
0x1ad6   :  { %v6796_v26 = vpop.eup %6795 }
0x1ad7   :  { %v6798_v7 = vpop.eup %6797  ;;  %3398 = vrot.lane.b32.xlu1 %v6796_v26, %s6935_s30 }
0x1ad8   :  { %3396 = vrot.lane.b32.xlu0 %v6798_v7, %s6935_s30 }
0x1b49   :  { %v3399_v41 = vpop.permute.xlu1 %3398 }
0x1b4a   :  { %v7689_v46 = vmul.f32 %v3399_v41, %v3369_v1  ;;  %v3397_v31 = vpop.permute.xlu0 %3396 }
0x1b4b   :  { %v7691_v56 = vmul.f32 %v3397_v31, %v3368_v39 }
0x1b4c   :  { %3418 = vrot.lane.b32.xlu1 %v7689_v46, %s6935_s30 }
0x1b4d   :  { %3416 = vrot.lane.b32.xlu0 %v7691_v56, %s6935_s30 }
0x1bbe   :  { %v3419_v63 = vpop.permute.xlu1 %3418 }
0x1bbf   :  { %v3417_v23 = vpop.permute.xlu0 %3416  ;;  %v3423_v42 = vsel %vm376_vm2, %v7639_v24, %v3419_v63 }
0x1bc0   :  { %v3422_v55 = vsel %vm376_vm2, %v7635_v30, %v3417_v23  ;;  %v7716_v30 = vld [vmem:[%s8231_s6] ss:$0 sm:$0xff] }
0x1bc1   :  { %5745 = vmatmul.mubr.msk.f32.vlgmr.msra.gmra.mrb[38].mxu0 %vm1666_vm6, %v3422_v55  ;;  %v1126_v24 = vadd.f32 %v7716_v30, %v7220_v36  ;;  %v1131_v21 = vadd.f32 %v7716_v30, %v7218_v35 }
0x1bc2   :  { %3516 = vmatprep.mubr.f32.mxu0 %v6933_v52  ;;  %6607 = vmatpush1.bf16.msra.mxu0 %v7228_v43 }
0x1bc3   :  { %6608 = vmatprep.subr.bf16.mxu0 %v6932_v19 }
0x1bc5   :  { %5746 = vmatmul.mubr.msk.f32.gmra.mrb[40].mxu0 %vm1666_vm6, %v3423_v42 }
0x1bc6   :  { %6610 = vmatpush1.bf16.msra.mxu0 %v7245_v51  ;;  %3999 = vmatprep.mubr.f32.mxu0 %v6933_v52 }
0x1bc7   :  { %6612 = vmatprep.subr.bf16.mxu0 %v7249_v53 }
0x1bca   :  { %6613 = vmatpush1.bf16.msra.mxu0 %v6932_v19 }
0x1bcb   :  { %6615 = vmatprep.subr.bf16.mxu0 %v7259_v58 }
0x1bce   :  { %6616 = vmatpush1.bf16.msra.mxu0 %v6932_v19 }
0x1bcf   :  { %6633 = vmatprep.subr.bf16.mxu0 %v6932_v19 }
0x1c94   :  { %v3512_v6 = vpop.f32.mrb[38].mxu0 }
0x1c95   :  { %v3525_v61 = vadd.f32 %v3512_v6, %v1126_v24  ;;  %v7720_v44 = vpop.f32.mrb[39].mxu0 }
0x1c97   :  { %v3527_v45 = vmul.f32 %v3525_v61, %v7294_v5 }
0x1c98   :  { %v3518_v20 = vpop.f32.mrb[40].mxu0 }
0x1c99   :  { %v3529_v47 = vsub.f32 0.0, %v3527_v45  ;;  %v3526_v54 = vadd.f32 %v3518_v20, %v1131_v21  ;;  %v7725_v62 = vpop.f32.mrb[41].mxu0  ;;  %v5749_v20 = vld [vmem:[%s8225_s0 + $0x40] sm:$0xff] }
0x1c9b   :  { %v3531_v9 = vmul.f32 1.442695, %v3529_v47  ;;  %v3528_v18 = vmul.f32 %v3526_v54, %v7294_v5 }
0x1c9d   :  { %6799 = vpow2.f32 %v3531_v9  ;;  %v3530_v0 = vsub.f32 0.0, %v3528_v18  ;;  %v5750_v18 = vld [vmem:[%s8225_s0 + $0x48] sm:$0xff] }
0x1c9f   :  { %v3533_v36 = vmul.f32 1.442695, %v3530_v0  ;;  %v3260_v0 = vmax.f32 %v7663_v10, 0.0 }
0x1ca1   :  { %6801 = vpow2.f32 %v3533_v36  ;;  %v3261_v36 = vmax.f32 %v7661_v22, 0.0 }
0x1ca7   :  { %v6800_v14 = vpop.eup %6799 }
0x1ca8   :  { %v3535_v12 = vadd.f32 1.0, %v6800_v14 }
0x1caa   :  { %6803 = vrcp.f32 %v3535_v12 }
0x1cab   :  { %v6802_v1 = vpop.eup %6801 }
0x1cac   :  { %v3536_v39 = vadd.f32 1.0, %v6802_v1 }
0x1cae   :  { %6805 = vrcp.f32 %v3536_v39 }
0x1cb4   :  { %v6804_v35 = vpop.eup %6803 }
0x1cb5   :  { %v3539_v57 = vmul.f32 %v6804_v35, %v7294_v5 }
0x1cb7   :  { %v3541_v13 = vadd.f32 %v3539_v57, %v7303_v32 }
0x1cb8   :  { %v6806_v29 = vpop.eup %6805 }
0x1cb9   :  { %3547 = vrot.lane.b32.xlu0 %v3541_v13, %s6935_s30  ;;  %v3540_v15 = vmul.f32 %v6806_v29, %v7294_v5  ;;  %v3543_v7 = vmul.f32 %v3541_v13, %v7624_v2 }
0x1cbb   :  { %v3542_v17 = vadd.f32 %v3540_v15, %v7303_v32 }
0x1cbd   :  { %3549 = vrot.lane.b32.xlu1 %v3542_v17, %s6935_s30  ;;  %v3544_v23 = vmul.f32 %v3542_v17, %v7628_v37 }
0x1d2b   :  { %v3548_v27 = vpop.permute.xlu0 %3547 }
0x1d2c   :  { %v3553_v28 = vmul.f32 %v3548_v27, %v3541_v13 }
0x1d2e   :  { %3557 = vrot.lane.b32.xlu0 %v3553_v28, %s6936_s11 }
0x1d2f   :  { %v3550_v49 = vpop.permute.xlu1 %3549 }
0x1d30   :  { %v3554_v26 = vmul.f32 %v3550_v49, %v3542_v17 }
0x1d32   :  { %3559 = vrot.lane.b32.xlu1 %v3554_v26, %s6936_s11 }
0x1da0   :  { %v3558_v41 = vpop.permute.xlu0 %3557 }
0x1da1   :  { %v7737_v31 = vadd.f32 %v3558_v41, %v3543_v7 }
0x1da3   :  { %6807 = vtanh.f32 %v7737_v31 }
0x1da4   :  { %v3560_v55 = vpop.permute.xlu1 %3559 }
0x1da5   :  { %v7741_v63 = vadd.f32 %v3560_v55, %v3544_v23 }
0x1da7   :  { %6809 = vtanh.f32 %v7741_v63 }
0x1dad   :  { %v6808_v42 = vpop.eup %6807 }
0x1dae   :  { %3569 = vrot.lane.b32.xlu0 %v6808_v42, %s6935_s30 }
0x1db1   :  { %v6810_v24 = vpop.eup %6809 }
0x1db2   :  { %3571 = vrot.lane.b32.xlu1 %v6810_v24, %s6935_s30 }
0x1e20   :  { %v3570_v6 = vpop.permute.xlu0 %3569 }
0x1e21   :  { %v3575_v2 = vmul.f32 %v3570_v6, %v3541_v13 }
0x1e23   :  { %3583 = vrot.lane.b32.xlu0 %v3575_v2, %s6936_s11 }
0x1e24   :  { %v3572_v61 = vpop.permute.xlu1 %3571 }
0x1e25   :  { %v3576_v21 = vmul.f32 %v3572_v61, %v3542_v17 }
0x1e27   :  { %3585 = vrot.lane.b32.xlu1 %v3576_v21, %s6936_s11 }
0x1e95   :  { %v7748_v37 = vpop.permute.xlu0 %3583 }
0x1e96   :  { %6274 = vmatprep.mubr.msk.f32.mxu1 %vm376_vm2, %v7748_v37 }
0x1e99   :  { %v7752_v45 = vpop.permute.xlu1 %3585 }
0x1e9a   :  { %6275 = vmatmul.mubr.msk.f32.vlgmr.msra.gmra.mrb[48].mxu1 %vm376_vm2, %v7752_v45 }
0x1e9b   :  { %6281 = vmatprep.mubr.msk.f32.mxu1 %vm286_vm1, %v5749_v20 }
0x1f6d   :  { %v6276_v47 = vpop.f32.mrb[48].mxu1 }
0x1f6e   :  { %v3657_v54 = vpop.f32.mrb[49].mxu1 }
0x1f6f   :  { %v6597_v9 = vpack.c.bf16 %v6276_v47, %v3657_v54 }
0x1f71   :  { %6598 = vmatprep.subr.bf16.mxu1 %v6597_v9 }
0x1f72   :  { %6600 = vmatpush3.bf16.msra.mxu1 %v6597_v9 }
0x1f73   :  { %6602 = vmatprep.subr.bf16.mxu1 %v7434_v25 }
0x1f75   :  { %6282 = vmatmul.mubr.msk.f32.vlgmr.msra.gmra.mrb[50].mxu1 %vm286_vm1, %v5750_v18 }
0x1f76   :  { %6604 = vmatpush3.bf16.msra.mxu1 %v7434_v25  ;;  %6288 = vmatprep.mubr.msk.f32.mxu1 %vm286_vm1, %v3260_v0 }
0x1f79   :  { %6289 = vmatmul.mubr.msk.f32.vlgmr.msra.gmra.mrb[52].mxu1 %vm286_vm1, %v3261_v36 }
0x2048   :  { %v7770_v14 = vpop.f32.mrb[50].mxu1 }
0x2049   :  { %v7772_v12 = vpop.f32.mrb[51].mxu1 }
0x204c   :  { %v6290_v1 = vpop.f32.mrb[52].mxu1 }
0x204d   :  { %v3838_v39 = vadd.f32 %v6290_v1, %v7453_v38  ;;  %v3832_v35 = vpop.f32.mrb[53].mxu1 }
0x204e   :  { %v3833_v10 = vadd.f32 %v7453_v38, %v3832_v35 }
0x204f   :  { %v3842_v57 = vadd.f32 %v3838_v39, %v7725_v62 }
0x2050   :  { %v3841_v25 = vadd.f32 %v3833_v10, %v7720_v44 }
0x2051   :  { %v3844_v13 = vmul.f32 %v3842_v57, %v7294_v5 }
0x2052   :  { %v3843_v22 = vmul.f32 %v3841_v25, %v7294_v5 }
0x2053   :  { %v3846_v29 = vsub.f32 0.0, %v3844_v13 }
0x2054   :  { %v3845_v15 = vsub.f32 0.0, %v3843_v22  ;;  %v1300_v22 = vadd.f32 %v7716_v30, %v7330_v3 }
0x2055   :  { %v3849_v17 = vmul.f32 1.442695, %v3846_v29 }
0x2056   :  { %v3847_v27 = vmul.f32 1.442695, %v3845_v15 }
0x2057   :  { %6811 = vpow2.f32 %v3849_v17 }
0x2058   :  { %6813 = vpow2.f32 %v3847_v27 }
0x2061   :  { %v6812_v28 = vpop.eup %6811 }
0x2062   :  { %v6814_v49 = vpop.eup %6813  ;;  %v3852_v26 = vadd.f32 1.0, %v6812_v28 }
0x2063   :  { %v3851_v7 = vadd.f32 1.0, %v6814_v49 }
0x2064   :  { %6815 = vrcp.f32 %v3852_v26 }
0x2065   :  { %6817 = vrcp.f32 %v3851_v7 }
0x206e   :  { %v6816_v38 = vpop.eup %6815 }
0x206f   :  { %v6818_v62 = vpop.eup %6817  ;;  %v3856_v44 = vmul.f32 %v6816_v38, %v7294_v5 }
0x2070   :  { %v3855_v41 = vmul.f32 %v6818_v62, %v7294_v5 }
0x2071   :  { %v3858_v23 = vadd.f32 %v3856_v44, %v7303_v32 }
0x2072   :  { %v3857_v55 = vadd.f32 %v3855_v41, %v7303_v32 }
0x2073   :  { %3865 = vrot.lane.b32.xlu1 %v3858_v23, %s6935_s30  ;;  %v3860_v61 = vmul.f32 %v3858_v23, %v7681_v40 }
0x2074   :  { %3863 = vrot.lane.b32.xlu0 %v3857_v55, %s6935_s30  ;;  %v3859_v20 = vmul.f32 %v3857_v55, %v7683_v48 }
0x20e5   :  { %v3866_v42 = vpop.permute.xlu1 %3865 }
0x20e6   :  { %v3870_v24 = vmul.f32 %v3866_v42, %v3858_v23  ;;  %v3864_v6 = vpop.permute.xlu0 %3863 }
0x20e7   :  { %v3869_v2 = vmul.f32 %v3864_v6, %v3857_v55 }
0x20e8   :  { %3875 = vrot.lane.b32.xlu1 %v3870_v24, %s6936_s11 }
0x20e9   :  { %3873 = vrot.lane.b32.xlu0 %v3869_v2, %s6936_s11 }
0x215a   :  { %v3876_v21 = vpop.permute.xlu1 %3875 }
0x215b   :  { %v7790_v47 = vadd.f32 %v3876_v21, %v3860_v61  ;;  %v3874_v54 = vpop.permute.xlu0 %3873 }
0x215c   :  { %v7792_v9 = vadd.f32 %v3874_v54, %v3859_v20 }
0x215d   :  { %6819 = vtanh.f32 %v7790_v47 }
0x215e   :  { %6821 = vtanh.f32 %v7792_v9 }
0x2167   :  { %v6820_v18 = vpop.eup %6819 }
0x2168   :  { %v6822_v0 = vpop.eup %6821  ;;  %3887 = vrot.lane.b32.xlu1 %v6820_v18, %s6935_s30 }
0x2169   :  { %3885 = vrot.lane.b32.xlu0 %v6822_v0, %s6935_s30 }
0x21da   :  { %v3888_v36 = vpop.permute.xlu1 %3887 }
0x21db   :  { %v7798_v40 = vmul.f32 %v3888_v36, %v3858_v23  ;;  %v3886_v1 = vpop.permute.xlu0 %3885 }
0x21dc   :  { %v7800_v48 = vmul.f32 %v3886_v1, %v3857_v55 }
0x21dd   :  { %3907 = vrot.lane.b32.xlu1 %v7798_v40, %s6935_s30 }
0x21de   :  { %3905 = vrot.lane.b32.xlu0 %v7800_v48, %s6935_s30 }
0x224f   :  { %v3908_v10 = vpop.permute.xlu1 %3907 }
0x2250   :  { %v3906_v39 = vpop.permute.xlu0 %3905  ;;  %v3912_v57 = vsel %vm376_vm2, %v7752_v45, %v3908_v10 }
0x2251   :  { %v3911_v35 = vsel %vm376_vm2, %v7748_v37, %v3906_v39  ;;  %v1295_v37 = vadd.f32 %v7716_v30, %v7338_v4 }
0x2252   :  { %5756 = vmatmul.mubr.msk.f32.vlgmr.msra.gmra.mrb[42].mxu0 %vm1666_vm6, %v3911_v35  ;;  %v4066_v35 = vld [vmem:[%s8228_s3] sm:$0xff] }
0x2253   :  { %4005 = vmatprep.mubr.f32.mxu0 %v6933_v52  ;;  %6635 = vmatpush1.bf16.msra.mxu0 %v7228_v43 }
0x2254   :  { %6636 = vmatprep.subr.bf16.mxu0 %v6932_v19 }
0x2256   :  { %5757 = vmatmul.mubr.msk.f32.gmra.mrb[44].mxu0 %vm1666_vm6, %v3912_v57 }
0x2257   :  { %6638 = vmatpush1.bf16.msra.mxu0 %v7245_v51  ;;  %4488 = vmatprep.mubr.f32.mxu0 %v6933_v52 }
0x2258   :  { %6640 = vmatprep.subr.bf16.mxu0 %v7249_v53 }
0x225b   :  { %6641 = vmatpush1.bf16.msra.mxu0 %v6932_v19 }
0x225c   :  { %6643 = vmatprep.subr.bf16.mxu0 %v7259_v58 }
0x225f   :  { %6644 = vmatpush1.bf16.msra.mxu0 %v6932_v19 }
0x2260   :  { %6661 = vmatprep.subr.bf16.mxu0 %v6932_v19 }
0x2325   :  { %v4001_v45 = vpop.f32.mrb[42].mxu0 }
0x2326   :  { %v4014_v25 = vadd.f32 %v4001_v45, %v1295_v37  ;;  %v7824_v13 = vpop.f32.mrb[43].mxu0  ;;  %v4068_v37 = vld [vmem:[%s8228_s3 + $0x10] sm:$0xff]  ;;  %v4069_v45 = vld [vmem:[%s8228_s3 + $0x18] sm:$0xff] }
0x2328   :  { %v4016_v29 = vmul.f32 %v4014_v25, %v7294_v5  ;;  %v7866_v25 = vpack.c.bf16 %v4069_v45, %v4068_v37 }
0x2329   :  { %v4007_v15 = vpop.f32.mrb[44].mxu0 }
0x232a   :  { %v4018_v17 = vsub.f32 0.0, %v4016_v29  ;;  %v4015_v27 = vadd.f32 %v4007_v15, %v1300_v22  ;;  %v7829_v28 = vpop.f32.mrb[45].mxu0 }
0x232c   :  { %v4020_v49 = vmul.f32 1.442695, %v4018_v17  ;;  %v4017_v26 = vmul.f32 %v4015_v27, %v7294_v5 }
0x232e   :  { %6823 = vpow2.f32 %v4020_v49  ;;  %v4019_v7 = vsub.f32 0.0, %v4017_v26  ;;  %v5760_v26 = vld [vmem:[%s8225_s0 + $0x50] sm:$0xff] }
0x2330   :  { %v4022_v4 = vmul.f32 1.442695, %v4019_v7  ;;  %v4240_v7 = vld [vmem:[%s8232_s7] sm:$0xff] }
0x2332   :  { %6825 = vpow2.f32 %v4022_v4  ;;  %v4241_v4 = vld [vmem:[%s8232_s7 + $0x8] sm:$0xff] }
0x2338   :  { %v6824_v38 = vpop.eup %6823 }
0x2339   :  { %v4024_v62 = vadd.f32 1.0, %v6824_v38 }
0x233b   :  { %6827 = vrcp.f32 %v4024_v62 }
0x233c   :  { %v6826_v44 = vpop.eup %6825 }
0x233d   :  { %v4025_v41 = vadd.f32 1.0, %v6826_v44 }
0x233f   :  { %6829 = vrcp.f32 %v4025_v41  ;;  %v7890_v41 = vpack.c.bf16 %v4241_v4, %v4240_v7 }
0x2345   :  { %v6828_v3 = vpop.eup %6827 }
0x2346   :  { %v4028_v23 = vmul.f32 %v6828_v3, %v7294_v5  ;;  %v5761_v3 = vld [vmem:[%s8225_s0 + $0x58] sm:$0xff] }
0x2348   :  { %v4030_v55 = vadd.f32 %v4028_v23, %v7303_v32  ;;  %v3749_v23 = vmax.f32 %v7772_v12, 0.0 }
0x2349   :  { %v6830_v42 = vpop.eup %6829 }
0x234a   :  { %4036 = vrot.lane.b32.xlu0 %v4030_v55, %s6935_s30  ;;  %v4029_v24 = vmul.f32 %v6830_v42, %v7294_v5  ;;  %v4032_v54 = vmul.f32 %v4030_v55, %v7737_v31  ;;  %v4067_v31 = vld [vmem:[%s8228_s3 + $0x8] sm:$0xff] }
0x234b   :  { %v7854_v10 = vpack.c.bf16 %v4067_v31, %v4066_v35 }
0x234c   :  { %v4031_v6 = vadd.f32 %v4029_v24, %v7303_v32  ;;  %v7913_v24 = vld [vmem:[%s8234_s9] ss:$0 sm:$0xff] }
0x234d   :  { %6618 = vmatprep.subr.bf16.mxu1 %v7854_v10 }
0x234e   :  { %4038 = vrot.lane.b32.xlu1 %v4031_v6, %s6935_s30  ;;  %v4033_v36 = vmul.f32 %v4031_v6, %v7741_v63  ;;  %6620 = vmatpush3.bf16.msra.mxu1 %v7854_v10 }
0x234f   :  { %6622 = vmatprep.subr.bf16.mxu1 %v7866_v25 }
0x2352   :  { %6624 = vmatpush3.bf16.msra.mxu1 %v7866_v25 }
0x23bc   :  { %v4037_v2 = vpop.permute.xlu0 %4036 }
0x23bd   :  { %v4042_v61 = vmul.f32 %v4037_v2, %v4030_v55 }
0x23bf   :  { %4046 = vrot.lane.b32.xlu0 %v4042_v61, %s6936_s11 }
0x23c0   :  { %v4039_v21 = vpop.permute.xlu1 %4038 }
0x23c1   :  { %v4043_v20 = vmul.f32 %v4039_v21, %v4031_v6 }
0x23c3   :  { %4048 = vrot.lane.b32.xlu1 %v4043_v20, %s6936_s11 }
0x2431   :  { %v4047_v18 = vpop.permute.xlu0 %4046 }
0x2432   :  { %v7841_v0 = vadd.f32 %v4047_v18, %v4032_v54 }
0x2434   :  { %6831 = vtanh.f32 %v7841_v0 }
0x2435   :  { %v4049_v1 = vpop.permute.xlu1 %4048 }
0x2436   :  { %v7845_v39 = vadd.f32 %v4049_v1, %v4033_v36 }
0x2438   :  { %6833 = vtanh.f32 %v7845_v39 }
0x243e   :  { %v6832_v63 = vpop.eup %6831 }
0x243f   :  { %4058 = vrot.lane.b32.xlu0 %v6832_v63, %s6935_s30 }
0x2442   :  { %v6834_v57 = vpop.eup %6833 }
0x2443   :  { %4060 = vrot.lane.b32.xlu1 %v6834_v57, %s6935_s30 }
0x24b1   :  { %v4059_v22 = vpop.permute.xlu0 %4058 }
0x24b2   :  { %v4064_v29 = vmul.f32 %v4059_v22, %v4030_v55  ;;  %v3750_v55 = vmax.f32 %v7770_v14, 0.0 }
0x24b4   :  { %4072 = vrot.lane.b32.xlu0 %v4064_v29, %s6936_s11 }
0x24b5   :  { %v4061_v15 = vpop.permute.xlu1 %4060 }
0x24b6   :  { %v4065_v17 = vmul.f32 %v4061_v15, %v4031_v6 }
0x24b8   :  { %4074 = vrot.lane.b32.xlu1 %v4065_v17, %s6936_s11 }
0x2526   :  { %v7872_v27 = vpop.permute.xlu0 %4072 }
0x2527   :  { %6299 = vmatprep.mubr.msk.f32.mxu1 %vm376_vm2, %v7872_v27 }
0x252a   :  { %v7876_v49 = vpop.permute.xlu1 %4074 }
0x252b   :  { %6300 = vmatmul.mubr.msk.f32.vlgmr.msra.gmra.mrb[54].mxu1 %vm376_vm2, %v7876_v49 }
0x252c   :  { %6306 = vmatprep.mubr.msk.f32.mxu1 %vm286_vm1, %v5760_v26 }
0x25fe   :  { %v6301_v38 = vpop.f32.mrb[54].mxu1 }
0x25ff   :  { %v4146_v62 = vpop.f32.mrb[55].mxu1 }
0x2600   :  { %v6625_v44 = vpack.c.bf16 %v6301_v38, %v4146_v62 }
0x2602   :  { %6626 = vmatprep.subr.bf16.mxu1 %v6625_v44 }
0x2603   :  { %6628 = vmatpush3.bf16.msra.mxu1 %v6625_v44 }
0x2604   :  { %6630 = vmatprep.subr.bf16.mxu1 %v7890_v41 }
0x2606   :  { %6307 = vmatmul.mubr.msk.f32.vlgmr.msra.gmra.mrb[56].mxu1 %vm286_vm1, %v5761_v3 }
0x2607   :  { %6632 = vmatpush3.bf16.msra.mxu1 %v7890_v41  ;;  %6313 = vmatprep.mubr.msk.f32.mxu1 %vm286_vm1, %v3749_v23 }
0x2608   :  { %6646 = vmatprep.subr.bf16.mxu1 %v7854_v10 }
0x260a   :  { %6314 = vmatmul.mubr.msk.f32.vlgmr.msra.gmra.mrb[58].mxu1 %vm286_vm1, %v3750_v55 }
0x260b   :  { %6648 = vmatpush3.bf16.msra.mxu1 %v7854_v10 }
0x260c   :  { %6650 = vmatprep.subr.bf16.mxu1 %v7866_v25 }
0x260f   :  { %6652 = vmatpush3.bf16.msra.mxu1 %v7866_v25 }
0x26d9   :  { %v7906_v42 = vpop.f32.mrb[56].mxu1 }
0x26da   :  { %v7908_v12 = vpop.f32.mrb[57].mxu1 }
0x26dd   :  { %v6315_v14 = vpop.f32.mrb[58].mxu1 }
0x26de   :  { %v4327_v6 = vadd.f32 %v6315_v14, %v7913_v24  ;;  %v4321_v2 = vpop.f32.mrb[59].mxu1 }
0x26df   :  { %v4322_v61 = vadd.f32 %v7913_v24, %v4321_v2 }
0x26e0   :  { %v4331_v21 = vadd.f32 %v4327_v6, %v7829_v28 }
0x26e1   :  { %v4330_v20 = vadd.f32 %v4322_v61, %v7824_v13 }
0x26e2   :  { %v4333_v54 = vmul.f32 %v4331_v21, %v7294_v5 }
0x26e3   :  { %v4332_v18 = vmul.f32 %v4330_v20, %v7294_v5 }
0x26e4   :  { %v4335_v36 = vsub.f32 0.0, %v4333_v54 }
0x26e5   :  { %v4334_v1 = vsub.f32 0.0, %v4332_v18 }
0x26e6   :  { %v4338_v35 = vmul.f32 1.442695, %v4335_v36 }
0x26e7   :  { %v4336_v31 = vmul.f32 1.442695, %v4334_v1 }
0x26e8   :  { %6835 = vpow2.f32 %v4338_v35 }
0x26e9   :  { %6837 = vpow2.f32 %v4336_v31  ;;  %v1469_v31 = vadd.f32 %v7716_v30, %v7277_v59 }
0x26f2   :  { %v6836_v63 = vpop.eup %6835 }
0x26f3   :  { %v6838_v57 = vpop.eup %6837  ;;  %v4341_v37 = vadd.f32 1.0, %v6836_v63 }
0x26f4   :  { %v4340_v45 = vadd.f32 1.0, %v6838_v57 }
0x26f5   :  { %6839 = vrcp.f32 %v4341_v37 }
0x26f6   :  { %6841 = vrcp.f32 %v4340_v45 }
0x26ff   :  { %v6840_v22 = vpop.eup %6839 }
0x2700   :  { %v6842_v28 = vpop.eup %6841  ;;  %v4345_v13 = vmul.f32 %v6840_v22, %v7294_v5 }
0x2701   :  { %v4344_v29 = vmul.f32 %v6842_v28, %v7294_v5 }
0x2702   :  { %v4347_v15 = vadd.f32 %v4345_v13, %v7303_v32 }
0x2703   :  { %v4346_v17 = vadd.f32 %v4344_v29, %v7303_v32 }
0x2704   :  { %4354 = vrot.lane.b32.xlu1 %v4347_v15, %s6935_s30  ;;  %v4349_v62 = vmul.f32 %v4347_v15, %v7790_v47 }
0x2705   :  { %4352 = vrot.lane.b32.xlu0 %v4346_v17, %s6935_s30  ;;  %v4348_v3 = vmul.f32 %v4346_v17, %v7792_v9 }
0x2776   :  { %v4355_v26 = vpop.permute.xlu1 %4354 }
0x2777   :  { %v4359_v7 = vmul.f32 %v4355_v26, %v4347_v15  ;;  %v4353_v4 = vpop.permute.xlu0 %4352 }
0x2778   :  { %v4358_v38 = vmul.f32 %v4353_v4, %v4346_v17 }
0x2779   :  { %4364 = vrot.lane.b32.xlu1 %v4359_v7, %s6936_s11 }
0x277a   :  { %4362 = vrot.lane.b32.xlu0 %v4358_v38, %s6936_s11 }
0x27eb   :  { %v4365_v44 = vpop.permute.xlu1 %4364 }
0x27ec   :  { %v7931_v23 = vadd.f32 %v4365_v44, %v4349_v62  ;;  %v4363_v55 = vpop.permute.xlu0 %4362 }
0x27ed   :  { %v7933_v14 = vadd.f32 %v4363_v55, %v4348_v3 }
0x27ee   :  { %6843 = vtanh.f32 %v7931_v23 }
0x27ef   :  { %6845 = vtanh.f32 %v7933_v14 }
0x27f8   :  { %v6844_v6 = vpop.eup %6843 }
0x27f9   :  { %v6846_v2 = vpop.eup %6845  ;;  %4376 = vrot.lane.b32.xlu1 %v6844_v6, %s6935_s30 }
0x27fa   :  { %4374 = vrot.lane.b32.xlu0 %v6846_v2, %s6935_s30 }
0x286b   :  { %v4377_v61 = vpop.permute.xlu1 %4376 }
0x286c   :  { %v7939_v47 = vmul.f32 %v4377_v61, %v4347_v15  ;;  %v4375_v21 = vpop.permute.xlu0 %4374 }
0x286d   :  { %v7941_v9 = vmul.f32 %v4375_v21, %v4346_v17 }
0x286e   :  { %4396 = vrot.lane.b32.xlu1 %v7939_v47, %s6935_s30 }
0x286f   :  { %4394 = vrot.lane.b32.xlu0 %v7941_v9, %s6935_s30 }
0x28e0   :  { %v4397_v18 = vpop.permute.xlu1 %4396 }
0x28e1   :  { %v4395_v20 = vpop.permute.xlu0 %4394  ;;  %v4401_v36 = vsel %vm376_vm2, %v7876_v49, %v4397_v18 }
0x28e2   :  { %v4400_v54 = vsel %vm376_vm2, %v7872_v27, %v4395_v20  ;;  %v1464_v27 = vadd.f32 %v7716_v30, %v7279_v60 }
0x28e3   :  { %5767 = vmatmul.mubr.msk.f32.vlgmr.msra.gmra.mrb[46].mxu0 %vm1666_vm6, %v4400_v54 }
0x28e4   :  { %4494 = vmatprep.mubr.f32.mxu0 %v6933_v52  ;;  %6663 = vmatpush1.bf16.msra.mxu0 %v7228_v43 }
0x28e5   :  { %6664 = vmatprep.subr.bf16.mxu0 %v6932_v19 }
0x28e7   :  { %5768 = vmatmul.mubr.msk.f32.gmra.mrb[48].mxu0 %vm1666_vm6, %v4401_v36 }
0x28e8   :  { %6666 = vmatpush1.bf16.msra.mxu0 %v7245_v51  ;;  %4977 = vmatprep.mubr.f32.mxu0 %v6933_v52 }
0x28e9   :  { %6668 = vmatprep.subr.bf16.mxu0 %v7249_v53 }
0x28ec   :  { %6669 = vmatpush1.bf16.msra.mxu0 %v6932_v19 }
0x28ed   :  { %6671 = vmatprep.subr.bf16.mxu0 %v7259_v58 }
0x28f0   :  { %6672 = vmatpush1.bf16.msra.mxu0 %v6932_v19 }
0x28f1   :  { %6689 = vmatprep.subr.bf16.mxu0 %v6932_v19 }
0x29b6   :  { %v4490_v49 = vpop.f32.mrb[46].mxu0 }
0x29b7   :  { %v4503_v1 = vadd.f32 %v4490_v49, %v1464_v27  ;;  %v7965_v35 = vpop.f32.mrb[47].mxu0 }
0x29b9   :  { %v4505_v63 = vmul.f32 %v4503_v1, %v7294_v5 }
0x29ba   :  { %v4496_v57 = vpop.f32.mrb[48].mxu0 }
0x29bb   :  { %v4507_v37 = vsub.f32 0.0, %v4505_v63  ;;  %v4504_v45 = vadd.f32 %v4496_v57, %v1469_v31  ;;  %v7970_v22 = vpop.f32.mrb[49].mxu0 }
0x29bd   :  { %v4509_v28 = vmul.f32 1.442695, %v4507_v37  ;;  %v4506_v13 = vmul.f32 %v4504_v45, %v7294_v5  ;;  %v5771_v45 = vld [vmem:[%s8225_s0 + $0x60] sm:$0xff] }
0x29bf   :  { %6847 = vpow2.f32 %v4509_v28  ;;  %v4508_v29 = vsub.f32 0.0, %v4506_v13 }
0x29c1   :  { %v4511_v60 = vmul.f32 1.442695, %v4508_v29 }
0x29c3   :  { %6849 = vpow2.f32 %v4511_v60  ;;  %v5772_v60 = vld [vmem:[%s8225_s0 + $0x68] sm:$0xff] }
0x29c9   :  { %v6848_v15 = vpop.eup %6847 }
0x29ca   :  { %v4513_v17 = vadd.f32 1.0, %v6848_v15  ;;  %v4238_v15 = vmax.f32 %v7908_v12, 0.0 }
0x29cc   :  { %6851 = vrcp.f32 %v4513_v17  ;;  %v4239_v17 = vmax.f32 %v7906_v42, 0.0 }
0x29cd   :  { %v6850_v26 = vpop.eup %6849 }
0x29ce   :  { %v4514_v7 = vadd.f32 1.0, %v6850_v26 }
0x29d0   :  { %6853 = vrcp.f32 %v4514_v7 }
0x29d6   :  { %v6852_v59 = vpop.eup %6851 }
0x29d7   :  { %v4517_v4 = vmul.f32 %v6852_v59, %v7294_v5 }
0x29d9   :  { %v4519_v38 = vadd.f32 %v4517_v4, %v7303_v32 }
0x29da   :  { %v6854_v62 = vpop.eup %6853 }
0x29db   :  { %4525 = vrot.lane.b32.xlu0 %v4519_v38, %s6935_s30  ;;  %v4518_v44 = vmul.f32 %v6854_v62, %v7294_v5  ;;  %v4521_v21 = vmul.f32 %v4519_v38, %v7841_v0 }
0x29dd   :  { %v4520_v3 = vadd.f32 %v4518_v44, %v7303_v32 }
0x29df   :  { %4527 = vrot.lane.b32.xlu1 %v4520_v3, %s6935_s30  ;;  %v4522_v18 = vmul.f32 %v4520_v3, %v7845_v39 }
0x2a4d   :  { %v4526_v55 = vpop.permute.xlu0 %4525 }
0x2a4e   :  { %v4531_v6 = vmul.f32 %v4526_v55, %v4519_v38 }
0x2a50   :  { %4535 = vrot.lane.b32.xlu0 %v4531_v6, %s6936_s11 }
0x2a51   :  { %v4528_v2 = vpop.permute.xlu1 %4527 }
0x2a52   :  { %v4532_v61 = vmul.f32 %v4528_v2, %v4520_v3 }
0x2a54   :  { %4537 = vrot.lane.b32.xlu1 %v4532_v61, %s6936_s11 }
0x2ac2   :  { %v4536_v20 = vpop.permute.xlu0 %4535 }
0x2ac3   :  { %v7982_v54 = vadd.f32 %v4536_v20, %v4521_v21 }
0x2ac5   :  { %6855 = vtanh.f32 %v7982_v54 }
0x2ac6   :  { %v4538_v36 = vpop.permute.xlu1 %4537 }
0x2ac7   :  { %v7986_v27 = vadd.f32 %v4538_v36, %v4522_v18 }
0x2ac9   :  { %6857 = vtanh.f32 %v7986_v27 }
0x2acf   :  { %v6856_v49 = vpop.eup %6855 }
0x2ad0   :  { %4547 = vrot.lane.b32.xlu0 %v6856_v49, %s6935_s30 }
0x2ad3   :  { %v6858_v1 = vpop.eup %6857 }
0x2ad4   :  { %4549 = vrot.lane.b32.xlu1 %v6858_v1, %s6935_s30 }
0x2b42   :  { %v4548_v31 = vpop.permute.xlu0 %4547 }
0x2b43   :  { %v4553_v0 = vmul.f32 %v4548_v31, %v4519_v38 }
0x2b45   :  { %4561 = vrot.lane.b32.xlu0 %v4553_v0, %s6936_s11 }
0x2b46   :  { %v4550_v63 = vpop.permute.xlu1 %4549 }
0x2b47   :  { %v4554_v57 = vmul.f32 %v4550_v63, %v4520_v3 }
0x2b49   :  { %4563 = vrot.lane.b32.xlu1 %v4554_v57, %s6936_s11 }
0x2bb7   :  { %v7993_v39 = vpop.permute.xlu0 %4561 }
0x2bb8   :  { %6324 = vmatprep.mubr.msk.f32.mxu1 %vm376_vm2, %v7993_v39 }
0x2bbb   :  { %v7997_v37 = vpop.permute.xlu1 %4563 }
0x2bbc   :  { %6325 = vmatmul.mubr.msk.f32.vlgmr.msra.gmra.mrb[60].mxu1 %vm376_vm2, %v7997_v37 }
0x2bbd   :  { %6331 = vmatprep.mubr.msk.f32.mxu1 %vm286_vm1, %v5771_v45 }
0x2c8f   :  { %v6326_v28 = vpop.f32.mrb[60].mxu1 }
0x2c90   :  { %v4635_v13 = vpop.f32.mrb[61].mxu1 }
0x2c91   :  { %v6653_v29 = vpack.c.bf16 %v6326_v28, %v4635_v13 }
0x2c93   :  { %6654 = vmatprep.subr.bf16.mxu1 %v6653_v29 }
0x2c94   :  { %6656 = vmatpush3.bf16.msra.mxu1 %v6653_v29 }
0x2c95   :  { %6658 = vmatprep.subr.bf16.mxu1 %v7890_v41 }
0x2c97   :  { %6332 = vmatmul.mubr.msk.f32.vlgmr.msra.gmra.mrb[62].mxu1 %vm286_vm1, %v5772_v60 }
0x2c98   :  { %6660 = vmatpush3.bf16.msra.mxu1 %v7890_v41  ;;  %6338 = vmatprep.mubr.msk.f32.mxu1 %vm286_vm1, %v4238_v15 }
0x2c99   :  { %6674 = vmatprep.subr.bf16.mxu1 %v7854_v10 }
0x2c9b   :  { %6339 = vmatmul.mubr.msk.f32.vlgmr.msra.gmra.mrb[64].mxu1 %vm286_vm1, %v4239_v17 }
0x2c9c   :  { %6676 = vmatpush3.bf16.msra.mxu1 %v7854_v10 }
0x2c9d   :  { %6678 = vmatprep.subr.bf16.mxu1 %v7866_v25 }
0x2ca0   :  { %6680 = vmatpush3.bf16.msra.mxu1 %v7866_v25 }
0x2d6a   :  { %v8019_v26 = vpop.f32.mrb[62].mxu1 }
0x2d6b   :  { %v8021_v12 = vpop.f32.mrb[63].mxu1 }
0x2d6e   :  { %v6340_v7 = vpop.f32.mrb[64].mxu1 }
0x2d6f   :  { %v4816_v59 = vadd.f32 %v6340_v7, %v7913_v24  ;;  %v4810_v4 = vpop.f32.mrb[65].mxu1 }
0x2d70   :  { %v4811_v42 = vadd.f32 %v7913_v24, %v4810_v4 }
0x2d71   :  { %v4820_v38 = vadd.f32 %v4816_v59, %v7970_v22 }
0x2d72   :  { %v4819_v62 = vadd.f32 %v4811_v42, %v7965_v35 }
0x2d73   :  { %v4822_v10 = vmul.f32 %v4820_v38, %v7294_v5 }
0x2d74   :  { %v4821_v44 = vmul.f32 %v4819_v62, %v7294_v5 }
0x2d75   :  { %v4824_v3 = vsub.f32 0.0, %v4822_v10 }
0x2d76   :  { %v4823_v25 = vsub.f32 0.0, %v4821_v44 }
0x2d77   :  { %v4827_v55 = vmul.f32 1.442695, %v4824_v3 }
0x2d78   :  { %v4825_v6 = vmul.f32 1.442695, %v4823_v25 }
0x2d79   :  { %6859 = vpow2.f32 %v4827_v55 }
0x2d7a   :  { %6861 = vpow2.f32 %v4825_v6 }
0x2d83   :  { %v6860_v2 = vpop.eup %6859 }
0x2d84   :  { %v6862_v61 = vpop.eup %6861  ;;  %v4830_v21 = vadd.f32 1.0, %v6860_v2 }
0x2d85   :  { %v4829_v20 = vadd.f32 1.0, %v6862_v61 }
0x2d86   :  { %6863 = vrcp.f32 %v4830_v21 }
0x2d87   :  { %6865 = vrcp.f32 %v4829_v20 }
0x2d90   :  { %v6864_v18 = vpop.eup %6863 }
0x2d91   :  { %v6866_v22 = vpop.eup %6865  ;;  %v4834_v35 = vmul.f32 %v6864_v18, %v7294_v5 }
0x2d92   :  { %v4833_v36 = vmul.f32 %v6866_v22, %v7294_v5 }
0x2d93   :  { %v4836_v49 = vadd.f32 %v4834_v35, %v7303_v32 }
0x2d94   :  { %v4835_v1 = vadd.f32 %v4833_v36, %v7303_v32 }
0x2d95   :  { %4843 = vrot.lane.b32.xlu1 %v4836_v49, %s6935_s30  ;;  %v4838_v45 = vmul.f32 %v4836_v49, %v7931_v23 }
0x2d96   :  { %4841 = vrot.lane.b32.xlu0 %v4835_v1, %s6935_s30  ;;  %v4837_v13 = vmul.f32 %v4835_v1, %v7933_v14 }
0x2e07   :  { %v4844_v31 = vpop.permute.xlu1 %4843 }
0x2e08   :  { %v4848_v0 = vmul.f32 %v4844_v31, %v4836_v49  ;;  %v4842_v63 = vpop.permute.xlu0 %4841 }
0x2e09   :  { %v4847_v57 = vmul.f32 %v4842_v63, %v4835_v1 }
0x2e0a   :  { %4853 = vrot.lane.b32.xlu1 %v4848_v0, %s6936_s11 }
0x2e0b   :  { %4851 = vrot.lane.b32.xlu0 %v4847_v57, %s6936_s11 }
0x2e7c   :  { %v4854_v28 = vpop.permute.xlu1 %4853 }
0x2e7d   :  { %v8039_v29 = vadd.f32 %v4854_v28, %v4838_v45  ;;  %v4852_v60 = vpop.permute.xlu0 %4851 }
0x2e7e   :  { %v8041_v15 = vadd.f32 %v4852_v60, %v4837_v13 }
0x2e7f   :  { %6867 = vtanh.f32 %v8039_v29 }
0x2e80   :  { %6869 = vtanh.f32 %v8041_v15 }
0x2e89   :  { %v6868_v17 = vpop.eup %6867 }
0x2e8a   :  { %v6870_v7 = vpop.eup %6869  ;;  %4865 = vrot.lane.b32.xlu1 %v6868_v17, %s6935_s30 }
0x2e8b   :  { %4863 = vrot.lane.b32.xlu0 %v6870_v7, %s6935_s30 }
0x2efc   :  { %v4866_v59 = vpop.permute.xlu1 %4865 }
0x2efd   :  { %v8047_v23 = vmul.f32 %v4866_v59, %v4836_v49  ;;  %v4864_v4 = vpop.permute.xlu0 %4863 }
0x2efe   :  { %v8049_v14 = vmul.f32 %v4864_v4, %v4835_v1 }
0x2eff   :  { %4885 = vrot.lane.b32.xlu1 %v8047_v23, %s6935_s30 }
0x2f00   :  { %4883 = vrot.lane.b32.xlu0 %v8049_v14, %s6935_s30 }
0x2f71   :  { %v4886_v62 = vpop.permute.xlu1 %4885 }
0x2f72   :  { %v4884_v42 = vpop.permute.xlu0 %4883  ;;  %v4890_v10 = vsel %vm376_vm2, %v7997_v37, %v4886_v62 }
0x2f73   :  { %v4889_v38 = vsel %vm376_vm2, %v7993_v39, %v4884_v42 }
0x2f74   :  { %5778 = vmatmul.mubr.msk.f32.vlgmr.msra.gmra.mrb[50].mxu0 %vm1666_vm6, %v4889_v38 }
0x2f75   :  { %4983 = vmatprep.mubr.f32.mxu0 %v6933_v52  ;;  %6691 = vmatpush1.bf16.msra.mxu0 %v7228_v43  ;;  %v1633_v43 = vadd.f32 %v7716_v30, %v7380_v34 }
0x2f76   :  { %6692 = vmatprep.subr.bf16.mxu0 %v6932_v19 }
0x2f78   :  { %5779 = vmatmul.mubr.msk.f32.gmra.mrb[52].mxu0 %vm1666_vm6, %v4890_v10  ;;  %v5782_v10 = vld [vmem:[%s8225_s0 + $0x70] sm:$0xff] }
0x2f79   :  { %6694 = vmatpush1.bf16.msra.mxu0 %v7245_v51  ;;  %5466 = vmatprep.mubr.f32.mxu0 %v6933_v52  ;;  %v1638_v51 = vadd.f32 %v7716_v30, %v7378_v33 }
0x2f7a   :  { %6696 = vmatprep.subr.bf16.mxu0 %v7249_v53 }
0x2f7d   :  { %6697 = vmatpush1.bf16.msra.mxu0 %v6932_v19 }
0x2f7e   :  { %6699 = vmatprep.subr.bf16.mxu0 %v7259_v58 }
0x2f81   :  { %6700 = vmatpush1.bf16.msra.mxu0 %v6932_v19 }
0x3047   :  { %v4979_v39 = vpop.f32.mrb[50].mxu0 }
0x3048   :  { %v4992_v44 = vadd.f32 %v4979_v39, %v1633_v43  ;;  %v8072_v37 = vpop.f32.mrb[51].mxu0 }
0x304a   :  { %v4994_v3 = vmul.f32 %v4992_v44, %v7294_v5 }
0x304b   :  { %v4985_v25 = vpop.f32.mrb[52].mxu0 }
0x304c   :  { %v4996_v53 = vsub.f32 0.0, %v4994_v3  ;;  %v4993_v55 = vadd.f32 %v4985_v25, %v1638_v51  ;;  %v8077_v6 = vpop.f32.mrb[53].mxu0  ;;  %v5783_v51 = vld [vmem:[%s8225_s0 + $0x78] sm:$0xff]  ;;  %v4727_v3 = vmax.f32 %v8021_v12, 0.0  ;;  %v4728_v25 = vmax.f32 %v8019_v26, 0.0  ;;  %s6937_s0 = smov [#allocation4]  }
0x304e   :  { %v4998_v58 = vmul.f32 1.442695, %v4996_v53  ;;  %v4995_v19 = vmul.f32 %v4993_v55, %v7294_v5 }
0x3050   :  { %6871 = vpow2.f32 %v4998_v58  ;;  %v4997_v2 = vsub.f32 0.0, %v4995_v19 }
0x3052   :  { %v5000_v34 = vmul.f32 1.442695, %v4997_v2 }
0x3054   :  { %6873 = vpow2.f32 %v5000_v34 }
0x305a   :  { %v6872_v61 = vpop.eup %6871 }
0x305b   :  { %v5002_v21 = vadd.f32 1.0, %v6872_v61 }
0x305d   :  { %6875 = vrcp.f32 %v5002_v21 }
0x305e   :  { %v6874_v20 = vpop.eup %6873 }
0x305f   :  { %v5003_v18 = vadd.f32 1.0, %v6874_v20 }
0x3061   :  { %6877 = vrcp.f32 %v5003_v18 }
0x3067   :  { %v6876_v33 = vpop.eup %6875 }
0x3068   :  { %v5006_v30 = vmul.f32 %v6876_v33, %v7294_v5 }
0x306a   :  { %v5008_v22 = vadd.f32 %v5006_v30, %v7303_v32 }
0x306b   :  { %v6878_v35 = vpop.eup %6877 }
0x306c   :  { %5014 = vrot.lane.b32.xlu0 %v5008_v22, %s6935_s30  ;;  %v5007_v36 = vmul.f32 %v6878_v35, %v7294_v5  ;;  %v5010_v57 = vmul.f32 %v5008_v22, %v7982_v54 }
0x306e   :  { %v5009_v49 = vadd.f32 %v5007_v36, %v7303_v32 }
0x3070   :  { %5016 = vrot.lane.b32.xlu1 %v5009_v49, %s6935_s30  ;;  %v5011_v13 = vmul.f32 %v5009_v49, %v7986_v27 }
0x30de   :  { %v5015_v1 = vpop.permute.xlu0 %5014 }
0x30df   :  { %v5020_v31 = vmul.f32 %v5015_v1, %v5008_v22 }
0x30e1   :  { %5024 = vrot.lane.b32.xlu0 %v5020_v31, %s6936_s11 }
0x30e2   :  { %v5017_v0 = vpop.permute.xlu1 %5016 }
0x30e3   :  { %v5021_v63 = vmul.f32 %v5017_v0, %v5009_v49 }
0x30e5   :  { %5026 = vrot.lane.b32.xlu1 %v5021_v63, %s6936_s11 }
0x3153   :  { %v5025_v45 = vpop.permute.xlu0 %5024 }
0x3154   :  { %v5030_v28 = vadd.f32 %v5025_v45, %v5010_v57 }
0x3156   :  { %6879 = vtanh.f32 %v5030_v28 }
0x3157   :  { %v5027_v60 = vpop.permute.xlu1 %5026 }
0x3158   :  { %v5031_v17 = vadd.f32 %v5027_v60, %v5011_v13 }
0x315a   :  { %6881 = vtanh.f32 %v5031_v17 }
0x3160   :  { %v6880_v7 = vpop.eup %6879 }
0x3161   :  { %5036 = vrot.lane.b32.xlu0 %v6880_v7, %s6935_s30 }
0x3164   :  { %v6882_v59 = vpop.eup %6881 }
0x3165   :  { %5038 = vrot.lane.b32.xlu1 %v6882_v59, %s6935_s30 }
0x31d3   :  { %v5037_v4 = vpop.permute.xlu0 %5036 }
0x31d4   :  { %v5042_v42 = vmul.f32 %v5037_v4, %v5008_v22 }
0x31d6   :  { %5050 = vrot.lane.b32.xlu0 %v5042_v42, %s6936_s11 }
0x31d7   :  { %v5039_v38 = vpop.permute.xlu1 %5038 }
0x31d8   :  { %v5043_v54 = vmul.f32 %v5039_v38, %v5009_v49 }
0x31da   :  { %5052 = vrot.lane.b32.xlu1 %v5043_v54, %s6936_s11 }
0x3248   :  { %v8094_v62 = vpop.permute.xlu0 %5050 }
0x3249   :  { %6349 = vmatprep.mubr.msk.f32.mxu1 %vm376_vm2, %v8094_v62 }
0x324c   :  { %v8098_v27 = vpop.permute.xlu1 %5052 }
0x324d   :  { %6350 = vmatmul.mubr.msk.f32.vlgmr.msra.gmra.mrb[66].mxu1 %vm376_vm2, %v8098_v27 }
0x324e   :  { %6356 = vmatprep.mubr.msk.f32.mxu1 %vm286_vm1, %v5782_v10 }
0x3320   :  { %v6351_v43 = vpop.f32.mrb[66].mxu1 }
0x3321   :  { %v5124_v39 = vpop.f32.mrb[67].mxu1 }
0x3322   :  { %v6681_v44 = vpack.c.bf16 %v6351_v43, %v5124_v39 }
0x3324   :  { %6682 = vmatprep.subr.bf16.mxu1 %v6681_v44 }
0x3325   :  { %6684 = vmatpush3.bf16.msra.mxu1 %v6681_v44 }
0x3326   :  { %6686 = vmatprep.subr.bf16.mxu1 %v7890_v41 }
0x3328   :  { %6357 = vmatmul.mubr.msk.f32.vlgmr.msra.gmra.mrb[68].mxu1 %vm286_vm1, %v5783_v51 }
0x3329   :  { %6688 = vmatpush3.bf16.msra.mxu1 %v7890_v41  ;;  %6363 = vmatprep.mubr.msk.f32.mxu1 %vm286_vm1, %v4727_v3 }
0x332a   :  { %6702 = vmatprep.subr.bf16.mxu1 %v7890_v41 }
0x332c   :  { %6364 = vmatmul.mubr.msk.f32.vlgmr.msra.gmra.mrb[70].mxu1 %vm286_vm1, %v4728_v25 }
0x332d   :  { %6704 = vmatpush3.bf16.msra.mxu1 %v7890_v41 }
0x33fb   :  { %v6358_v53 = vpop.f32.mrb[68].mxu1 }
0x33fc   :  { %v5207_v55 = vpop.f32.mrb[69].mxu1  ;;  %v5217_v19 = vmax.f32 %v6358_v53, 0.0 }
0x33fd   :  { %v5216_v58 = vmax.f32 %v5207_v55, 0.0 }
0x33ff   :  { %v6365_v2 = vpop.f32.mrb[70].mxu1  ;;  %6370 = vmatprep.mubr.msk.f32.mxu1 %vm286_vm1, %v5216_v58 }
0x3400   :  { %v5305_v12 = vadd.f32 %v6365_v2, %v7913_v24  ;;  %v5299_v34 = vpop.f32.mrb[71].mxu1  ;;  %6371 = vmatmul.mubr.msk.f32.vlgmr.msra.gmra.mrb[72].mxu1 %vm286_vm1, %v5217_v19 }
0x3401   :  { %v5300_v26 = vadd.f32 %v7913_v24, %v5299_v34 }
0x3402   :  { %v5309_v61 = vadd.f32 %v5305_v12, %v8077_v6 }
0x3403   :  { %v5308_v21 = vadd.f32 %v5300_v26, %v8072_v37 }
0x3404   :  { %v5311_v41 = vmul.f32 %v5309_v61, %v7294_v5 }
0x3405   :  { %v5310_v20 = vmul.f32 %v5308_v21, %v7294_v5 }
0x3406   :  { %v5313_v18 = vsub.f32 0.0, %v5311_v41 }
0x3407   :  { %v5312_v33 = vsub.f32 0.0, %v5310_v20 }
0x3408   :  { %v5316_v30 = vmul.f32 1.442695, %v5313_v18 }
0x3409   :  { %v5314_v22 = vmul.f32 1.442695, %v5312_v33 }
0x340a   :  { %6883 = vpow2.f32 %v5316_v30 }
0x340b   :  { %6885 = vpow2.f32 %v5314_v22 }
0x3414   :  { %v6884_v35 = vpop.eup %6883 }
0x3415   :  { %v6886_v36 = vpop.eup %6885  ;;  %v5319_v49 = vadd.f32 1.0, %v6884_v35 }
0x3416   :  { %v5318_v1 = vadd.f32 1.0, %v6886_v36 }
0x3417   :  { %6887 = vrcp.f32 %v5319_v49 }
0x3418   :  { %6889 = vrcp.f32 %v5318_v1 }
0x3421   :  { %v6888_v31 = vpop.eup %6887 }
0x3422   :  { %v6890_v6 = vpop.eup %6889  ;;  %v5323_v37 = vmul.f32 %v6888_v31, %v7294_v5 }
0x3423   :  { %v5322_v0 = vmul.f32 %v6890_v6, %v7294_v5 }
0x3424   :  { %v5325_v63 = vadd.f32 %v5323_v37, %v7303_v32 }
0x3425   :  { %v5324_v57 = vadd.f32 %v5322_v0, %v7303_v32 }
0x3426   :  { %5332 = vrot.lane.b32.xlu1 %v5325_v63, %s6935_s30  ;;  %v5327_v59 = vmul.f32 %v5325_v63, %v8039_v29 }
0x3427   :  { %5330 = vrot.lane.b32.xlu0 %v5324_v57, %s6935_s30  ;;  %v5326_v42 = vmul.f32 %v5324_v57, %v8041_v15 }
0x3498   :  { %v5333_v45 = vpop.permute.xlu1 %5332 }
0x3499   :  { %v5337_v28 = vmul.f32 %v5333_v45, %v5325_v63  ;;  %v5331_v13 = vpop.permute.xlu0 %5330 }
0x349a   :  { %v5336_v60 = vmul.f32 %v5331_v13, %v5324_v57 }
0x349b   :  { %5342 = vrot.lane.b32.xlu1 %v5337_v28, %s6936_s11 }
0x349c   :  { %5340 = vrot.lane.b32.xlu0 %v5336_v60, %s6936_s11 }
0x34d3   :  { %v6372_v17 = vpop.f32.mrb[72].mxu1 }
0x34d4   :  { %v5558_v7 = vpop.f32.mrb[73].mxu1  ;;  %v5564_v34 = vadd.f32 %v6372_v17, %v7913_v24 }
0x34d5   :  { %v5559_v58 = vadd.f32 %v7913_v24, %v5558_v7 }
0x350d   :  { %v5343_v4 = vpop.permute.xlu1 %5342 }
0x350e   :  { %v5347_v38 = vadd.f32 %v5343_v4, %v5327_v59  ;;  %v5341_v54 = vpop.permute.xlu0 %5340 }
0x350f   :  { %v5346_v10 = vadd.f32 %v5341_v54, %v5326_v42 }
0x3510   :  { %6891 = vtanh.f32 %v5347_v38 }
0x3511   :  { %6893 = vtanh.f32 %v5346_v10 }
0x351a   :  { %v6892_v43 = vpop.eup %6891 }
0x351b   :  { %v6894_v39 = vpop.eup %6893  ;;  %5354 = vrot.lane.b32.xlu1 %v6892_v43, %s6935_s30 }
0x351c   :  { %5352 = vrot.lane.b32.xlu0 %v6894_v39, %s6935_s30 }
0x358d   :  { %v5355_v44 = vpop.permute.xlu1 %5354 }
0x358e   :  { %v8138_v51 = vmul.f32 %v5355_v44, %v5325_v63  ;;  %v5353_v3 = vpop.permute.xlu0 %5352 }
0x358f   :  { %v8140_v25 = vmul.f32 %v5353_v3, %v5324_v57 }
0x3590   :  { %5374 = vrot.lane.b32.xlu1 %v8138_v51, %s6935_s30 }
0x3591   :  { %5372 = vrot.lane.b32.xlu0 %v8140_v25, %s6935_s30 }
0x3602   :  { %v5375_v53 = vpop.permute.xlu1 %5374 }
0x3603   :  { %v5373_v29 = vpop.permute.xlu0 %5372  ;;  %v5379_v55 = vsel %vm376_vm2, %v8098_v27, %v5375_v53 }
0x3604   :  { %v5378_v15 = vsel %vm376_vm2, %v8094_v62, %v5373_v29 }
0x3605   :  { %5789 = vmatmul.mubr.msk.f32.vlgmr.msra.gmra.mrb[54].mxu0 %vm1666_vm6, %v5378_v15 }
0x3606   :  { %5471 = vmatprep.mubr.f32.mxu0 %v6933_v52 }
0x3609   :  { %5790 = vmatmul.mubr.msk.f32.gmra.mrb[56].mxu0 %vm1666_vm6, %v5379_v55 }
0x36d8   :  { %v5468_v19 = vpop.f32.mrb[54].mxu0 }
0x36d9   :  { %v5469_v2 = vpop.f32.mrb[55].mxu0 }
0x36da   :  { %v5567_v12 = vadd.f32 %v5559_v58, %v5469_v2 }
0x36dc   :  { %v5569_v26 = vmul.f32 %v5567_v12, %v7294_v5  ;;  %v5473_v62 = vpop.f32.mrb[56].mxu0 }
0x36dd   :  { %v5474_v61 = vpop.f32.mrb[57].mxu0 }
0x36de   :  { %v5571_v21 = vsub.f32 0.0, %v5569_v26  ;;  %v5568_v41 = vadd.f32 %v5564_v34, %v5474_v61 }
0x36e0   :  { %v5573_v20 = vmul.f32 1.442695, %v5571_v21  ;;  %v5570_v52 = vmul.f32 %v5568_v41, %v7294_v5 }
0x36e2   :  { %6895 = vpow2.f32 %v5573_v20  ;;  %v5572_v27 = vsub.f32 0.0, %v5570_v52 }
0x36e4   :  { %v5575_v18 = vmul.f32 1.442695, %v5572_v27 }
0x36e6   :  { %6897 = vpow2.f32 %v5575_v18 }
0x36ec   :  { %v6896_v33 = vpop.eup %6895 }
0x36ed   :  { %v5577_v30 = vadd.f32 1.0, %v6896_v33 }
0x36ef   :  { %6899 = vrcp.f32 %v5577_v30 }
0x36f0   :  { %v6898_v22 = vpop.eup %6897 }
0x36f1   :  { %v5578_v35 = vadd.f32 1.0, %v6898_v22 }
0x36f3   :  { %6901 = vrcp.f32 %v5578_v35 }
0x36f9   :  { %v6900_v24 = vpop.eup %6899 }
0x36fa   :  { %v5581_v36 = vmul.f32 %v6900_v24, %v7294_v5 }
0x36fc   :  { %v5583_v49 = vadd.f32 %v5581_v36, %v7303_v32 }
0x36fd   :  { %v6902_v1 = vpop.eup %6901 }
0x36fe   :  { %5589 = vrot.lane.b32.xlu0 %v5583_v49, %s6935_s30  ;;  %v5582_v31 = vmul.f32 %v6902_v1, %v7294_v5  ;;  %v5585_v45 = vmul.f32 %v5583_v49, %v5346_v10 }
0x3700   :  { %v5584_v6 = vadd.f32 %v5582_v31, %v7303_v32 }
0x3702   :  { %5591 = vrot.lane.b32.xlu1 %v5584_v6, %s6935_s30  ;;  %v5586_v60 = vmul.f32 %v5584_v6, %v5347_v38 }
0x3770   :  { %v5590_v37 = vpop.permute.xlu0 %5589 }
0x3771   :  { %v5595_v0 = vmul.f32 %v5590_v37, %v5583_v49 }
0x3773   :  { %5599 = vrot.lane.b32.xlu0 %v5595_v0, %s6936_s11 }
0x3774   :  { %v5592_v63 = vpop.permute.xlu1 %5591 }
0x3775   :  { %v5596_v57 = vmul.f32 %v5592_v63, %v5584_v6 }
0x3777   :  { %5601 = vrot.lane.b32.xlu1 %v5596_v57, %s6936_s11 }
0x37e5   :  { %v5600_v28 = vpop.permute.xlu0 %5599 }
0x37e6   :  { %v5605_v13 = vadd.f32 %v5600_v28, %v5585_v45 }
0x37e8   :  { %6903 = vtanh.f32 %v5605_v13 }
0x37e9   :  { %v5602_v17 = vpop.permute.xlu1 %5601 }
0x37ea   :  { %v5606_v7 = vadd.f32 %v5602_v17, %v5586_v60 }
0x37ec   :  { %6905 = vtanh.f32 %v5606_v7 }
0x37f2   :  { %v6904_v5 = vpop.eup %6903 }
0x37f3   :  { %5611 = vrot.lane.b32.xlu0 %v6904_v5, %s6935_s30 }
0x37f6   :  { %v6906_v32 = vpop.eup %6905 }
0x37f7   :  { %2428 = vrot.lane.b32.xlu0 %v7479_v50, %s6936_s11  ;;  %5613 = vrot.lane.b32.xlu1 %v6906_v32, %s6935_s30  ;;  %s5634_s30 = sshll.u32 %s6937_s0, 4  ;;  %s5635_s30 = int_to_ptr.vmem [resolvable:$true] %s5634_s30 }
0x37f8   :  { %p6913_p1 = scmp.lt.s32.totalorder %s5635_s30, %s5635_s30 }
0x37fb   :  { %2917 = vrot.lane.b32.xlu0 %v7583_v11, %s6936_s11  ;;  %2430 = vrot.lane.b32.xlu1 %v7477_v16, %s6936_s11 }
0x37ff   :  { %3406 = vrot.lane.b32.xlu0 %v7691_v56, %s6936_s11  ;;  %2919 = vrot.lane.b32.xlu1 %v7581_v8, %s6936_s11 }
0x3803   :  { %3895 = vrot.lane.b32.xlu0 %v7800_v48, %s6936_s11  ;;  %3408 = vrot.lane.b32.xlu1 %v7689_v46, %s6936_s11 }
0x3807   :  { %4384 = vrot.lane.b32.xlu0 %v7941_v9, %s6936_s11  ;;  %3897 = vrot.lane.b32.xlu1 %v7798_v40, %s6936_s11 }
0x380b   :  { %4873 = vrot.lane.b32.xlu0 %v8049_v14, %s6936_s11  ;;  %4386 = vrot.lane.b32.xlu1 %v7939_v47, %s6936_s11 }
0x380f   :  { %5362 = vrot.lane.b32.xlu0 %v8140_v25, %s6936_s11  ;;  %4875 = vrot.lane.b32.xlu1 %v8047_v23, %s6936_s11 }
0x3813   :  { %5364 = vrot.lane.b32.xlu1 %v8138_v51, %s6936_s11 }
0x3865   :  { %v5612_v16 = vpop.permute.xlu0 %5611 }
0x3866   :  { %v5617_v50 = vmul.f32 %v5612_v16, %v5583_v49 }
0x3868   :  { %5621 = vrot.lane.b32.xlu0 %v5617_v50, %s6936_s11 }
0x3869   :  { %v2429_v8 = vpop.permute.xlu0 %2428  ;;  %v5614_v11 = vpop.permute.xlu1 %5613 }
0x386a   :  { %2434 = vst.msk [vmem:[#allocation4] sm:$0xff] %vm376_vm2, %v2429_v8  ;;  %v5618_v46 = vmul.f32 %v5614_v11, %v5584_v6 }
0x386c   :  { %5623 = vrot.lane.b32.xlu1 %v5618_v46, %s6936_s11  ;;  %s6908_s11 = scalar_lea.vmem %s5635_s30, 2048 }
0x386d   :  { %v2918_v56 = vpop.permute.xlu0 %2917  ;;  %v2431_v40 = vpop.permute.xlu1 %2430  ;;  %p6909_p0 = scmp.ne.s32.totalorder %s5635_s30, %s6908_s11  ;;  %p6914_p2 = scmp.lt.s32.totalorder %s6908_s11, %s6908_s11 }
0x386e   :  { %2923 = vst.msk [vmem:[#allocation4 + $0x10] sm:$0xff] %vm376_vm2, %v2918_v56  ;;  %2435 = vst.msk [vmem:[#allocation4 + $0x8] sm:$0xff] %vm376_vm2, %v2431_v40 }
0x386f   :  { %p6915_p3 = por %p6914_p2, %p6913_p1 }
0x3871   :  { %v3407_v48 = vpop.permute.xlu0 %3406  ;;  %v2920_v47 = vpop.permute.xlu1 %2919  ;;  %p6916_p4 = pnand %p6915_p3, %p6909_p0 }
0x3872   :  { %3412 = vst.msk [vmem:[#allocation4 + $0x20] sm:$0xff] %vm376_vm2, %v3407_v48  ;;  %2924 = vst.msk [vmem:[#allocation4 + $0x18] sm:$0xff] %vm376_vm2, %v2920_v47 }
0x3875   :  { %v3896_v9 = vpop.permute.xlu0 %3895  ;;  %v3409_v23 = vpop.permute.xlu1 %3408 }
0x3876   :  { %3901 = vst.msk [vmem:[#allocation4 + $0x30] sm:$0xff] %vm376_vm2, %v3896_v9  ;;  %3413 = vst.msk [vmem:[#allocation4 + $0x28] sm:$0xff] %vm376_vm2, %v3409_v23 }
0x3879   :  { %v4385_v14 = vpop.permute.xlu0 %4384  ;;  %v3898_v59 = vpop.permute.xlu1 %3897 }
0x387a   :  { %4390 = vst.msk [vmem:[#allocation4 + $0x40] sm:$0xff] %vm376_vm2, %v4385_v14  ;;  %3902 = vst.msk [vmem:[#allocation4 + $0x38] sm:$0xff] %vm376_vm2, %v3898_v59 }
0x387d   :  { %v4874_v4 = vpop.permute.xlu0 %4873  ;;  %v4387_v42 = vpop.permute.xlu1 %4386 }
0x387e   :  { %4879 = vst.msk [vmem:[#allocation4 + $0x50] sm:$0xff] %vm376_vm2, %v4874_v4  ;;  %4391 = vst.msk [vmem:[#allocation4 + $0x48] sm:$0xff] %vm376_vm2, %v4387_v42 }
0x3881   :  { %v5363_v38 = vpop.permute.xlu0 %5362  ;;  %v4876_v54 = vpop.permute.xlu1 %4875 }
0x3882   :  { %5368 = vst.msk [vmem:[#allocation4 + $0x60] sm:$0xff] %vm376_vm2, %v5363_v38  ;;  %4880 = vst.msk [vmem:[#allocation4 + $0x58] sm:$0xff] %vm376_vm2, %v4876_v54 }
0x3885   :  { %v5365_v10 = vpop.permute.xlu1 %5364 }
0x3886   :  { %5369 = vst.msk [vmem:[#allocation4 + $0x68] sm:$0xff] %vm376_vm2, %v5365_v10 }
0x38da   :  { %v5622_v43 = vpop.permute.xlu0 %5621 }
0x38db   :  { %5627 = vst.msk [vmem:[#allocation4 + $0x70] sm:$0xff] %vm376_vm2, %v5622_v43 }
0x38de   :  { %v5624_v39 = vpop.permute.xlu1 %5623 }
0x38df   :  { %5628 = vst.msk [vmem:[#allocation4 + $0x78] sm:$0xff] %vm376_vm2, %v5624_v39 }
0x38e0   :  { %6919 = shalt.err (!%p6916_p4)
}
0x38e1   :  { %s6920_s17 = scalar_lea.hbm %s8235_s10, 2048 }
0x38e2   :  { %p6921_p5 = scmp.ne.s32.totalorder %s8235_s10, %s6920_s17  ;;  %p6924_p6 = scmp.lt.u32.totalorder %s6920_s17, %s8235_s10 }
0x38e4   :  { %p6926_p7 = pnand %p6924_p6, %p6921_p5 }
0x38e6   :  { %6929 = shalt.err (!%p6926_p7)
}
0x38e7   :  { %s6938_s1 = smov 128   ;;  %s6939_s21 = smov 8  }
0x38e8   :  { %5640 = dma.vmem_to_hbm [thread:$0]  %s5635_s30, 2048, %s8235_s10, [#allocation5], %s6938_s1, %s6938_s1, %s6939_s21  }
0x38e9   :  { %6930 = dma.done.wait [#allocation5], 2048  }
0x38ea   :  { %6931 = vsyncadd [#allocation5], 4294965248 }
0x38eb   :  { %5644 = vsyncpa [#allocation5], 1 }

</bundles_post_ra>
